<compile_context>
chip_gen: v6e
topology: v6e:2x2x1
jax: 0.10.0
libtpu: 0.0.40
codegen_flags: <defaults>
</compile_context>

<pallas_src>
import functools
import math

import jax
import jax.numpy as jnp
from jax.experimental import pallas as pl
from jax.experimental.pallas import tpu as pltpu

# Pin matmul precision so the in-kernel dots and the pure-JAX reference use the
# same (full-f32 effective) accumulation strategy on TPU.
jax.config.update("jax_default_matmul_precision", "highest")


# ----------------------------------------------------------------------------
# In-kernel helpers
# ----------------------------------------------------------------------------
def _layernorm(x, gamma, beta, eps=1e-6):
    # Matches the custom torch LayerNorm: unbiased std (N-1), eps added to std.
    n = x.shape[-1]
    mean = jnp.mean(x, axis=-1, keepdims=True)
    d = x - mean
    var = jnp.sum(d * d, axis=-1, keepdims=True) / (n - 1)
    std = jnp.sqrt(var)
    return gamma * (d / (std + eps)) + beta


# ----------------------------------------------------------------------------
# Fused per-(batch, layer) kernel.  grid = (B, L); the activation h is carried
# across the L axis in a persistent VMEM scratch.
# ----------------------------------------------------------------------------
def _encoder_layer_kernel(x_ref, pe_ref,
                          wq_ref, wk_ref, wv_ref, wfc_ref, ln1g_ref, ln1b_ref,
                          w1_ref, w2_ref, w3_ref, ln2g_ref, ln2b_ref,
                          out_ref, attn_ref,
                          h_ref,
                          *, n_heads, d_k, d_v, mxu_dtype):
    l = pl.program_id(1)
    S, D = h_ref.shape

    @pl.when(l == 0)
    def _():
        # positional-encoding add (dropout is identity in inference)
        h_ref[...] = x_ref[0] + pe_ref[...]

    h0 = h_ref[...]                                        # (S, D) f32
    hm = h0.astype(mxu_dtype)

    # ---------------- multi-head self-attention ----------------
    # lane-dense combined projections: (S, D) @ (D, H*dk)
    q = jnp.dot(hm, wq_ref[0].astype(mxu_dtype),
                preferred_element_type=jnp.float32)        # (S, H*dk)
    k = jnp.dot(hm, wk_ref[0].astype(mxu_dtype),
                preferred_element_type=jnp.float32)        # (S, H*dk)
    v = jnp.dot(hm, wv_ref[0].astype(mxu_dtype),
                preferred_element_type=jnp.float32)        # (S, H*dv)

    # head axis only where the attention math truly needs it (scores, p@V)
    qh = q.reshape(S, n_heads, d_k)
    kh = k.reshape(S, n_heads, d_k)
    vh = v.reshape(S, n_heads, d_v)

    s = jnp.einsum("qhd,khd->hqk", qh.astype(mxu_dtype), kh.astype(mxu_dtype),
                   preferred_element_type=jnp.float32) / math.sqrt(d_k)  # (H,S,S)
    s = s - jnp.max(s, axis=-1, keepdims=True)
    e = jnp.exp(s)
    p = e / jnp.sum(e, axis=-1, keepdims=True)             # exact (user-visible)
    attn_ref[0, 0] = p

    ctx = jnp.einsum("hqk,khd->qhd", p.astype(mxu_dtype), vh.astype(mxu_dtype),
                     preferred_element_type=jnp.float32)   # (S, H, dv)
    # single lane-dense output projection: (S, H*dv) @ (H*dv, D)
    o = jnp.dot(ctx.reshape(S, n_heads * d_v).astype(mxu_dtype),
                wfc_ref[0].astype(mxu_dtype),
                preferred_element_type=jnp.float32)        # (S, D)
    h1 = _layernorm(o + h0, ln1g_ref[0], ln1b_ref[0])

    # ---------------- position-wise FFN ----------------
    f = jnp.maximum(jnp.dot(h1.astype(mxu_dtype), w1_ref[0].astype(mxu_dtype),
                            preferred_element_type=jnp.float32), 0.0)
    f = jnp.maximum(jnp.dot(f.astype(mxu_dtype), w2_ref[0].astype(mxu_dtype),
                            preferred_element_type=jnp.float32), 0.0)
    f = jnp.dot(f.astype(mxu_dtype), w3_ref[0].astype(mxu_dtype),
                preferred_element_type=jnp.float32)
    h2 = _layernorm(f + h1, ln2g_ref[0], ln2b_ref[0])

    h_ref[...] = h2                                        # carry to next layer

    @pl.when(l == pl.num_programs(1) - 1)
    def _():
        out_ref[0] = h2


# ----------------------------------------------------------------------------
# Wrapper
# ----------------------------------------------------------------------------
def encoder_forward(x, pe, layer_params, *, n_heads, d_k, d_v,
                    mxu_dtype=jnp.float32):
    B, S, D = x.shape
    L = len(layer_params)

    # Stack per-layer weights along a leading L axis; they are blocked per
    # layer by the grid's L axis.  Weights stay [in_features, out_features] so
    # every projection is a single lane-dense matmul.
    wq = jnp.stack([p["wq"] for p in layer_params])        # (L, D, H*dk)
    wk = jnp.stack([p["wk"] for p in layer_params])        # (L, D, H*dk)
    wv = jnp.stack([p["wv"] for p in layer_params])        # (L, D, H*dv)
    wfc = jnp.stack([p["wfc"] for p in layer_params])      # (L, H*dv, D)
    ln1g = jnp.stack([p["ln1_g"] for p in layer_params])   # (L, 1, D)
    ln1b = jnp.stack([p["ln1_b"] for p in layer_params])
    w1 = jnp.stack([p["w1"] for p in layer_params])        # (L, D, dff)
    w2 = jnp.stack([p["w2"] for p in layer_params])        # (L, dff, dff)
    w3 = jnp.stack([p["w3"] for p in layer_params])        # (L, dff, D)
    ln2g = jnp.stack([p["ln2_g"] for p in layer_params])
    ln2b = jnp.stack([p["ln2_b"] for p in layer_params])
    pe2d = pe[0, :S, :]                                    # (S, D)

    def per_layer_spec(arr):
        nd = arr.ndim
        blk = (1,) + arr.shape[1:]
        return pl.BlockSpec(blk, lambda b, l, _nd=nd: (l,) + (0,) * (_nd - 1))

    weights = (wq, wk, wv, wfc, ln1g, ln1b, w1, w2, w3, ln2g, ln2b)

    in_specs = ([pl.BlockSpec((1, S, D), lambda b, l: (b, 0, 0)),   # x
                 pl.BlockSpec((S, D), lambda b, l: (0, 0))]         # pe
                + [per_layer_spec(w) for w in weights])

    out_specs = (pl.BlockSpec((1, S, D), lambda b, l: (b, 0, 0)),
                 pl.BlockSpec((1, 1, n_heads, S, S),
                              lambda b, l: (b, l, 0, 0, 0)))

    kern = functools.partial(_encoder_layer_kernel, n_heads=n_heads,
                             d_k=d_k, d_v=d_v, mxu_dtype=mxu_dtype)

    out, attn = pl.pallas_call(
        kern,
        grid=(B, L),
        out_shape=(jax.ShapeDtypeStruct((B, S, D), jnp.float32),
                   jax.ShapeDtypeStruct((B, L, n_heads, S, S), jnp.float32)),
        in_specs=in_specs,
        out_specs=out_specs,
        scratch_shapes=[pltpu.VMEM((S, D), jnp.float32)],   # activation carry
        compiler_params=pltpu.CompilerParams(
            dimension_semantics=("parallel", "arbitrary")),
    )(x, pe2d, *weights)

    # list of per-layer attention maps (B, H, S, S), matching the torch module
    return out, [attn[:, l] for l in range(L)]


# ----------------------------------------------------------------------------
# Pure-JAX reference (for correctness check)
# ----------------------------------------------------------------------------
def _ref_ln(x, g, b, eps=1e-6):
    n = x.shape[-1]
    mean = jnp.mean(x, axis=-1, keepdims=True)
    d = x - mean
    std = jnp.sqrt(jnp.sum(d * d, axis=-1, keepdims=True) / (n - 1))
    return g[0] * d / (std + eps) + b[0]


def ref_encoder(x, pe, layer_params, *, n_heads, d_k, d_v):
    B, S, D = x.shape
    h = x + pe[:, :S, :]
    attns = []
    for p in layer_params:
        res = h
        Q = (h @ p["wq"]).reshape(B, S, n_heads, d_k).transpose(0, 2, 1, 3)
        K = (h @ p["wk"]).reshape(B, S, n_heads, d_k).transpose(0, 2, 1, 3)
        V = (h @ p["wv"]).reshape(B, S, n_heads, d_v).transpose(0, 2, 1, 3)
        s = jnp.einsum("bhqd,bhkd->bhqk", Q, K) / math.sqrt(d_k)
        a = jax.nn.softmax(s, axis=-1)
        ctx = jnp.einsum("bhqk,bhkd->bhqd", a, V).transpose(0, 2, 1, 3).reshape(
            B, S, n_heads * d_v)
        h = _ref_ln(ctx @ p["wfc"] + res, p["ln1_g"], p["ln1_b"])
        res2 = h
        f = jnp.maximum(h @ p["w1"], 0.0)
        f = jnp.maximum(f @ p["w2"], 0.0)
        f = f @ p["w3"]
        h = _ref_ln(f + res2, p["ln2_g"], p["ln2_b"])
        attns.append(a)
    return h, attns


# ----------------------------------------------------------------------------
# Parameter / input construction
# ----------------------------------------------------------------------------
def make_pe(max_len, d_model):
    position = jnp.arange(0.0, max_len, dtype=jnp.float32)[:, None]
    div_term = jnp.exp(jnp.arange(0.0, d_model, 2.0, dtype=jnp.float32)
                       * -(math.log(10000.0) / d_model))
    pe = jnp.zeros((max_len, d_model), jnp.float32)
    pe = pe.at[:, 0::2].set(jnp.sin(position * div_term))
    pe = pe.at[:, 1::2].set(jnp.cos(position * div_term))
    return pe[None]  # (1, max_len, d_model)


def init_linear(key, fan_in, fan_out):
    # deterministic synthetic init; stored as [in, out] (transposed vs nn.Linear)
    bound = 1.0 / math.sqrt(fan_in)
    return jax.random.uniform(key, (fan_in, fan_out), jnp.float32, -bound, bound)


def init_layer(key, d_model, d_k, n_heads, d_v, d_ff):
    ks = jax.random.split(key, 7)
    return {
        "wq": init_linear(ks[0], d_model, d_k * n_heads),
        "wk": init_linear(ks[1], d_model, d_k * n_heads),
        "wv": init_linear(ks[2], d_model, d_v * n_heads),
        "wfc": init_linear(ks[3], n_heads * d_v, d_model),
        "ln1_g": jnp.ones((1, d_model), jnp.float32),
        "ln1_b": jnp.zeros((1, d_model), jnp.float32),
        "w1": init_linear(ks[4], d_model, d_ff),
        "w2": init_linear(ks[5], d_ff, d_ff),
        "w3": init_linear(ks[6], d_ff, d_model),
        "ln2_g": jnp.ones((1, d_model), jnp.float32),
        "ln2_b": jnp.zeros((1, d_model), jnp.float32),
    }


if __name__ == "__main__":
    # Small shapes consistent with the module's forward
    B, S = 2, 8
    d_model, d_k, n_heads, d_v, d_ff = 32, 8, 4, 8, 64
    n_layers, max_len = 2, 16

    key = jax.random.PRNGKey(0)
    kx, *klayers = jax.random.split(key, 1 + n_layers)

    x = jax.random.normal(kx, (B, S, d_model), jnp.float32)
    pe = make_pe(max_len, d_model)
    params = [init_layer(k, d_model, d_k, n_heads, d_v, d_ff) for k in klayers]

    out, attns = encoder_forward(x, pe, params, n_heads=n_heads, d_k=d_k, d_v=d_v)
    out = jax.block_until_ready(out)
    attns = [jax.block_until_ready(a) for a in attns]

    # correctness check vs pure-JAX reference (exact softmax / LayerNorm math,
    # f32 matmuls at HIGHEST precision on both sides)
    ref_out, ref_attns = ref_encoder(x, pe, params, n_heads=n_heads, d_k=d_k, d_v=d_v)
    assert jnp.allclose(out, ref_out, rtol=2e-3, atol=2e-3), "output mismatch"
    for a, ra in zip(attns, ref_attns):
        assert jnp.allclose(a, ra, rtol=2e-3, atol=2e-3), "attention mismatch"

    print("KERNEL_OK")
</pallas_src>

<mosaic_0001>
module attributes {stable_mosaic.version = 11 : i64} {
  func.func @_encoder_layer_kernel(%arg0: i32, %arg1: i32, %arg2: memref<1x8x32xf32, #tpu.memory_space<vmem>>, %arg3: memref<8x32xf32, #tpu.memory_space<vmem>>, %arg4: memref<1x32x32xf32, #tpu.memory_space<vmem>>, %arg5: memref<1x32x32xf32, #tpu.memory_space<vmem>>, %arg6: memref<1x32x32xf32, #tpu.memory_space<vmem>>, %arg7: memref<1x32x32xf32, #tpu.memory_space<vmem>>, %arg8: memref<1x1x32xf32, #tpu.memory_space<vmem>>, %arg9: memref<1x1x32xf32, #tpu.memory_space<vmem>>, %arg10: memref<1x32x64xf32, #tpu.memory_space<vmem>>, %arg11: memref<1x64x64xf32, #tpu.memory_space<vmem>>, %arg12: memref<1x64x32xf32, #tpu.memory_space<vmem>>, %arg13: memref<1x1x32xf32, #tpu.memory_space<vmem>>, %arg14: memref<1x1x32xf32, #tpu.memory_space<vmem>>, %arg15: memref<1x8x32xf32, #tpu.memory_space<vmem>>, %arg16: memref<1x1x4x8x8xf32, #tpu.memory_space<vmem>>, %arg17: memref<8x32xf32, #tpu.memory_space<vmem>>) attributes {dimension_semantics = [#tpu.dimension_semantics<parallel>, #tpu.dimension_semantics<arbitrary>], iteration_bounds = array<i64: 2, 2>, scalar_prefetch = 0 : i64, scratch_operands = 1 : i64, tpu.core_type = #tpu.core_type<tc>, window_params = [{transform_indices = @transform_0, window_bounds = array<i64: 1, 8, 32>}, {pipeline_mode = #tpu.pipeline_mode<synchronous>, transform_indices = @transform_1, window_bounds = array<i64: 8, 32>}, {transform_indices = @transform_2, window_bounds = array<i64: 1, 32, 32>}, {transform_indices = @transform_3, window_bounds = array<i64: 1, 32, 32>}, {transform_indices = @transform_4, window_bounds = array<i64: 1, 32, 32>}, {transform_indices = @transform_5, window_bounds = array<i64: 1, 32, 32>}, {transform_indices = @transform_6, window_bounds = array<i64: 1, 1, 32>}, {transform_indices = @transform_7, window_bounds = array<i64: 1, 1, 32>}, {transform_indices = @transform_8, window_bounds = array<i64: 1, 32, 64>}, {transform_indices = @transform_9, window_bounds = array<i64: 1, 64, 64>}, {transform_indices = @transform_10, window_bounds = array<i64: 1, 64, 32>}, {transform_indices = @transform_11, window_bounds = array<i64: 1, 1, 32>}, {transform_indices = @transform_12, window_bounds = array<i64: 1, 1, 32>}, {transform_indices = @transform_13, window_bounds = array<i64: 1, 8, 32>}, {transform_indices = @transform_14, window_bounds = array<i64: 1, 1, 4, 8, 8>}]} {
    %c0_i32 = arith.constant 0 : i32
    %0 = arith.cmpi eq, %arg1, %c0_i32 : i32
    %1 = arith.extui %0 : i1 to i32
    %c0_i32_0 = arith.constant 0 : i32
    %2 = arith.cmpi ne, %1, %c0_i32_0 : i32
    scf.if %2 {
      %c0_66 = arith.constant 0 : index
      %c0_67 = arith.constant 0 : index
      %c0_68 = arith.constant 0 : index
      %104 = vector.load %arg2[%c0_66, %c0_67, %c0_68] : memref<1x8x32xf32, #tpu.memory_space<vmem>>, vector<1x8x32xf32>
      %105 = vector.shape_cast %104 : vector<1x8x32xf32> to vector<8x32xf32>
      %c0_69 = arith.constant 0 : index
      %c0_70 = arith.constant 0 : index
      %106 = vector.load %arg3[%c0_69, %c0_70] : memref<8x32xf32, #tpu.memory_space<vmem>>, vector<8x32xf32>
      %107 = arith.addf %105, %106 : vector<8x32xf32>
      %c0_71 = arith.constant 0 : index
      %c0_72 = arith.constant 0 : index
      %108 = vector.load %arg17[%c0_71, %c0_72] : memref<8x32xf32, #tpu.memory_space<vmem>>, vector<8x32xf32>
      tpu.vector_store %arg17[%c0_71, %c0_72], %107 {strides = array<i32>} : memref<8x32xf32, #tpu.memory_space<vmem>>, vector<8x32xf32>,
    } else {
    }
    %c0 = arith.constant 0 : index
    %c0_1 = arith.constant 0 : index
    %3 = vector.load %arg17[%c0, %c0_1] : memref<8x32xf32, #tpu.memory_space<vmem>>, vector<8x32xf32>
    %c0_2 = arith.constant 0 : index
    %c0_3 = arith.constant 0 : index
    %c0_4 = arith.constant 0 : index
    %4 = vector.load %arg4[%c0_2, %c0_3, %c0_4] : memref<1x32x32xf32, #tpu.memory_space<vmem>>, vector<1x32x32xf32>
    %5 = vector.shape_cast %4 : vector<1x32x32xf32> to vector<32x32xf32>
    %cst = arith.constant dense<0.000000e+00> : vector<8x32xf32>
    %6 = tpu.matmul %3, %5, %cst {dimension_numbers = #tpu.dot_dimension_numbers<[1], [0], [0], [1], [0, 0, 1, 1], [], []>, precision = #tpu.contract_precision<fp32>} : vector<8x32xf32>, vector<32x32xf32>, vector<8x32xf32> -> vector<8x32xf32>
    %c0_5 = arith.constant 0 : index
    %c0_6 = arith.constant 0 : index
    %c0_7 = arith.constant 0 : index
    %7 = vector.load %arg5[%c0_5, %c0_6, %c0_7] : memref<1x32x32xf32, #tpu.memory_space<vmem>>, vector<1x32x32xf32>
    %8 = vector.shape_cast %7 : vector<1x32x32xf32> to vector<32x32xf32>
    %cst_8 = arith.constant dense<0.000000e+00> : vector<8x32xf32>
    %9 = tpu.matmul %3, %8, %cst_8 {dimension_numbers = #tpu.dot_dimension_numbers<[1], [0], [0], [1], [0, 0, 1, 1], [], []>, precision = #tpu.contract_precision<fp32>} : vector<8x32xf32>, vector<32x32xf32>, vector<8x32xf32> -> vector<8x32xf32>
    %c0_9 = arith.constant 0 : index
    %c0_10 = arith.constant 0 : index
    %c0_11 = arith.constant 0 : index
    %10 = vector.load %arg6[%c0_9, %c0_10, %c0_11] : memref<1x32x32xf32, #tpu.memory_space<vmem>>, vector<1x32x32xf32>
    %11 = vector.shape_cast %10 : vector<1x32x32xf32> to vector<32x32xf32>
    %cst_12 = arith.constant dense<0.000000e+00> : vector<8x32xf32>
    %12 = tpu.matmul %3, %11, %cst_12 {dimension_numbers = #tpu.dot_dimension_numbers<[1], [0], [0], [1], [0, 0, 1, 1], [], []>, precision = #tpu.contract_precision<fp32>} : vector<8x32xf32>, vector<32x32xf32>, vector<8x32xf32> -> vector<8x32xf32>
    %13 = vector.shape_cast %6 : vector<8x32xf32> to vector<8x4x8xf32>
    %14 = vector.shape_cast %9 : vector<8x32xf32> to vector<8x4x8xf32>
    %15 = vector.shape_cast %12 : vector<8x32xf32> to vector<8x4x8xf32>
    "tpu.trace_start"() <{level = 10 : i32, message = "qhd,khd->hqk"}> : () -> ()
    %cst_13 = arith.constant dense<0.000000e+00> : vector<4x8x8xf32>
    %16 = tpu.matmul %13, %14, %cst_13 {dimension_numbers = #tpu.dot_dimension_numbers<[2], [2], [0], [0], [0, 1, 0, 0, 1, 0], [1], [1]>, precision = #tpu.contract_precision<fp32>} : vector<8x4x8xf32>, vector<8x4x8xf32>, vector<4x8x8xf32> -> vector<4x8x8xf32>
    "tpu.trace_stop"() : () -> ()
    %cst_14 = arith.constant 2.82842708 : f32
    %17 = vector.broadcast %cst_14 : f32 to vector<4x8x8xf32>
    %18 = arith.divf %16, %17 : vector<4x8x8xf32>
    %cst_15 = arith.constant dense<0xFF800000> : vector<4x8xf32>
    %19 = vector.multi_reduction <maximumf>, %18, %cst_15 [2] : vector<4x8x8xf32> to vector<4x8xf32>
    %20 = vector.shape_cast %19 : vector<4x8xf32> to vector<4x8x1xf32>
    %21 = vector.broadcast %20 : vector<4x8x1xf32> to vector<4x8x8xf32>
    %22 = arith.subf %18, %21 : vector<4x8x8xf32>
    %23 = math.exp %22 : vector<4x8x8xf32>
    %cst_16 = arith.constant dense<0.000000e+00> : vector<4x8xf32>
    %24 = vector.multi_reduction <add>, %23, %cst_16 [2] : vector<4x8x8xf32> to vector<4x8xf32>
    %25 = vector.shape_cast %24 : vector<4x8xf32> to vector<4x8x1xf32>
    %26 = vector.broadcast %25 : vector<4x8x1xf32> to vector<4x8x8xf32>
    %27 = arith.divf %23, %26 : vector<4x8x8xf32>
    %c0_17 = arith.constant 0 : index
    %c0_18 = arith.constant 0 : index
    %c0_19 = arith.constant 0 : index
    %c0_20 = arith.constant 0 : index
    %c0_21 = arith.constant 0 : index
    %28 = vector.load %arg16[%c0_17, %c0_18, %c0_19, %c0_20, %c0_21] : memref<1x1x4x8x8xf32, #tpu.memory_space<vmem>>, vector<1x1x4x8x8xf32>
    %29 = vector.shape_cast %28 : vector<1x1x4x8x8xf32> to vector<4x8x8xf32>
    %30 = vector.shape_cast %27 : vector<4x8x8xf32> to vector<1x1x4x8x8xf32>
    tpu.vector_store %arg16[%c0_17, %c0_18, %c0_19, %c0_20, %c0_21], %30 {strides = array<i32>} : memref<1x1x4x8x8xf32, #tpu.memory_space<vmem>>, vector<1x1x4x8x8xf32>,
    "tpu.trace_start"() <{level = 10 : i32, message = "hqk,khd->qhd"}> : () -> ()
    %cst_22 = arith.constant dense<0.000000e+00> : vector<4x8x8xf32>
    %31 = tpu.matmul %15, %27, %cst_22 {dimension_numbers = #tpu.dot_dimension_numbers<[0], [2], [2], [1], [0, 1, 0, 2, 1, 1], [1], [0]>, precision = #tpu.contract_precision<fp32>} : vector<8x4x8xf32>, vector<4x8x8xf32>, vector<4x8x8xf32> -> vector<4x8x8xf32>
    %32 = tpu.transpose %31, [2, 0, 1] : vector<4x8x8xf32> -> vector<8x4x8xf32>
    "tpu.trace_stop"() : () -> ()
    %33 = vector.shape_cast %32 : vector<8x4x8xf32> to vector<8x32xf32>
    %c0_23 = arith.constant 0 : index
    %c0_24 = arith.constant 0 : index
    %c0_25 = arith.constant 0 : index
    %34 = vector.load %arg7[%c0_23, %c0_24, %c0_25] : memref<1x32x32xf32, #tpu.memory_space<vmem>>, vector<1x32x32xf32>
    %35 = vector.shape_cast %34 : vector<1x32x32xf32> to vector<32x32xf32>
    %cst_26 = arith.constant dense<0.000000e+00> : vector<8x32xf32>
    %36 = tpu.matmul %33, %35, %cst_26 {dimension_numbers = #tpu.dot_dimension_numbers<[1], [0], [0], [1], [0, 0, 1, 1], [], []>, precision = #tpu.contract_precision<fp32>} : vector<8x32xf32>, vector<32x32xf32>, vector<8x32xf32> -> vector<8x32xf32>
    %37 = arith.addf %36, %3 : vector<8x32xf32>
    %c0_27 = arith.constant 0 : index
    %c0_28 = arith.constant 0 : index
    %c0_29 = arith.constant 0 : index
    %38 = vector.load %arg8[%c0_27, %c0_28, %c0_29] : memref<1x1x32xf32, #tpu.memory_space<vmem>>, vector<1x1x32xf32>
    %39 = vector.shape_cast %38 : vector<1x1x32xf32> to vector<1x32xf32>
    %c0_30 = arith.constant 0 : index
    %c0_31 = arith.constant 0 : index
    %c0_32 = arith.constant 0 : index
    %40 = vector.load %arg9[%c0_30, %c0_31, %c0_32] : memref<1x1x32xf32, #tpu.memory_space<vmem>>, vector<1x1x32xf32>
    %41 = vector.shape_cast %40 : vector<1x1x32xf32> to vector<1x32xf32>
    %cst_33 = arith.constant dense<0.000000e+00> : vector<8xf32>
    %42 = vector.multi_reduction <add>, %37, %cst_33 [1] : vector<8x32xf32> to vector<8xf32>
    %43 = vector.shape_cast %42 : vector<8xf32> to vector<8x1xf32>
    %cst_34 = arith.constant 3.200000e+01 : f32
    %44 = vector.broadcast %cst_34 : f32 to vector<8x1xf32>
    %45 = arith.divf %43, %44 : vector<8x1xf32>
    %46 = vector.broadcast %45 : vector<8x1xf32> to vector<8x32xf32>
    %47 = arith.subf %37, %46 : vector<8x32xf32>
    %48 = arith.mulf %47, %47 : vector<8x32xf32>
    %cst_35 = arith.constant dense<0.000000e+00> : vector<8xf32>
    %49 = vector.multi_reduction <add>, %48, %cst_35 [1] : vector<8x32xf32> to vector<8xf32>
    %50 = vector.shape_cast %49 : vector<8xf32> to vector<8x1xf32>
    %cst_36 = arith.constant 3.100000e+01 : f32
    %51 = vector.broadcast %cst_36 : f32 to vector<8x1xf32>
    %52 = arith.divf %50, %51 : vector<8x1xf32>
    %53 = math.sqrt %52 : vector<8x1xf32>
    %cst_37 = arith.constant 9.99999997E-7 : f32
    %54 = vector.broadcast %cst_37 : f32 to vector<8x1xf32>
    %55 = arith.addf %53, %54 : vector<8x1xf32>
    %56 = vector.broadcast %55 : vector<8x1xf32> to vector<8x32xf32>
    %57 = arith.divf %47, %56 : vector<8x32xf32>
    %58 = vector.broadcast %39 : vector<1x32xf32> to vector<8x32xf32>
    %59 = arith.mulf %58, %57 : vector<8x32xf32>
    %60 = vector.broadcast %41 : vector<1x32xf32> to vector<8x32xf32>
    %61 = arith.addf %59, %60 : vector<8x32xf32>
    %c0_38 = arith.constant 0 : index
    %c0_39 = arith.constant 0 : index
    %c0_40 = arith.constant 0 : index
    %62 = vector.load %arg10[%c0_38, %c0_39, %c0_40] : memref<1x32x64xf32, #tpu.memory_space<vmem>>, vector<1x32x64xf32>
    %63 = vector.shape_cast %62 : vector<1x32x64xf32> to vector<32x64xf32>
    %cst_41 = arith.constant dense<0.000000e+00> : vector<8x64xf32>
    %64 = tpu.matmul %61, %63, %cst_41 {dimension_numbers = #tpu.dot_dimension_numbers<[1], [0], [0], [1], [0, 0, 1, 1], [], []>, precision = #tpu.contract_precision<fp32>} : vector<8x32xf32>, vector<32x64xf32>, vector<8x64xf32> -> vector<8x64xf32>
    %cst_42 = arith.constant 0.000000e+00 : f32
    %65 = vector.broadcast %cst_42 : f32 to vector<8x64xf32>
    %66 = arith.maximumf %64, %65 : vector<8x64xf32>
    %c0_43 = arith.constant 0 : index
    %c0_44 = arith.constant 0 : index
    %c0_45 = arith.constant 0 : index
    %67 = vector.load %arg11[%c0_43, %c0_44, %c0_45] : memref<1x64x64xf32, #tpu.memory_space<vmem>>, vector<1x64x64xf32>
    %68 = vector.shape_cast %67 : vector<1x64x64xf32> to vector<64x64xf32>
    %cst_46 = arith.constant dense<0.000000e+00> : vector<8x64xf32>
    %69 = tpu.matmul %66, %68, %cst_46 {dimension_numbers = #tpu.dot_dimension_numbers<[1], [0], [0], [1], [0, 0, 1, 1], [], []>, precision = #tpu.contract_precision<fp32>} : vector<8x64xf32>, vector<64x64xf32>, vector<8x64xf32> -> vector<8x64xf32>
    %cst_47 = arith.constant 0.000000e+00 : f32
    %70 = vector.broadcast %cst_47 : f32 to vector<8x64xf32>
    %71 = arith.maximumf %69, %70 : vector<8x64xf32>
    %c0_48 = arith.constant 0 : index
    %c0_49 = arith.constant 0 : index
    %c0_50 = arith.constant 0 : index
    %72 = vector.load %arg12[%c0_48, %c0_49, %c0_50] : memref<1x64x32xf32, #tpu.memory_space<vmem>>, vector<1x64x32xf32>
    %73 = vector.shape_cast %72 : vector<1x64x32xf32> to vector<64x32xf32>
    %cst_51 = arith.constant dense<0.000000e+00> : vector<8x32xf32>
    %74 = tpu.matmul %71, %73, %cst_51 {dimension_numbers = #tpu.dot_dimension_numbers<[1], [0], [0], [1], [0, 0, 1, 1], [], []>, precision = #tpu.contract_precision<fp32>} : vector<8x64xf32>, vector<64x32xf32>, vector<8x32xf32> -> vector<8x32xf32>
    %75 = arith.addf %74, %61 : vector<8x32xf32>
    %c0_52 = arith.constant 0 : index
    %c0_53 = arith.constant 0 : index
    %c0_54 = arith.constant 0 : index
    %76 = vector.load %arg13[%c0_52, %c0_53, %c0_54] : memref<1x1x32xf32, #tpu.memory_space<vmem>>, vector<1x1x32xf32>
    %77 = vector.shape_cast %76 : vector<1x1x32xf32> to vector<1x32xf32>
    %c0_55 = arith.constant 0 : index
    %c0_56 = arith.constant 0 : index
    %c0_57 = arith.constant 0 : index
    %78 = vector.load %arg14[%c0_55, %c0_56, %c0_57] : memref<1x1x32xf32, #tpu.memory_space<vmem>>, vector<1x1x32xf32>
    %79 = vector.shape_cast %78 : vector<1x1x32xf32> to vector<1x32xf32>
    %cst_58 = arith.constant dense<0.000000e+00> : vector<8xf32>
    %80 = vector.multi_reduction <add>, %75, %cst_58 [1] : vector<8x32xf32> to vector<8xf32>
    %81 = vector.shape_cast %80 : vector<8xf32> to vector<8x1xf32>
    %cst_59 = arith.constant 3.200000e+01 : f32
    %82 = vector.broadcast %cst_59 : f32 to vector<8x1xf32>
    %83 = arith.divf %81, %82 : vector<8x1xf32>
    %84 = vector.broadcast %83 : vector<8x1xf32> to vector<8x32xf32>
    %85 = arith.subf %75, %84 : vector<8x32xf32>
    %86 = arith.mulf %85, %85 : vector<8x32xf32>
    %cst_60 = arith.constant dense<0.000000e+00> : vector<8xf32>
    %87 = vector.multi_reduction <add>, %86, %cst_60 [1] : vector<8x32xf32> to vector<8xf32>
    %88 = vector.shape_cast %87 : vector<8xf32> to vector<8x1xf32>
    %cst_61 = arith.constant 3.100000e+01 : f32
    %89 = vector.broadcast %cst_61 : f32 to vector<8x1xf32>
    %90 = arith.divf %88, %89 : vector<8x1xf32>
    %91 = math.sqrt %90 : vector<8x1xf32>
    %cst_62 = arith.constant 9.99999997E-7 : f32
    %92 = vector.broadcast %cst_62 : f32 to vector<8x1xf32>
    %93 = arith.addf %91, %92 : vector<8x1xf32>
    %94 = vector.broadcast %93 : vector<8x1xf32> to vector<8x32xf32>
    %95 = arith.divf %85, %94 : vector<8x32xf32>
    %96 = vector.broadcast %77 : vector<1x32xf32> to vector<8x32xf32>
    %97 = arith.mulf %96, %95 : vector<8x32xf32>
    %98 = vector.broadcast %79 : vector<1x32xf32> to vector<8x32xf32>
    %99 = arith.addf %97, %98 : vector<8x32xf32>
    %c0_63 = arith.constant 0 : index
    %c0_64 = arith.constant 0 : index
    %100 = vector.load %arg17[%c0_63, %c0_64] : memref<8x32xf32, #tpu.memory_space<vmem>>, vector<8x32xf32>
    tpu.vector_store %arg17[%c0_63, %c0_64], %99 {strides = array<i32>} : memref<8x32xf32, #tpu.memory_space<vmem>>, vector<8x32xf32>,
    %c1_i32 = arith.constant 1 : i32
    %101 = arith.cmpi eq, %arg1, %c1_i32 : i32
    %102 = arith.extui %101 : i1 to i32
    %c0_i32_65 = arith.constant 0 : i32
    %103 = arith.cmpi ne, %102, %c0_i32_65 : i32
    scf.if %103 {
      %c0_66 = arith.constant 0 : index
      %c0_67 = arith.constant 0 : index
      %c0_68 = arith.constant 0 : index
      %104 = vector.load %arg15[%c0_66, %c0_67, %c0_68] : memref<1x8x32xf32, #tpu.memory_space<vmem>>, vector<1x8x32xf32>
      %105 = vector.shape_cast %104 : vector<1x8x32xf32> to vector<8x32xf32>
      %106 = vector.shape_cast %99 : vector<8x32xf32> to vector<1x8x32xf32>
      tpu.vector_store %arg15[%c0_66, %c0_67, %c0_68], %106 {strides = array<i32>} : memref<1x8x32xf32, #tpu.memory_space<vmem>>, vector<1x8x32xf32>,
    } else {
    }
    return
  }
  func.func @transform_0(%arg0: i32, %arg1: i32) -> (i32, i32, i32) {
    %c0_i32 = arith.constant 0 : i32
    %c0_i32_0 = arith.constant 0 : i32
    %c0_i32_1 = arith.constant 0 : i32
    return %arg0, %c0_i32, %c0_i32_0 : i32, i32, i32
  }
  func.func @transform_1(%arg0: i32, %arg1: i32) -> (i32, i32) {
    %c0_i32 = arith.constant 0 : i32
    %c0_i32_0 = arith.constant 0 : i32
    %c0_i32_1 = arith.constant 0 : i32
    return %c0_i32, %c0_i32_0 : i32, i32
  }
  func.func @transform_2(%arg0: i32, %arg1: i32) -> (i32, i32, i32) {
    %c0_i32 = arith.constant 0 : i32
    %c0_i32_0 = arith.constant 0 : i32
    %c0_i32_1 = arith.constant 0 : i32
    return %arg1, %c0_i32, %c0_i32_0 : i32, i32, i32
  }
  func.func @transform_3(%arg0: i32, %arg1: i32) -> (i32, i32, i32) {
    %c0_i32 = arith.constant 0 : i32
    %c0_i32_0 = arith.constant 0 : i32
    %c0_i32_1 = arith.constant 0 : i32
    return %arg1, %c0_i32, %c0_i32_0 : i32, i32, i32
  }
  func.func @transform_4(%arg0: i32, %arg1: i32) -> (i32, i32, i32) {
    %c0_i32 = arith.constant 0 : i32
    %c0_i32_0 = arith.constant 0 : i32
    %c0_i32_1 = arith.constant 0 : i32
    return %arg1, %c0_i32, %c0_i32_0 : i32, i32, i32
  }
  func.func @transform_5(%arg0: i32, %arg1: i32) -> (i32, i32, i32) {
    %c0_i32 = arith.constant 0 : i32
    %c0_i32_0 = arith.constant 0 : i32
    %c0_i32_1 = arith.constant 0 : i32
    return %arg1, %c0_i32, %c0_i32_0 : i32, i32, i32
  }
  func.func @transform_6(%arg0: i32, %arg1: i32) -> (i32, i32, i32) {
    %c0_i32 = arith.constant 0 : i32
    %c0_i32_0 = arith.constant 0 : i32
    %c0_i32_1 = arith.constant 0 : i32
    return %arg1, %c0_i32, %c0_i32_0 : i32, i32, i32
  }
  func.func @transform_7(%arg0: i32, %arg1: i32) -> (i32, i32, i32) {
    %c0_i32 = arith.constant 0 : i32
    %c0_i32_0 = arith.constant 0 : i32
    %c0_i32_1 = arith.constant 0 : i32
    return %arg1, %c0_i32, %c0_i32_0 : i32, i32, i32
  }
  func.func @transform_8(%arg0: i32, %arg1: i32) -> (i32, i32, i32) {
    %c0_i32 = arith.constant 0 : i32
    %c0_i32_0 = arith.constant 0 : i32
    %c0_i32_1 = arith.constant 0 : i32
    return %arg1, %c0_i32, %c0_i32_0 : i32, i32, i32
  }
  func.func @transform_9(%arg0: i32, %arg1: i32) -> (i32, i32, i32) {
    %c0_i32 = arith.constant 0 : i32
    %c0_i32_0 = arith.constant 0 : i32
    %c0_i32_1 = arith.constant 0 : i32
    return %arg1, %c0_i32, %c0_i32_0 : i32, i32, i32
  }
  func.func @transform_10(%arg0: i32, %arg1: i32) -> (i32, i32, i32) {
    %c0_i32 = arith.constant 0 : i32
    %c0_i32_0 = arith.constant 0 : i32
    %c0_i32_1 = arith.constant 0 : i32
    return %arg1, %c0_i32, %c0_i32_0 : i32, i32, i32
  }
  func.func @transform_11(%arg0: i32, %arg1: i32) -> (i32, i32, i32) {
    %c0_i32 = arith.constant 0 : i32
    %c0_i32_0 = arith.constant 0 : i32
    %c0_i32_1 = arith.constant 0 : i32
    return %arg1, %c0_i32, %c0_i32_0 : i32, i32, i32
  }
  func.func @transform_12(%arg0: i32, %arg1: i32) -> (i32, i32, i32) {
    %c0_i32 = arith.constant 0 : i32
    %c0_i32_0 = arith.constant 0 : i32
    %c0_i32_1 = arith.constant 0 : i32
    return %arg1, %c0_i32, %c0_i32_0 : i32, i32, i32
  }
  func.func @transform_13(%arg0: i32, %arg1: i32) -> (i32, i32, i32) {
    %c0_i32 = arith.constant 0 : i32
    %c0_i32_0 = arith.constant 0 : i32
    %c0_i32_1 = arith.constant 0 : i32
    return %arg0, %c0_i32, %c0_i32_0 : i32, i32, i32
  }
  func.func @transform_14(%arg0: i32, %arg1: i32) -> (i32, i32, i32, i32, i32) {
    %c0_i32 = arith.constant 0 : i32
    %c0_i32_0 = arith.constant 0 : i32
    %c0_i32_1 = arith.constant 0 : i32
    %c0_i32_2 = arith.constant 0 : i32
    return %arg0, %arg1, %c0_i32, %c0_i32_0, %c0_i32_1 : i32, i32, i32, i32, i32
  }
}

</mosaic_0001>

<bundles_post_ra>
// kernel: tpu_custom_call.1
= control target key start
LH: loop header
LB: loop body
LE: loop exit
PB: predicated region body
PF: predicated region fallthrough
CT: control target
= control target key end

     0   :  { %s12513_s0 = inlined_call_operand.vmem [shape: f32[2,8,32], index: 0, kind: input, shape index: {}]   ;;  %s12514_s1 = inlined_call_operand.hbm [shape: f32[8,32], index: 1, kind: input, shape index: {}]   ;;  %s12515_s2 = inlined_call_operand.vmem [shape: f32[2,32,32], index: 2, kind: input, shape index: {}]   ;;  %s12516_s3 = inlined_call_operand.hbm [shape: f32[2,32,32], index: 3, kind: input, shape index: {}]   ;;  %s12517_s4 = inlined_call_operand.hbm [shape: f32[2,32,32], index: 4, kind: input, shape index: {}]   ;;  %s12518_s5 = inlined_call_operand.hbm [shape: f32[2,32,32], index: 5, kind: input, shape index: {}]   ;;  %s12519_s6 = inlined_call_operand.hbm [shape: f32[2,1,32], index: 6, kind: input, shape index: {}]   ;;  %s12520_s7 = inlined_call_operand.hbm [shape: f32[2,1,32], index: 7, kind: input, shape index: {}]   ;;  %s12521_s8 = inlined_call_operand.hbm [shape: f32[2,32,64], index: 8, kind: input, shape index: {}]   ;;  %s12522_s9 = inlined_call_operand.vmem [shape: f32[2,64,64], index: 9, kind: input, shape index: {}]   ;;  %s12523_s10 = inlined_call_operand.vmem [shape: f32[2,64,32], index: 10, kind: input, shape index: {}]   ;;  %s12524_s11 = inlined_call_operand.vmem [shape: f32[2,1,32], index: 11, kind: input, shape index: {}]   ;;  %s12525_s12 = inlined_call_operand.vmem [shape: f32[2,1,32], index: 12, kind: input, shape index: {}]   ;;  %s12526_s13 = inlined_call_operand.hbm [shape: f32[2,8,32], index: 13, kind: output, shape index: {0}]   ;;  %s12527_s14 = inlined_call_operand.hbm [shape: f32[2,2,4,8,8], index: 14, kind: output, shape index: {1}]  }
   0x1   :  { %12565 = sst [smem:[#allocation46_spill]] %s12513_s0 }
   0x2   :  { %12566 = sst [smem:[#allocation47_spill]] %s12514_s1 }
   0x3   :  { %12567 = sst [smem:[#allocation48_spill]] %s12515_s2 }
   0x4   :  { %12568 = sst [smem:[#allocation49_spill]] %s12516_s3 }
   0x5   :  { %12569 = sst [smem:[#allocation50_spill]] %s12517_s4 }
   0x6   :  { %12570 = sst [smem:[#allocation51_spill]] %s12518_s5 }
   0x7   :  { %12571 = sst [smem:[#allocation52_spill]] %s12519_s6 }
   0x8   :  { %12572 = sst [smem:[#allocation53_spill]] %s12520_s7 }
   0x9   :  { %12573 = sst [smem:[#allocation54_spill]] %s12521_s8 }
   0xa   :  { %12574 = sst [smem:[#allocation55_spill]] %s12522_s9 }
   0xb   :  { %12575 = sst [smem:[#allocation56_spill]] %s12523_s10 }
   0xc   :  { %12576 = sst [smem:[#allocation57_spill]] %s12524_s11 }
   0xd   :  { %12577 = sst [smem:[#allocation58_spill]] %s12525_s12 }
   0xe   :  { %12578 = sst [smem:[#allocation59_spill]] %s12526_s13 }
   0xf   :  { %12579 = sst [smem:[#allocation60_spill]] %s12527_s14 }
  0x10   :  { %20 = vsyncpa [#allocation4], 0 }
  0x11   :  { %21 = vsyncpa [#allocation7], 0 }
  0x12   :  { %23 = vsyncpa [#allocation7 + $0x1], 0 }
  0x13   :  { %24 = vsyncpa [#allocation10], 0 }
  0x14   :  { %26 = vsyncpa [#allocation10 + $0x1], 0 }
  0x15   :  { %27 = vsyncpa [#allocation13], 0 }
  0x16   :  { %29 = vsyncpa [#allocation13 + $0x1], 0 }
  0x17   :  { %30 = vsyncpa [#allocation5], 0 }
  0x18   :  { %32 = vsyncpa [#allocation5 + $0x1], 0 }
  0x19   :  { %33 = vsyncpa [#allocation17], 0 }
  0x1a   :  { %35 = vsyncpa [#allocation17 + $0x1], 0  ;;  %s10894_s29 = smov 0   ;;  %s10896_s30 = smov 0  }
  0x1b   :  { %s10898_s15 = smov 0   ;;  %s10900_s16 = smov 0  }
  0x1c   :  { %s10902_s17 = smov 0   ;;  %s10904_s18 = smov 0  }
  0x1d   :  { %s10906_s19 = smov 0   ;;  %s10908_s20 = smov 0  }
  0x1e   :  { %s10910_s21 = smov 0   ;;  %s10912_s22 = smov 0  }
  0x1f   :  { %s10914_s23 = smov 0   ;;  %s10916_s24 = smov 0  }
  0x20   :  { %s10918_s25 = smov 0   ;;  %s10920_s26 = smov 0  }
  0x21 LB: > { %12580 = sst [smem:[#allocation24_spill]] %s10743_s29  ;;  %s50_s27 = sadd.s32 1, %s10787_s24  ;;  %s10795_s26 = sphi %s10920_s26, %s41_s26   ;;  %s10791_s25 = sphi %s10918_s25, %s12683_s25   ;;  %s10787_s24 = sphi %s10916_s24, %s12682_s24   ;;  %s10783_s23 = sphi %s10914_s23, %s12681_s23   ;;  %s10779_s22 = sphi %s10912_s22, %s12680_s22   ;;  %s10775_s21 = sphi %s10910_s21, %s12679_s21   ;;  %s10771_s20 = sphi %s10908_s20, %s12678_s20   ;;  %s10767_s19 = sphi %s10906_s19, %s12677_s19   ;;  %s10763_s18 = sphi %s10904_s18, %s12676_s18   ;;  %s10759_s17 = sphi %s10902_s17, %s12675_s17   ;;  %s10755_s16 = sphi %s10900_s16, %s12674_s16   ;;  %s10751_s15 = sphi %s10898_s15, %s12673_s15   ;;  %s10747_s30 = sphi %s10896_s30, %s12672_s30   ;;  %s10743_s29 = sphi %s10894_s29, %s12671_s29  }
  0x22   : > { %12581 = sst [smem:[#allocation25_spill]] %s10747_s30  ;;  %s133_s28 = sadd.s32 1, %s10775_s21 }
  0x23   : > { %12582 = sst [smem:[#allocation26_spill]] %s10751_s15  ;;  %p10966_p0 = scmp.ge.s32.totalorder %s50_s27, 2 }
  0x24   : > { %12583 = sst [smem:[#allocation27_spill]] %s10755_s16  ;;  %p140_p1 = scmp.ne.s32.totalorder %s10775_s21, %s10771_s20 }
  0x25   : > { %12584 = sst [smem:[#allocation28_spill]] %s10759_s17  ;;  %p141_p2 = scmp.eq.s32.totalorder %s10795_s26, 0 }
  0x26   : > { %12585 = sst [smem:[#allocation29_spill]] %s10763_s18  ;;  %s12685_s27 = smov (%p10966_p0, %s50_s27), 0 }
  0x27   : > { %12586 = sst [smem:[#allocation30_spill]] %s10771_s20  ;;  %p142_p3 = por %p141_p2, %p140_p1 }
  0x28   : > { %12587 = sst [smem:[#allocation31_spill]] %s10775_s21  ;;  %p10261_p4 = scmp.lt.s32.totalorder %s10795_s26, 4 }
  0x29   : > { %12588 = sst [smem:[#allocation32_spill]] %s10779_s22  ;;  %s10980_s13 = ssub.s32 %s10787_s24, %s12685_s27 }
  0x2a   : > { %12589 = sst [smem:[#allocation33_spill]] %s10783_s23  ;;  %s10983_s12 = sand.u32 1, %s10795_s26  }
  0x2b   : > { %12590 = sst [smem:[#allocation34_spill]] %s10787_s24  ;;  %p131_p5 = scmp.eq.s32.totalorder %s10980_s13, 0 }
  0x2c   : > { %12591 = sst [smem:[#allocation35_spill]] %s10791_s25  ;;  %s10987_s11 = sand.u32 1, %s10775_s21  }
  0x2d   : > { %12592 = sst [smem:[#allocation36_spill]] %s10795_s26  ;;  %s10990_s10 = sshll.u32 %s10787_s24, 9 }
  0x2e   : > { %12594 = sst [smem:[#allocation37_spill]] %s12685_s27  ;;  %s10996_s2 = sshll.u32 %s10987_s11, 5 }
  0x2f   : > { %12595 = sst [smem:[#allocation38_spill]] %s10980_s13  ;;  %p11002_p6 = pnand %p10261_p4, %p142_p3 }
  0x30   : > { %s10993_s9 = scalar_select %p131_p5, %s10775_s21, %s133_s28  }
  0x31   : > { %s12597_s3 = sld [smem:[#allocation49_spill]]  ;;  %s488_s8 = scalar_lea.vmem [#allocation6], %s10996_s2 }
  0x32   : > { %12596 = sst [smem:[#allocation39_spill]] %s10993_s9  ;;  %s495_s1 = sshll.u32 %s488_s8, 4  ;;  %s496_s1 = int_to_ptr.vmem [resolvable:$true] %s495_s1 }
  0x33   : > { %p11010_p7 = pneg %p11002_p6  ;;  %s10428_s9 = scalar_lea.vmem %s496_s1, 512 }
  0x34   : > { %p10429_p8 = scmp.ne.s32.totalorder %s496_s1, %s10428_s9  ;;  %s10797_s0 = smov [#allocation6]  }
  0x35   : > { %s10433_s22 = sshll.u32 %s10797_s0, 4  ;;  %s10434_s22 = int_to_ptr.vmem [resolvable:$false] %s10433_s22 }
  0x36   : > { %p10431_p9 = pnand %p10429_p8, %p11010_p7  ;;  %p10436_p11 = scmp.lt.s32.totalorder %s496_s1, %s10434_s22 }
  0x37   : > { %s494_s27 = scalar_lea.hbm %s12597_s3, %s10990_s10  ;;  %s10435_s3 = scalar_lea.vmem %s10434_s22, 1024 }
  0x38   : > { %p10432_p10 = pneg %p10431_p9  ;;  %p10437_p12 = scmp.lt.s32.totalorder %s10435_s3, %s10428_s9 }
  0x3a   : > { %p10438_p13 = por %p10437_p12, %p10436_p11 }
  0x3c   : > { %p10439_p1 = pnand %p10438_p13, %p10432_p10 }
  0x3e   : > { %10442 = shalt.err (!%p10439_p1)
}
  0x3f   : > { %s12545_s8 = smov 128   ;;  %s12547_s4 = smov 8  }
  0x40   : > { %s12600_s0 = scalar_lea.sflag [#allocation7], %s10983_s12  ;;  %s12601_s5 = sld [smem:[#allocation51_spill]] }
  0x41   : > { %10237 = dma.hbm_to_vmem [thread:$0]  (!%p11002_p6), %s494_s27, 512, %s496_s1, %s12600_s0, %s12545_s8, %s12545_s8, %s12547_s4  }
  0x42   : > { %s530_s21 = scalar_lea.vmem [#allocation9], %s10996_s2  ;;  %s9015_s30 = sshll.u32 %s10787_s24, 4 }
  0x43   : > { %s537_s29 = sshll.u32 %s530_s21, 4  ;;  %s12602_s6 = sld [smem:[#allocation52_spill]]  ;;  %s538_s29 = int_to_ptr.vmem [resolvable:$true] %s537_s29 }
  0x44   : > { %s12543_s17 = scalar_lea.sflag [#allocation10], %s10983_s12  ;;  %s10456_s18 = scalar_lea.vmem %s538_s29, 512 }
  0x45   : > { %p10457_p2 = scmp.ne.s32.totalorder %s538_s29, %s10456_s18  ;;  %s10800_s1 = smov [#allocation9]  }
  0x46   : > { %s536_s9 = scalar_lea.hbm %s12601_s5, %s10990_s10  ;;  %s10461_s27 = sshll.u32 %s10800_s1, 4  ;;  %s10462_s27 = int_to_ptr.vmem [resolvable:$false] %s10461_s27 }
  0x47   : > { %p10459_p3 = pnand %p10457_p2, %p11010_p7  ;;  %s10463_s0 = scalar_lea.vmem %s10462_s27, 1024 }
  0x48   : > { %p10464_p5 = scmp.lt.s32.totalorder %s538_s29, %s10462_s27  ;;  %p10465_p8 = scmp.lt.s32.totalorder %s10463_s0, %s10456_s18 }
  0x49   : > { %s11032_s16 = scalar_lea.hbm %s12602_s6, %s9015_s30  ;;  %p10460_p4 = pneg %p10459_p3 }
  0x4a   : > { %p10466_p9 = por %p10465_p8, %p10464_p5 }
  0x4c   : > { %p10467_p10 = pnand %p10466_p9, %p10460_p4 }
  0x4e   : > { %10470 = shalt.err (!%p10467_p10)
}
  0x4f   : > { %10243 = dma.hbm_to_vmem [thread:$0]  (!%p11002_p6), %s536_s9, 512, %s538_s29, %s12543_s17, %s12545_s8, %s12545_s8, %s12547_s4  }
  0x50   : > { %s12603_s7 = sld [smem:[#allocation53_spill]]  ;;  %s567_s22 = scalar_lea.vmem [#allocation12], %s10987_s11 }
  0x51   : > { %s574_s18 = sshll.u32 %s567_s22, 4  ;;  %s12542_s3 = scalar_lea.sflag [#allocation13], %s10983_s12  ;;  %s575_s18 = int_to_ptr.vmem [resolvable:$true] %s574_s18 }
  0x52   : > { %s10484_s1 = scalar_lea.vmem %s575_s18, 16  ;;  %s10801_s27 = smov [#allocation12]  }
  0x53   : > { %p10485_p11 = scmp.ne.s32.totalorder %s575_s18, %s10484_s1  ;;  %s10489_s0 = sshll.u32 %s10801_s27, 4  ;;  %s10490_s0 = int_to_ptr.vmem [resolvable:$false] %s10489_s0 }
  0x54   : > { %s10491_s5 = scalar_lea.vmem %s10490_s0, 32  ;;  %p10492_p1 = scmp.lt.s32.totalorder %s575_s18, %s10490_s0 }
  0x55   : > { %p10487_p12 = pnand %p10485_p11, %p11010_p7  ;;  %p10493_p2 = scmp.lt.s32.totalorder %s10491_s5, %s10484_s1 }
  0x56   : > { %s572_s21 = scalar_lea.hbm %s12603_s7, %s9015_s30 }
  0x57   : > { %p10488_p13 = pneg %p10487_p12  ;;  %p10494_p3 = por %p10493_p2, %p10492_p1 }
  0x59   : > { %p10495_p4 = pnand %p10494_p3, %p10488_p13 }
  0x5b   : > { %10498 = shalt.err (!%p10495_p4)
}
  0x5c   : > { %s12604_s29 = sld [smem:[#allocation29_spill]]  ;;  %s11056_s5 = sadd.s32 4294967295, %s10795_s26  }
  0x5d   : > { %s12605_s30 = sld [smem:[#allocation28_spill]]  ;;  %s9002_s13 = sadd.s32 4294967294, %s10795_s26  }
  0x5e   : > { %s12606_s9 = sld [smem:[#allocation27_spill]]  ;;  %s53_s15 = sadd.s32 1, %s10791_s25 }
  0x5f   : > { %10249 = dma.hbm_to_vmem [thread:$0]  (!%p11002_p6), %s572_s21, 16, %s575_s18, %s12542_s3  }
  0x60   : > { %s12607_s22 = sld [smem:[#allocation38_spill]]  ;;  %s12687_s15 = smov (!%p10966_p0, %s53_s15), %s10791_s25 }
  0x61   : > { %p146_p5 = scmp.ne.s32.totalorder %s10771_s20, %s10767_s19  ;;  %p12544_p8 = scmp.eq.s32.totalorder %s11056_s5, 0 }
  0x62   : > { %s12608_s1 = sld [smem:[#allocation26_spill]]  ;;  %p55_p9 = scmp.ge.s32.totalorder %s12687_s15, 2 }
  0x63   : > { %s12609_s27 = sld [smem:[#allocation25_spill]]  ;;  %s393_s0 = sadd.s32 1, %s12604_s29 }
  0x64   : > { %s12610_s21 = sld [smem:[#allocation24_spill]]  ;;  %p11069_p10 = por %p12544_p8, %p146_p5 }
  0x65   : > { %p403_p11 = scmp.ne.s32.totalorder %s12604_s29, %s12605_s30  ;;  %s12689_s15 = smov (%p55_p9, %s12687_s15), 0 }
  0x66   : > { %12612 = sst [smem:[#allocation40_spill]] %s12689_s15  ;;  %p404_p0 = scmp.eq.s32.totalorder %s11056_s5, 3 }
  0x67   : > { %p409_p12 = scmp.ne.s32.totalorder %s12605_s30, %s12606_s9  ;;  %s390_s14 = ssub.s32 %s10791_s25, %s12689_s15 }
  0x68   : > { %p410_p13 = scmp.eq.s32.totalorder %s9002_s13, 3  ;;  %p391_p1 = scmp.eq.s32.totalorder %s390_s14, 0 }
  0x69   : > { %p11084_p2 = por %p404_p0, %p403_p11  ;;  %s418_s17 = sor.u32 %s390_s14, %s12607_s22 }
  0x6a   : > { %p11088_p3 = por %p410_p13, %p409_p12  ;;  %s12691_s29 = smov (!%p391_p1, %s12604_s29), %s393_s0 }
  0x6b   : > { %s12613_s19 = scalar_select %p11084_p2, 1, 0 }
  0x6c   : > { %s12615_s3 = scalar_select %p11088_p3, 1, 0 }
  0x6d   : > { %12614 = sst [smem:[#allocation38_spill]] %s12613_s19  ;;  %p419_p4 = scmp.eq.s32.totalorder %s418_s17, 0 }
  0x6e   : > { %12616 = sst [smem:[#allocation41_spill]] %s12615_s3  ;;  %s421_s30 = sadd.s32 1, %s12608_s1 }
  0x6f   : > { %12617 = sst [smem:[#allocation42_spill]] %s12691_s29  ;;  %p431_p5 = scmp.ne.s32.totalorder %s12608_s1, %s12609_s27 }
  0x70   : > { %p437_p9 = scmp.ne.s32.totalorder %s12609_s27, %s12610_s21  ;;  %s12693_s1 = smov (!%p419_p4, %s12608_s1), %s421_s30 }
  0x71   : > { %12618 = sst [smem:[#allocation43_spill]] %s12693_s1  ;;  %p11106_p11 = por %p431_p5, %p404_p0 }
  0x72   : > { %p11110_p12 = por %p437_p9, %p410_p13  ;;  %p9003_p1 = scmp.ge.s32.totalorder %s10795_s26, 1 }
  0x73   : > { %s12619_s9 = scalar_select %p11106_p11, 1, 0 }
  0x74   : > { %s12621_s13 = scalar_select %p11110_p12, 1, 0 }
  0x75   : > { %12620 = sst [smem:[#allocation44_spill]] %s12619_s9  ;;  %p445_p8 = scmp.lt.s32.totalorder %s10795_s26, 5 }
  0x76   : > { %12622 = sst [smem:[#allocation45_spill]] %s12621_s13  ;;  %s10802_s22 = smov [#allocation3]  }
  0x77   : > { %p11116_p3 = pnand %p9003_p1, %p445_p8  ;;  %s458_s27 = sshll.u32 %s10802_s22, 4  ;;  %s11120_s27 = int_to_ptr.vmem [resolvable:$true] %s458_s27 }
  0x78   : > { %s12624_s14 = sld [smem:[#allocation50_spill]]  ;;  %s509_s8 = scalar_lea.vmem [#allocation8], %s10996_s2 }
  0x79   : > { %p10230_p0 = pneg %p11116_p3  ;;  %s516_s4 = sshll.u32 %s509_s8, 4  ;;  %s517_s4 = int_to_ptr.vmem [resolvable:$true] %s516_s4 }
  0x7a   : > { %p12625_p13 = scmp.eq.s32.totalorder %s11056_s5, 0  ;;  %s10512_s7 = scalar_lea.vmem %s517_s4, 512 }
  0x7b   : > { %p10513_p8 = scmp.ne.s32.totalorder %s517_s4, %s10512_s7  ;;  %s10803_s22 = smov [#allocation8]  }
  0x7c   : > { %p11131_p4 = pnand %p10230_p0, %p12625_p13  ;;  %s10517_s15 = sshll.u32 %s10803_s22, 4  ;;  %s10518_s15 = int_to_ptr.vmem [resolvable:$false] %s10517_s15 }
  0x7d   : > { %p10515_p5 = pnand %p10513_p8, %p11010_p7  ;;  %s10519_s25 = scalar_lea.vmem %s10518_s15, 1024 }
  0x7e   : > { %s515_s30 = scalar_lea.hbm %s12624_s14, %s10990_s10  ;;  %p10520_p1 = scmp.lt.s32.totalorder %s517_s4, %s10518_s15 }
  0x7f   : > { %p10516_p9 = pneg %p10515_p5  ;;  %p10521_p12 = scmp.lt.s32.totalorder %s10519_s25, %s10512_s7 }
  0x81   : > { %p10522_p11 = por %p10521_p12, %p10520_p1 }
  0x83   : > { %p10523_p2 = pnand %p10522_p11, %p10516_p9 }
  0x85   : > { %10526 = shalt.err (!%p10523_p2)
}
  0x86   : > { %s12627_s8 = smov 8   ;;  %s12628_s0 = smov 128  }
  0x87   : > { %s12629_s21 = scalar_lea.sflag [#allocation7], %s10983_s12  ;;  %s550_s14 = scalar_lea.vmem [#allocation11], %s10987_s11 }
  0x88   : > { %10240 = dma.hbm_to_vmem [thread:$0]  (!%p11002_p6), %s515_s30, 512, %s517_s4, %s12629_s21, %s12628_s0, %s12628_s0, %s12627_s8  }
  0x89   : > { %s557_s22 = sshll.u32 %s550_s14, 4  ;;  %p10529_p0 = pneg %p11131_p4  ;;  %s558_s22 = int_to_ptr.vmem [resolvable:$true] %s557_s22 }
  0x8a   : > { %s10538_s7 = scalar_lea.vmem %s11120_s27, 128  ;;  %p10546_p13 = scmp.lt.s32.totalorder %s11120_s27, %s11120_s27 }
  0x8b   : > { %p10539_p11 = scmp.ne.s32.totalorder %s11120_s27, %s10538_s7  ;;  %p10547_p8 = scmp.lt.s32.totalorder %s10538_s7, %s10538_s7 }
  0x8d   : > { %p10541_p2 = pnand %p10539_p11, %p10529_p0  ;;  %p10548_p5 = por %p10547_p8, %p10546_p13 }
  0x8f   : > { %p10542_p12 = pneg %p10541_p2 }
  0x91   : > { %p10549_p9 = pnand %p10548_p5, %p10542_p12 }
  0x93   : > { %10552 = shalt.err (!%p10549_p9)
}
  0x94   : > { %s12630_s4 = sld [smem:[#allocation47_spill]]  ;;  %s10566_s11 = scalar_lea.vmem %s558_s22, 16 }
  0x95   : > { %p10567_p1 = scmp.ne.s32.totalorder %s558_s22, %s10566_s11  ;;  %s10804_s30 = smov [#allocation11]  }
  0x96   : > { %s10571_s21 = sshll.u32 %s10804_s30, 4  ;;  %s10572_s21 = int_to_ptr.vmem [resolvable:$false] %s10571_s21 }
  0x97   : > { %p10569_p0 = pnand %p10567_p1, %p11010_p7  ;;  %s10573_s14 = scalar_lea.vmem %s10572_s21, 32 }
  0x98   : > { %p10574_p2 = scmp.lt.s32.totalorder %s558_s22, %s10572_s21  ;;  %p10575_p12 = scmp.lt.s32.totalorder %s10573_s14, %s10566_s11 }
  0x99   : > { %p10570_p11 = pneg %p10569_p0 }
  0x9a   : > { %10233 = dma.hbm_to_vmem [thread:$0]  (!%p11131_p4), %s12630_s4, 128, %s11120_s27, [#allocation4]  }
  0x9b   : > { %p10576_p13 = por %p10575_p12, %p10574_p2 }
  0x9d   : > { %p10577_p8 = pnand %p10576_p13, %p10570_p11 }
  0x9f   : > { %10580 = shalt.err (!%p10577_p8)
}
  0xa0   : > { %s12631_s6 = scalar_lea.sflag [#allocation10], %s10983_s12  ;;  %s12632_s25 = sld [smem:[#allocation54_spill]] }
  0xa1   : > { %10246 = dma.hbm_to_vmem [thread:$0]  (!%p11002_p6), %s11032_s16, 16, %s558_s22, %s12631_s6  }
  0xa2   : > { %s585_s4 = scalar_lea.vmem [#allocation14], %s10996_s2  ;;  %s10805_s21 = smov [#allocation14]  }
  0xa3   : > { %s592_s30 = sshll.u32 %s585_s4, 4  ;;  %s10599_s14 = sshll.u32 %s10805_s21, 4  ;;  %s593_s30 = int_to_ptr.vmem [resolvable:$true] %s592_s30  ;;  %s10600_s14 = int_to_ptr.vmem [resolvable:$false] %s10599_s14 }
  0xa4   : > { %s10594_s11 = scalar_lea.vmem %s593_s30, 512  ;;  %s10601_s24 = scalar_lea.vmem %s10600_s14, 1024 }
  0xa5   : > { %p10595_p4 = scmp.ne.s32.totalorder %s593_s30, %s10594_s11  ;;  %p10602_p1 = scmp.lt.s32.totalorder %s593_s30, %s10600_s14 }
  0xa6   : > { %s591_s15 = scalar_lea.hbm %s12632_s25, %s10990_s10  ;;  %p10603_p0 = scmp.lt.s32.totalorder %s10601_s24, %s10594_s11 }
  0xa7   : > { %p10597_p5 = pnand %p10595_p4, %p11010_p7 }
  0xa8   : > { %p10604_p11 = por %p10603_p0, %p10602_p1 }
  0xa9   : > { %p10598_p9 = pneg %p10597_p5 }
  0xab   : > { %p10605_p2 = pnand %p10604_p11, %p10598_p9 }
  0xad   : > { %10608 = shalt.err (!%p10605_p2)
}
  0xae   : > { %s12633_s2 = scalar_lea.sflag [#allocation13], %s10983_s12  ;;  %632 = sbr.rel (%p11116_p3) target bundleno = 3451 (0xd7b), region = 72 }
  0xaf   : > { %10252 = dma.hbm_to_vmem [thread:$0]  (!%p11002_p6), %s591_s15, 512, %s593_s30, %s12633_s2, %s12628_s0, %s12628_s0, %s12627_s8  }
  0xb0   : > { %p12634_p7 = scmp.eq.s32.totalorder (!%p11116_p3), %s11056_s5, 0 }
  0xb3   : > { %10718 = dma.done.wait (%p12634_p7), [#allocation4], 128   ;;  %p12635_p12 = pmov %p12634_p7 }
  0xb4   : > { %s638_s10 = sand.u32 1, %s11056_s5   ;;  %s11186_s16 = sand.u32 1, %s10771_s20  }
  0xb5   : > { %10720 = vsyncadd (%p12635_p12), [#allocation4], 4294967168  ;;  %s11189_s23 = sshll.u32 %s11186_s16, 5  ;;  %s639_s12 = scalar_lea.sflag [#allocation7], %s638_s10 }
  0xb6   : > { %s11192_s24 = scalar_lea.vmem [#allocation6], %s11189_s23 }
  0xb7   : > { %10722 = dma.done.wait (%p11069_p10), %s639_s12, 1024  }
  0xb8   : > { %10724 = vsyncadd (%p11069_p10), %s639_s12, 4294966272  ;;  %s11199_s28 = scalar_lea.vmem [#allocation8], %s11189_s23  ;;  %s657_s5 = scalar_lea.sflag [#allocation10], %s638_s10 }
  0xb9   : > { %s11202_s17 = scalar_lea.vmem [#allocation9], %s11189_s23 }
  0xba   : > { %10726 = dma.done.wait (%p11069_p10), %s657_s5, 528  }
  0xbb   : > { %10728 = vsyncadd (%p11069_p10), %s657_s5, 4294966768  ;;  %s674_s0 = scalar_lea.sflag [#allocation13], %s638_s10 }
  0xbc   : > { %10730 = dma.done.wait (%p11069_p10), %s674_s0, 528  }
  0xbd   : > { %10732 = vsyncadd (%p11069_p10), %s674_s0, 4294966768  ;;  %s12636_s6 = sld [smem:[#allocation28_spill]] }
  0xbe   : > { %s12637_s27 = sld [smem:[#allocation25_spill]] }
  0xbf   : > { %s12638_s7 = sld [smem:[#allocation33_spill]] }
  0xc0   : > { %s12639_s25 = sld [smem:[#allocation32_spill]] }
  0xc1   : > { %s12640_s10 = sld [smem:[#allocation46_spill]] }
  0xc2   : > { %s12642_s20 = sld [smem:[#allocation55_spill]] }
  0xc3   : > { %s12554_s15 = sand.u32 1, %s12636_s6   ;;  %s12643_s3 = sld [smem:[#allocation56_spill]] }
  0xc4   : > { %s11217_s4 = sshll.u32 %s12554_s15, 3  ;;  %s12555_s30 = sand.u32 1, %s12637_s27  }
  0xc5   : > { %s9027_s11 = sshll.u32 %s12555_s30, 5  ;;  %p783_p6 = scmp.lt.s32.totalorder %s12638_s7, 1 }
  0xc6   : > { %p787_p3 = scmp.lt.s32.totalorder %s12639_s25, 1  ;;  %s12641_s27 = sld [smem:[#allocation48_spill]] }
  0xc7   : > { %s12695_s7 = smov (!%p783_p6, %s12638_s7), 1  ;;  %s12644_s14 = sld [smem:[#allocation57_spill]] }
  0xc8   : > { %s11226_s18 = scalar_select %p787_p3, %s12639_s25, 1 }
  0xc9   : > { %s9028_s21 = sshll.u32 %s12695_s7, 3  ;;  %s12645_s19 = sld [smem:[#allocation58_spill]] }
  0xca   : > { %s786_s12 = scalar_lea.vmem %s12640_s10, %s9028_s21  ;;  %s9055_s5 = sshll.u32 %s11226_s18, 5 }
  0xcb   : > { %s9056_s30 = sshll.u32 %s11226_s18, 6  ;;  %s775_s6 = scalar_lea.vmem [#allocation15], %s11217_s4 }
  0xcc   : > { %s791_s15 = scalar_lea.vmem %s12641_s27, %s9055_s5  ;;  %s11239_s29 = scalar_lea.vmem %s12642_s20, %s9056_s30 }
  0xcd   : > { %s11244_s26 = scalar_lea.vmem %s12643_s3, %s9056_s30  ;;  %s804_s21 = scalar_lea.vmem %s12644_s14, %s11226_s18 }
  0xce   : > { %s11255_s5 = scalar_lea.vmem [#allocation14], %s11189_s23  ;;  %s11258_s27 = scalar_lea.vmem [#allocation16], %s9027_s11 }
  0xcf   : > { %s807_s0 = scalar_lea.vmem %s12645_s19, %s11226_s18  ;;  %p9035_p10 = scmp.ne.s32.totalorder %s12639_s25, 0 }
  0xd1   : > { %811 = sbr.rel (%p9035_p10) target bundleno = 218 (0xda), region = 104 }
  0xd6   : > { %v812_v0 = vld [vmem:[%s786_s12] sm:$0xff]  ;;  %v813_v1 = vld [vmem:[#allocation3] sm:$0xff]  ;;  %vm815_vm0 = vcmask 261120  }
  0xd7   : > { %v814_v2 = vadd.f32 %v813_v1, %v812_v0 }
  0xd9   : > { %816 = vst.msk [vmem:[#allocation2] sm:$0xff] %vm815_vm0, %v814_v2 }
  0xda PF: > { %v821_v3 = vld [vmem:[%s791_s15 + $0x18] sm:$0xff]  ;;  %v820_v4 = vld [vmem:[%s791_s15 + $0x10] sm:$0xff]  ;;  %v819_v5 = vld [vmem:[%s791_s15 + $0x8] sm:$0xff]  ;;  %vm822_vm1 = vcmask 261120   ;;  %v10806_v6 = vmov 0.0   ;;  %vm10807_vm2 = vmmov 0  }
  0xdb   : > { %9412 = vmatprep.subr.mxu0 %v10806_v6  ;;  %v11262_v7 = vand.u32 4294901760, %v821_v3  ;;  %v11264_v8 = vand.u32 4294901760, %v820_v4  ;;  %v11266_v9 = vand.u32 4294901760, %v819_v5  ;;  %9423 = vmatprep.subr.mxu1 %v10806_v6  ;;  %v818_v10 = vld [vmem:[%s791_s15] sm:$0xff]  ;;  %v1314_v35 = vld [vmem:[%s11192_s24 + $0x18] sm:$0xff]  ;;  %v1312_v38 = vld [vmem:[%s11192_s24 + $0x8] sm:$0xff] }
  0xdc   : > { %v11269_v12 = vand.u32 4294901760, %v818_v10  ;;  %9420 = vmatprep.mubr.msk.f32.mxu0 %vm10807_vm2, %v10806_v6  ;;  %9431 = vmatprep.mubr.msk.f32.mxu1 %vm10807_vm2, %v10806_v6  ;;  %v11324_v36 = vand.u32 4294901760, %v1314_v35  ;;  %v1313_v37 = vld [vmem:[%s11192_s24 + $0x10] sm:$0xff]  ;;  %v1311_v41 = vld [vmem:[%s11192_s24] sm:$0xff]  ;;  %v11342_v42 = vand.u32 4294901760, %v1312_v38  ;;  %s10808_s20 = smov 120  }
  0xdd   : > { %9413 = vmatpush3.msra.mxu0 %v11262_v7  ;;  %v931_v14 = vsub.f32 %v821_v3, %v11262_v7  ;;  %v938_v16 = vsub.f32 %v820_v4, %v11264_v8  ;;  %v11282_v17 = vsub.f32 %v819_v5, %v11266_v9  ;;  %v11333_v39 = vand.u32 4294901760, %v1313_v37  ;;  %s10809_s3 = smov 104   ;;  %s10810_s1 = smov 112  }
  0xde   : > { %9414 = vmatprep.subr.mxu0 %v10806_v6  ;;  %v11286_v18 = vsub.f32 %v818_v10, %v11269_v12  ;;  %v11338_v40 = vsub.f32 %v1314_v35, %v11324_v36  ;;  %v11352_v44 = vand.u32 4294901760, %v1311_v41  ;;  %v11359_v46 = vsub.f32 %v1312_v38, %v11342_v42  ;;  %v1802_v35 = vld [vmem:[%s11199_s28 + $0x10] sm:$0xff]  ;;  %s10813_s19 = smov 16   ;;  %s10814_s9 = smov 8  }
  0xdf   : > { %9415 = vmatpush3.msra.mxu0 %v11264_v8  ;;  %v932_v19 = vand.u32 4294901760, %v931_v14  ;;  %v939_v21 = vand.u32 4294901760, %v938_v16  ;;  %v946_v22 = vand.u32 4294901760, %v11282_v17  ;;  %v11350_v43 = vsub.f32 %v1313_v37, %v11333_v39  ;;  %s10815_s13 = smov 24   ;;  %s12646_s23 = scalar_lea.vmem [#allocation11], %s11186_s16 }
  0xe0   : > { %v817_v11 = vld [vmem:[#allocation2] sm:$0xff]  ;;  %9416 = vmatprep.subr.mxu0 %v10806_v6  ;;  %v953_v23 = vand.u32 4294901760, %v11286_v18  ;;  %v1421_v45 = vand.u32 4294901760, %v11338_v40  ;;  %v11368_v47 = vsub.f32 %v1311_v41, %v11352_v44  ;;  %v1435_v50 = vand.u32 4294901760, %v11359_v46  ;;  %s12647_s24 = scalar_lea.vmem [#allocation12], %s11186_s16  ;;  %s12650_s22 = sld [smem:[#allocation32_spill]] }
  0xe1   : > { %v824_v13 = vsel %vm822_vm1, %v817_v11, 0  ;;  %9417 = vmatpush3.msra.mxu0 %v11266_v9  ;;  %v933_v24 = vsub.f32 %v931_v14, %v932_v19  ;;  %v940_v26 = vsub.f32 %v938_v16, %v939_v21  ;;  %v947_v27 = vsub.f32 %v11282_v17, %v946_v22 }
  0xe2   : > { %v11278_v15 = vand.u32 4294901760, %v824_v13  ;;  %9418 = vmatprep.subr.mxu0 %v10806_v6  ;;  %v954_v31 = vsub.f32 %v11286_v18, %v953_v23  ;;  %v1428_v48 = vand.u32 4294901760, %v11350_v43  ;;  %v1422_v49 = vsub.f32 %v11338_v40, %v1421_v45 }
  0xe3   : > { %9419 = vmatpush3.msra.mxu0 %v11269_v12  ;;  %v934_v28 = vand.u32 4294901760, %v933_v24  ;;  %v941_v30 = vand.u32 4294901760, %v940_v26  ;;  %v948_v33 = vand.u32 4294901760, %v947_v27  ;;  %v1442_v52 = vand.u32 4294901760, %v11368_v47 }
  0xe4   : > { %v11290_v20 = vsub.f32 %v824_v13, %v11278_v15  ;;  %9434 = vmatprep.subr.mxu0 %v10806_v6  ;;  %v955_v34 = vand.u32 4294901760, %v954_v31  ;;  %v1429_v51 = vsub.f32 %v11350_v43, %v1428_v48  ;;  %v1423_v53 = vand.u32 4294901760, %v1422_v49 }
  0xe5   : > { %9424 = vmatpush3.msra.mxu1 %v934_v28  ;;  %v1436_v54 = vsub.f32 %v11359_v46, %v1435_v50  ;;  %v1443_v56 = vsub.f32 %v11368_v47, %v1442_v52  ;;  %v11469_v38 = vand.u32 4294901760, %v1802_v35  ;;  %vm2444_vm3 = vcmask 64512  }
  0xe6   : > { %v11297_v25 = vand.u32 4294901760, %v11290_v20  ;;  %9425 = vmatprep.subr.mxu1 %v10806_v6  ;;  %v1430_v55 = vand.u32 4294901760, %v1429_v51  ;;  %vm6503_vm4 = vcmask 130048   ;;  %vm6505_vm5 = vcmask 195584   ;;  %p9042_p13 = scmp.ne.s32.totalorder %s12650_s22, 1 }
  0xe7   : > { %9426 = vmatpush3.msra.mxu1 %v941_v30  ;;  %v1437_v57 = vand.u32 4294901760, %v1436_v54  ;;  %v1444_v58 = vand.u32 4294901760, %v1443_v56  ;;  %vm7538_vm8 = vcmask 523264  }
  0xe8   : > { %v898_v29 = vsub.f32 %v11290_v20, %v11297_v25  ;;  %9427 = vmatprep.subr.mxu1 %v10806_v6 }
  0xe9   : > { %9428 = vmatpush3.msra.mxu1 %v948_v33 }
  0xea   : > { %v11308_v32 = vand.u32 4294901760, %v898_v29  ;;  %9429 = vmatprep.subr.mxu1 %v10806_v6 }
  0xeb   : > { %9430 = vmatpush3.msra.mxu1 %v955_v34  ;;  %v1803_v34 = vld [vmem:[%s11199_s28 + $0x18] sm:$0xff] }
  0xec   : > { %9421 = vmatmul.mubr.f32.vlgmr.msra.gmra.mxu0 %v11308_v32  ;;  %9432 = vmatmul.mubr.f32.vlgmr.msra.gmra.mxu1 %v11278_v15  ;;  %v11467_v37 = vand.u32 4294901760, %v1803_v34 }
  0xed   : > { %9435 = vmatpush3.msra.mxu0 %v931_v14  ;;  %9445 = vmatprep.subr.mxu1 %v10806_v6 }
  0xee   : > { %9436 = vmatprep.subr.mxu0 %v10806_v6  ;;  %9442 = vmatprep.mubr.msk.f32.mxu0 %vm10807_vm2, %v10806_v6 }
  0xef   : > { %9437 = vmatpush3.msra.mxu0 %v938_v16  ;;  %9446 = vmatpush3.msra.mxu1 %v11262_v7 }
  0xf0   : > { %9438 = vmatprep.subr.mxu0 %v10806_v6  ;;  %9447 = vmatprep.subr.mxu1 %v10806_v6 }
  0xf1   : > { %9439 = vmatpush3.msra.mxu0 %v11282_v17  ;;  %9448 = vmatpush3.msra.mxu1 %v11264_v8 }
  0xf2   : > { %9440 = vmatprep.subr.mxu0 %v10806_v6  ;;  %9449 = vmatprep.subr.mxu1 %v10806_v6 }
  0xf3   : > { %9441 = vmatpush3.msra.mxu0 %v11286_v18  ;;  %9450 = vmatpush3.msra.mxu1 %v11266_v9 }
  0xf4   : > { %9443 = vmatmul.mubr.f32.vlgmr.msra.gmra.mxu0 %v11290_v20  ;;  %9456 = vmatprep.subr.mxu0 %v10806_v6 }
  0xf5   : > { %9457 = vmatpush3.msra.mxu0 %v932_v19  ;;  %9451 = vmatprep.subr.mxu1 %v10806_v6 }
  0xf6   : > { %9458 = vmatprep.subr.mxu0 %v10806_v6  ;;  %9452 = vmatpush3.msra.mxu1 %v11269_v12 }
  0xf7   : > { %9459 = vmatpush3.msra.mxu0 %v939_v21  ;;  %9453 = vmatprep.mubr.msk.f32.mxu1 %vm10807_vm2, %v10806_v6 }
  0xf8   : > { %9460 = vmatprep.subr.mxu0 %v10806_v6  ;;  %9454 = vmatmul.mubr.f32.vlgmr.msra.gmra.mxu1 %v11297_v25 }
  0xf9   : > { %9461 = vmatpush3.msra.mxu0 %v946_v22  ;;  %9467 = vmatprep.subr.mxu1 %v10806_v6 }
  0xfa   : > { %9462 = vmatprep.subr.mxu0 %v10806_v6  ;;  %9464 = vmatprep.mubr.msk.f32.mxu0 %vm10807_vm2, %v10806_v6 }
  0xfb   : > { %9463 = vmatpush3.msra.mxu0 %v953_v23  ;;  %9468 = vmatpush3.msra.mxu1 %v11262_v7 }
  0xfc   : > { %9465 = vmatmul.mubr.f32.vlgmr.msra.gmra.mxu0 %v11278_v15  ;;  %9469 = vmatprep.subr.mxu1 %v10806_v6 }
  0xfd   : > { %9478 = vmatprep.subr.mxu0 %v10806_v6  ;;  %9470 = vmatpush3.msra.mxu1 %v11264_v8 }
  0xfe   : > { %9479 = vmatpush3.msra.mxu0 %v11324_v36  ;;  %9471 = vmatprep.subr.mxu1 %v10806_v6 }
  0xff   : > { %9480 = vmatprep.subr.mxu0 %v10806_v6  ;;  %9472 = vmatpush3.msra.mxu1 %v11266_v9 }
 0x100   : > { %9481 = vmatpush3.msra.mxu0 %v11333_v39  ;;  %9473 = vmatprep.subr.mxu1 %v10806_v6 }
 0x101   : > { %9482 = vmatprep.subr.mxu0 %v10806_v6  ;;  %9474 = vmatpush3.msra.mxu1 %v11269_v12 }
 0x102   : > { %9475 = vmatprep.mubr.msk.f32.mxu1 %vm10807_vm2, %v10806_v6  ;;  %9483 = vmatpush3.msra.mxu0 %v11342_v42 }
 0x103   : > { %9476 = vmatmul.mubr.f32.vlgmr.msra.gmra.mxu1 %v11278_v15  ;;  %9484 = vmatprep.subr.mxu0 %v10806_v6 }
 0x104   : > { %9489 = vmatprep.subr.mxu1 %v10806_v6  ;;  %9485 = vmatpush3.msra.mxu0 %v11352_v44 }
 0x105   : > { %9490 = vmatpush3.msra.mxu1 %v1423_v53  ;;  %9486 = vmatprep.mubr.msk.f32.mxu0 %vm10807_vm2, %v10806_v6 }
 0x106   : > { %9491 = vmatprep.subr.mxu1 %v10806_v6  ;;  %9500 = vmatprep.subr.mxu0 %v10806_v6 }
 0x107   : > { %9487 = vmatmul.mubr.f32.vlgmr.msra.gmra.mxu0 %v11308_v32  ;;  %9492 = vmatpush3.msra.mxu1 %v1430_v55 }
 0x108   : > { %9501 = vmatpush3.msra.mxu0 %v11338_v40  ;;  %9493 = vmatprep.subr.mxu1 %v10806_v6  ;;  %v1800_v40 = vld [vmem:[%s11199_s28] sm:$0xff] }
 0x109   : > { %9502 = vmatprep.subr.mxu0 %v10806_v6  ;;  %9494 = vmatpush3.msra.mxu1 %v1437_v57  ;;  %v11474_v41 = vand.u32 4294901760, %v1800_v40 }
 0x10a   : > { %9503 = vmatpush3.msra.mxu0 %v11350_v43  ;;  %9495 = vmatprep.subr.mxu1 %v10806_v6  ;;  %v1916_v43 = vsub.f32 %v1802_v35, %v11469_v38 }
 0x10b   : > { %9504 = vmatprep.subr.mxu0 %v10806_v6  ;;  %9496 = vmatpush3.msra.mxu1 %v1444_v58 }
 0x10c   : > { %9497 = vmatprep.mubr.msk.f32.mxu1 %vm10807_vm2, %v10806_v6  ;;  %9505 = vmatpush3.msra.mxu0 %v11359_v46 }
 0x10d   : > { %9498 = vmatmul.mubr.f32.vlgmr.msra.gmra.mxu1 %v11278_v15  ;;  %9506 = vmatprep.subr.mxu0 %v10806_v6 }
 0x10e   : > { %9511 = vmatprep.subr.mxu1 %v10806_v6  ;;  %9507 = vmatpush3.msra.mxu0 %v11368_v47  ;;  %v1917_v47 = vand.u32 4294901760, %v1916_v43 }
 0x10f   : > { %9508 = vmatprep.mubr.msk.f32.mxu0 %vm10807_vm2, %v10806_v6  ;;  %9512 = vmatpush3.msra.mxu1 %v11324_v36 }
 0x110   : > { %9509 = vmatmul.mubr.f32.vlgmr.msra.gmra.mxu0 %v11290_v20  ;;  %9513 = vmatprep.subr.mxu1 %v10806_v6  ;;  %v1918_v51 = vsub.f32 %v1916_v43, %v1917_v47 }
 0x111   : > { %9522 = vmatprep.subr.mxu0 %v10806_v6  ;;  %9514 = vmatpush3.msra.mxu1 %v11333_v39 }
 0x112   : > { %9523 = vmatpush3.msra.mxu0 %v1421_v45  ;;  %9515 = vmatprep.subr.mxu1 %v10806_v6  ;;  %v1930_v45 = vsub.f32 %v1800_v40, %v11474_v41  ;;  %v1919_v54 = vand.u32 4294901760, %v1918_v51 }
 0x113   : > { %9524 = vmatprep.subr.mxu0 %v10806_v6  ;;  %9516 = vmatpush3.msra.mxu1 %v11342_v42 }
 0x114   : > { %9525 = vmatpush3.msra.mxu0 %v1428_v48  ;;  %9517 = vmatprep.subr.mxu1 %v10806_v6  ;;  %v1931_v49 = vand.u32 4294901760, %v1930_v45 }
 0x115   : > { %9526 = vmatprep.subr.mxu0 %v10806_v6  ;;  %9518 = vmatpush3.msra.mxu1 %v11352_v44 }
 0x116   : > { %9519 = vmatprep.mubr.msk.f32.mxu1 %vm10807_vm2, %v10806_v6  ;;  %9527 = vmatpush3.msra.mxu0 %v1435_v50  ;;  %v1932_v55 = vsub.f32 %v1930_v45, %v1931_v49 }
 0x117   : > { %9520 = vmatmul.mubr.f32.vlgmr.msra.gmra.mxu1 %v11297_v25  ;;  %9528 = vmatprep.subr.mxu0 %v10806_v6 }
 0x118   : > { %9533 = vmatprep.subr.mxu1 %v10806_v6  ;;  %9529 = vmatpush3.msra.mxu0 %v1442_v52  ;;  %v1933_v57 = vand.u32 4294901760, %v1932_v55 }
 0x119   : > { %9530 = vmatprep.mubr.msk.f32.mxu0 %vm10807_vm2, %v10806_v6  ;;  %9534 = vmatpush3.msra.mxu1 %v11324_v36  ;;  %v1801_v36 = vld [vmem:[%s11199_s28 + $0x8] sm:$0xff] }
 0x11a   : > { %9531 = vmatmul.mubr.f32.vlgmr.msra.gmra.mxu0 %v11278_v15  ;;  %9535 = vmatprep.subr.mxu1 %v10806_v6 }
 0x11b   : > { %9541 = vmatprep.mubr.msk.f32.mxu1 %vm10807_vm2, %v10806_v6  ;;  %9536 = vmatpush3.msra.mxu1 %v11333_v39  ;;  %v11471_v39 = vand.u32 4294901760, %v1801_v36 }
 0x11c   : > { %9544 = vmatprep.subr.mxu0 %v10806_v6  ;;  %9537 = vmatprep.subr.mxu1 %v10806_v6 }
 0x11d   : > { %9552 = vmatprep.mubr.msk.f32.mxu0 %vm10807_vm2, %v10806_v6  ;;  %9538 = vmatpush3.msra.mxu1 %v11342_v42  ;;  %v1909_v42 = vsub.f32 %v1803_v34, %v11467_v37 }
 0x11e   : > { %9539 = vmatprep.subr.mxu1 %v10806_v6  ;;  %9545 = vmatpush3.msra.mxu0 %v11467_v37 }
 0x11f   : > { %9540 = vmatpush3.msra.mxu1 %v11352_v44  ;;  %v1923_v44 = vsub.f32 %v1801_v36, %v11471_v39  ;;  %9546 = vmatprep.subr.mxu0 %v10806_v6  ;;  %v1910_v46 = vand.u32 4294901760, %v1909_v42 }
 0x120   : > { %9542 = vmatmul.mubr.f32.vlgmr.msra.gmra.mxu1 %v11278_v15  ;;  %9555 = vmatprep.subr.mxu1 %v10806_v6 }
 0x121   : > { %9563 = vmatprep.mubr.msk.f32.mxu1 %vm10807_vm2, %v10806_v6  ;;  %9547 = vmatpush3.msra.mxu0 %v11469_v38  ;;  %v1924_v48 = vand.u32 4294901760, %v1923_v44  ;;  %v1911_v50 = vsub.f32 %v1909_v42, %v1910_v46 }
 0x122   : > { %9548 = vmatprep.subr.mxu0 %v10806_v6 }
 0x123   : > { %9549 = vmatpush3.msra.mxu0 %v11471_v39  ;;  %v1925_v52 = vsub.f32 %v1923_v44, %v1924_v48  ;;  %v1912_v53 = vand.u32 4294901760, %v1911_v50 }
 0x124   : > { %9550 = vmatprep.subr.mxu0 %v10806_v6 }
 0x125   : > { %9551 = vmatpush3.msra.mxu0 %v11474_v41  ;;  %9556 = vmatpush3.msra.mxu1 %v1912_v53  ;;  %v1926_v56 = vand.u32 4294901760, %v1925_v52 }
 0x126   : > { %9566 = vmatprep.subr.mxu0 %v10806_v6  ;;  %9553 = vmatmul.mubr.f32.vlgmr.msra.gmra.mxu0 %v11308_v32 }
 0x127   : > { %9567 = vmatpush3.msra.mxu0 %v1909_v42  ;;  %9557 = vmatprep.subr.mxu1 %v10806_v6 }
 0x128   : > { %9568 = vmatprep.subr.mxu0 %v10806_v6  ;;  %9558 = vmatpush3.msra.mxu1 %v1919_v54 }
 0x129   : > { %9569 = vmatpush3.msra.mxu0 %v1916_v43  ;;  %9559 = vmatprep.subr.mxu1 %v10806_v6 }
 0x12a   : > { %9570 = vmatprep.subr.mxu0 %v10806_v6  ;;  %9560 = vmatpush3.msra.mxu1 %v1926_v56 }
 0x12b   : > { %9571 = vmatpush3.msra.mxu0 %v1923_v44  ;;  %9561 = vmatprep.subr.mxu1 %v10806_v6 }
 0x12c   : > { %9572 = vmatprep.subr.mxu0 %v10806_v6  ;;  %9562 = vmatpush3.msra.mxu1 %v1933_v57 }
 0x12d   : > { %9573 = vmatpush3.msra.mxu0 %v1930_v45  ;;  %9574 = vmatprep.mubr.msk.f32.mxu0 %vm10807_vm2, %v10806_v6 }
 0x12e   : > { %9577 = vmatprep.subr.mxu1 %v10806_v6  ;;  %9588 = vmatprep.subr.mxu0 %v10806_v6 }
 0x12f   : > { %9564 = vmatmul.mubr.f32.vlgmr.msra.gmra.mxu1 %v11278_v15  ;;  %9575 = vmatmul.mubr.f32.vlgmr.msra.gmra.mxu0 %v11290_v20 }
 0x130   : > { %9578 = vmatpush3.msra.mxu1 %v11467_v37  ;;  %9589 = vmatpush3.msra.mxu0 %v1910_v46 }
 0x131   : > { %9579 = vmatprep.subr.mxu1 %v10806_v6  ;;  %9590 = vmatprep.subr.mxu0 %v10806_v6 }
 0x132   : > { %9580 = vmatpush3.msra.mxu1 %v11469_v38  ;;  %9591 = vmatpush3.msra.mxu0 %v1917_v47 }
 0x133   : > { %9581 = vmatprep.subr.mxu1 %v10806_v6  ;;  %9592 = vmatprep.subr.mxu0 %v10806_v6 }
 0x134   : > { %9582 = vmatpush3.msra.mxu1 %v11471_v39  ;;  %9593 = vmatpush3.msra.mxu0 %v1924_v48 }
 0x135   : > { %9583 = vmatprep.subr.mxu1 %v10806_v6  ;;  %9594 = vmatprep.subr.mxu0 %v10806_v6 }
 0x136   : > { %9584 = vmatpush3.msra.mxu1 %v11474_v41  ;;  %9595 = vmatpush3.msra.mxu0 %v1931_v49 }
 0x137   : > { %9596 = vmatprep.mubr.msk.f32.mxu0 %vm10807_vm2, %v10806_v6  ;;  %9585 = vmatprep.mubr.msk.f32.mxu1 %vm10807_vm2, %v10806_v6 }
 0x138   : > { %9597 = vmatmul.mubr.f32.vlgmr.msra.gmra.mxu0 %v11278_v15  ;;  %9599 = vmatprep.subr.mxu1 %v10806_v6 }
 0x139   : > { %9586 = vmatmul.mubr.f32.vlgmr.msra.gmra.mxu1 %v11297_v25  ;;  %9610 = vmatprep.subr.mxu0 %v10806_v6 }
 0x13a   : > { %9600 = vmatpush3.msra.mxu1 %v11467_v37  ;;  %9612 = vmatprep.mubr.msk.f32.mxu0 %vm10807_vm2, %v10806_v6 }
 0x13b   : > { %9601 = vmatprep.subr.mxu1 %v10806_v6  ;;  %9607 = vmatprep.mubr.msk.f32.mxu1 %vm10807_vm2, %v10806_v6 }
 0x13c   : > { %9602 = vmatpush3.msra.mxu1 %v11469_v38 }
 0x13d   : > { %9603 = vmatprep.subr.mxu1 %v10806_v6 }
 0x13e   : > { %9604 = vmatpush3.msra.mxu1 %v11471_v39 }
 0x13f   : > { %9605 = vmatprep.subr.mxu1 %v10806_v6 }
 0x140   : > { %9606 = vmatpush3.msra.mxu1 %v11474_v41 }
 0x141   : > { %9608 = vmatmul.mubr.f32.vlgmr.msra.gmra.mxu1 %v11278_v15  ;;  %9615 = vmatprep.subr.mxu1 %v10806_v6 }
 0x142   : > { %9617 = vmatprep.mubr.msk.f32.mxu1 %vm10807_vm2, %v10806_v6 }
 0x1ac   : > { %v901_v59 = vpop.f32.mrf.mxu0  ;;  %v992_v61 = vpop.f32.mrf.mxu1 }
 0x1ad   : > { %v993_v1 = vadd.f32 %v992_v61, %v901_v59 }
 0x1ae   : > { %v9422_v60 = vpop.f32.mrf.mxu0  ;;  %v9433_v62 = vpop.f32.mrf.mxu1 }
 0x1b4   : > { %v1072_v63 = vpop.f32.mrf.mxu0 }
 0x1b5   : > { %v1073_v4 = vadd.f32 %v1072_v63, %v993_v1 }
 0x1b6   : > { %v9444_v0 = vpop.f32.mrf.mxu0 }
 0x1b8   : > { %v1149_v2 = vpop.f32.mrf.mxu1 }
 0x1b9   : > { %v1150_v7 = vadd.f32 %v1149_v2, %v1073_v4 }
 0x1ba   : > { %v9455_v3 = vpop.f32.mrf.mxu1 }
 0x1bc   : > { %v1232_v5 = vpop.f32.mrf.mxu0 }
 0x1bd   : > { %v1233_v9 = vadd.f32 %v1232_v5, %v1150_v7 }
 0x1be   : > { %v9466_v8 = vpop.f32.mrf.mxu0 }
 0x1c3   : > { %v1307_v10 = vpop.f32.mrf.mxu1 }
 0x1c4   : > { %v11450_v11 = vadd.f32 %v1307_v10, %v1233_v9 }
 0x1c5   : > { %v9477_v12 = vpop.f32.mrf.mxu1 }
 0x1c6   : > { %2290 = vrot.lane.b32.xlu1 %v11450_v11, %s10808_s20  ;;  %v2445_v59 = vsel %vm2444_vm3, %v11450_v11, 0 }
 0x1c7   : > { %v1390_v13 = vpop.f32.mrf.mxu0  ;;  %v2513_v60 = vand.u32 4294901760, %v2445_v59 }
 0x1c9   : > { %v9488_v14 = vpop.f32.mrf.mxu0  ;;  %v2514_v61 = vsub.f32 %v2445_v59, %v2513_v60 }
 0x1cb   : > { %v2515_v62 = vand.u32 4294901760, %v2514_v61 }
 0x1cd   : > { %v1481_v16 = vpop.f32.mrf.mxu1  ;;  %v2516_v15 = vsub.f32 %v2514_v61, %v2515_v62 }
 0x1ce   : > { %v1482_v21 = vadd.f32 %v1481_v16, %v1390_v13 }
 0x1cf   : > { %v9499_v17 = vpop.f32.mrf.mxu1  ;;  %v2517_v1 = vand.u32 4294901760, %v2516_v15 }
 0x1d0   : > { %v1561_v18 = vpop.f32.mrf.mxu0 }
 0x1d1   : > { %v1562_v24 = vadd.f32 %v1561_v18, %v1482_v21 }
 0x1d2   : > { %v9510_v19 = vpop.f32.mrf.mxu0 }
 0x1d7   : > { %v1638_v22 = vpop.f32.mrf.mxu1 }
 0x1d8   : > { %v1639_v27 = vadd.f32 %v1638_v22, %v1562_v24 }
 0x1d9   : > { %v9521_v23 = vpop.f32.mrf.mxu1 }
 0x1da   : > { %v1721_v26 = vpop.f32.mrf.mxu0 }
 0x1db   : > { %v1722_v29 = vadd.f32 %v1721_v26, %v1639_v27 }
 0x1dc   : > { %v9532_v28 = vpop.f32.mrf.mxu0 }
 0x1e0   : > { %v1796_v30 = vpop.f32.mrf.mxu1 }
 0x1e1   : > { %v11454_v31 = vadd.f32 %v1796_v30, %v1722_v29 }
 0x1e2   : > { %v9543_v33 = vpop.f32.mrf.mxu1 }
 0x1e3   : > { %2303 = vrot.lane.b32.xlu1 %v11454_v31, %s10809_s3  ;;  %2297 = vrot.lane.b32.xlu0 %v11454_v31, %s10808_s20 }
 0x1e6   : > { %v1879_v7 = vpop.f32.mrf.mxu0 }
 0x1e7   : > { %2300 = vrot.lane.b32.xlu0 %v11454_v31, %s10810_s1 }
 0x1e8   : > { %v9554_v8 = vpop.f32.mrf.mxu0 }
 0x1eb   : > { %2292 = vrot.lane.b32.xlu0 %v11450_v11, %s10810_s1 }
 0x1ef   : > { %2294 = vrot.lane.b32.xlu0 %v11450_v11, %s10809_s3  ;;  %v1970_v9 = vpop.f32.mrf.mxu1  ;;  %v2050_v10 = vpop.f32.mrf.mxu0 }
 0x1f0   : > { %v1971_v11 = vadd.f32 %v1970_v9, %v1879_v7 }
 0x1f1   : > { %v9565_v12 = vpop.f32.mrf.mxu1  ;;  %v9576_v14 = vpop.f32.mrf.mxu0 }
 0x1f2   : > { %v2051_v16 = vadd.f32 %v2050_v10, %v1971_v11 }
 0x1f8   : > { %v2210_v18 = vpop.f32.mrf.mxu0 }
 0x1f9   : > { %v2127_v22 = vpop.f32.mrf.mxu1 }
 0x1fa   : > { %v9598_v23 = vpop.f32.mrf.mxu0  ;;  %v2128_v24 = vadd.f32 %v2127_v22, %v2051_v16 }
 0x1fb   : > { %v9587_v26 = vpop.f32.mrf.mxu1 }
 0x1fc   : > { %v2211_v30 = vadd.f32 %v2210_v18, %v2128_v24 }
 0x201   : > { %v2285_v33 = vpop.f32.mrf.mxu1 }
 0x202   : > { %v11564_v35 = vadd.f32 %v2285_v33, %v2211_v30 }
 0x203   : > { %v9609_v38 = vpop.f32.mrf.mxu1 }
 0x20c   : > { %2316 = vxpose.xlu1.b32.start.end [1/1] (short) (narrow) %v11454_v31, 8 }
 0x238   : > { %v2291_v20 = vpop.permute.xlu1 %2290 }
 0x239   : > { %v2893_v13 = vsel %vm2444_vm3, %v2291_v20, 0 }
 0x23a   : > { %v11558_v17 = vand.u32 4294901760, %v2893_v13 }
 0x23c   : > { %v2962_v19 = vsub.f32 %v2893_v13, %v11558_v17 }
 0x23e   : > { %v2963_v27 = vand.u32 4294901760, %v2962_v19 }
 0x240   : > { %v2964_v31 = vsub.f32 %v2962_v19, %v2963_v27 }
 0x242   : > { %v2965_v39 = vand.u32 4294901760, %v2964_v31 }
 0x255   : > { %v2304_v25 = vpop.permute.xlu1 %2303  ;;  %v2298_v32 = vpop.permute.xlu0 %2297 }
 0x256   : > { %2412 = vxpose.xlu1.b32.start.end [1/1] (short) (narrow) %v2304_v25, 8  ;;  %2348 = vxpose.xlu0.b32.start.end [1/1] (short) (narrow) %v2298_v32, 8 }
 0x259   : > { %v2301_v58 = vpop.permute.xlu0 %2300 }
 0x25a   : > { %2380 = vxpose.xlu0.b32.start.end [1/1] (short) (narrow) %v2301_v58, 8 }
 0x25d   : > { %v2293_v21 = vpop.permute.xlu0 %2292 }
 0x25e   : > { %v3341_v28 = vsel %vm2444_vm3, %v2293_v21, 0 }
 0x25f   : > { %v11562_v34 = vand.u32 4294901760, %v3341_v28 }
 0x261   : > { %v2295_v29 = vpop.permute.xlu0 %2294  ;;  %v11567_v40 = vsub.f32 %v3341_v28, %v11562_v34 }
 0x262   : > { %v3789_v48 = vsel %vm2444_vm3, %v2295_v29, 0 }
 0x263   : > { %v3411_v45 = vand.u32 4294901760, %v11567_v40  ;;  %v11579_v53 = vand.u32 4294901760, %v3789_v48 }
 0x265   : > { %v3412_v52 = vsub.f32 %v11567_v40, %v3411_v45  ;;  %v3858_v57 = vsub.f32 %v3789_v48, %v11579_v53 }
 0x267   : > { %v3413_v56 = vand.u32 4294901760, %v3412_v52  ;;  %v3859_v32 = vand.u32 4294901760, %v3858_v57 }
 0x269   : > { %v3860_v59 = vsub.f32 %v3858_v57, %v3859_v32 }
 0x288   : > { %v2332_v63 = vpop.trf.xlu1 }
 0x289   : > { %v2478_v0 = vand.u32 4294901760, %v2332_v63 }
 0x28b   : > { %v2555_v2 = vsub.f32 %v2332_v63, %v2478_v0  ;;  %9611 = vmatpush3.msra.mxu0 %v2478_v0 }
 0x28c   : > { %9613 = vmatmul.mubr.f32.vlgmr.msra.gmra.mxu0 %v2517_v1  ;;  %9620 = vmatprep.subr.mxu0 %v10806_v6 }
 0x28d   : > { %v2556_v3 = vand.u32 4294901760, %v2555_v2  ;;  %9621 = vmatpush3.msra.mxu0 %v2555_v2  ;;  %9622 = vmatprep.mubr.msk.f32.mxu0 %vm10807_vm2, %v10806_v6 }
 0x28e   : > { %9630 = vmatprep.subr.mxu0 %v10806_v6 }
 0x28f   : > { %v2557_v4 = vsub.f32 %v2555_v2, %v2556_v3 }
 0x290   : > { %9623 = vmatmul.mubr.f32.vlgmr.msra.gmra.mxu0 %v2514_v61  ;;  %v3861_v61 = vand.u32 4294901760, %v3860_v59 }
 0x291   : > { %v2558_v5 = vand.u32 4294901760, %v2557_v4  ;;  %9631 = vmatpush3.msra.mxu0 %v2556_v3  ;;  %9632 = vmatprep.mubr.msk.f32.mxu0 %vm10807_vm2, %v10806_v6 }
 0x292   : > { %9640 = vmatprep.subr.mxu0 %v10806_v6 }
 0x293   : > { %9616 = vmatpush3.msra.mxu1 %v2558_v5 }
 0x294   : > { %9618 = vmatmul.mubr.f32.vlgmr.msra.gmra.mxu1 %v2513_v60  ;;  %9633 = vmatmul.mubr.f32.vlgmr.msra.gmra.mxu0 %v2513_v60 }
 0x295   : > { %9625 = vmatprep.subr.mxu1 %v10806_v6  ;;  %9627 = vmatprep.mubr.msk.f32.mxu1 %vm10807_vm2, %v10806_v6 }
 0x296   : > { %9626 = vmatpush3.msra.mxu1 %v2478_v0  ;;  %9642 = vmatprep.mubr.msk.f32.mxu0 %vm10807_vm2, %v10806_v6 }
 0x297   : > { %9635 = vmatprep.subr.mxu1 %v10806_v6 }
 0x298   : > { %9628 = vmatmul.mubr.f32.vlgmr.msra.gmra.mxu1 %v2515_v62 }
 0x299   : > { %9636 = vmatpush3.msra.mxu1 %v2478_v0  ;;  %9637 = vmatprep.mubr.msk.f32.mxu1 %vm10807_vm2, %v10806_v6 }
 0x29a   : > { %9645 = vmatprep.subr.mxu1 %v10806_v6 }
 0x29c   : > { %9638 = vmatmul.mubr.f32.vlgmr.msra.gmra.mxu1 %v2513_v60 }
 0x29d   : > { %9647 = vmatprep.mubr.msk.f32.mxu1 %vm10807_vm2, %v10806_v6 }
 0x2d2   : > { %v2364_v36 = vpop.trf.xlu0  ;;  %v2428_v51 = vpop.trf.xlu1 }
 0x2d3   : > { %v2926_v37 = vand.u32 4294901760, %v2364_v36  ;;  %v3822_v55 = vand.u32 4294901760, %v2428_v51 }
 0x2d5   : > { %v3003_v41 = vsub.f32 %v2364_v36, %v2926_v37  ;;  %9641 = vmatpush3.msra.mxu0 %v2926_v37  ;;  %v3899_v25 = vsub.f32 %v2428_v51, %v3822_v55 }
 0x2d6   : > { %9643 = vmatmul.mubr.f32.vlgmr.msra.gmra.mxu0 %v2965_v39  ;;  %9650 = vmatprep.subr.mxu0 %v10806_v6  ;;  %v2396_v42 = vpop.trf.xlu0 }
 0x2d7   : > { %v3004_v43 = vand.u32 4294901760, %v3003_v41  ;;  %9651 = vmatpush3.msra.mxu0 %v3003_v41  ;;  %9652 = vmatprep.mubr.msk.f32.mxu0 %vm10807_vm2, %v10806_v6  ;;  %v3374_v44 = vand.u32 4294901760, %v2396_v42  ;;  %v3900_v58 = vand.u32 4294901760, %v3899_v25 }
 0x2d8   : > { %9660 = vmatprep.subr.mxu0 %v10806_v6 }
 0x2d9   : > { %v3005_v46 = vsub.f32 %v3003_v41, %v3004_v43  ;;  %v3451_v47 = vsub.f32 %v2396_v42, %v3374_v44  ;;  %v3901_v60 = vsub.f32 %v3899_v25, %v3900_v58 }
 0x2da   : > { %9653 = vmatmul.mubr.f32.vlgmr.msra.gmra.mxu0 %v2962_v19 }
 0x2db   : > { %v3006_v49 = vand.u32 4294901760, %v3005_v46  ;;  %9661 = vmatpush3.msra.mxu0 %v3004_v43  ;;  %v3452_v50 = vand.u32 4294901760, %v3451_v47  ;;  %9662 = vmatprep.mubr.msk.f32.mxu0 %vm10807_vm2, %v10806_v6  ;;  %v3902_v62 = vand.u32 4294901760, %v3901_v60 }
 0x2dc   : > { %9670 = vmatprep.subr.mxu0 %v10806_v6 }
 0x2dd   : > { %9646 = vmatpush3.msra.mxu1 %v3006_v49  ;;  %v3453_v54 = vsub.f32 %v3451_v47, %v3452_v50 }
 0x2de   : > { %9648 = vmatmul.mubr.f32.vlgmr.msra.gmra.mxu1 %v11558_v17  ;;  %9655 = vmatprep.subr.mxu1 %v10806_v6 }
 0x2df   : > { %9663 = vmatmul.mubr.f32.vlgmr.msra.gmra.mxu0 %v11558_v17  ;;  %9656 = vmatpush3.msra.mxu1 %v2926_v37  ;;  %v3454_v20 = vand.u32 4294901760, %v3453_v54 }
 0x2e0   : > { %9671 = vmatpush3.msra.mxu0 %v3374_v44  ;;  %9657 = vmatprep.mubr.msk.f32.mxu1 %vm10807_vm2, %v10806_v6 }
 0x2e1   : > { %9665 = vmatprep.subr.mxu1 %v10806_v6  ;;  %9672 = vmatprep.mubr.msk.f32.mxu0 %vm10807_vm2, %v10806_v6 }
 0x2e2   : > { %9680 = vmatprep.subr.mxu0 %v10806_v6  ;;  %9658 = vmatmul.mubr.f32.vlgmr.msra.gmra.mxu1 %v2963_v27 }
 0x2e3   : > { %9666 = vmatpush3.msra.mxu1 %v2926_v37  ;;  %9673 = vmatmul.mubr.f32.vlgmr.msra.gmra.mxu0 %v3413_v56 }
 0x2e4   : > { %9681 = vmatpush3.msra.mxu0 %v3451_v47  ;;  %9667 = vmatprep.mubr.msk.f32.mxu1 %vm10807_vm2, %v10806_v6 }
 0x2e5   : > { %9675 = vmatprep.subr.mxu1 %v10806_v6  ;;  %9682 = vmatprep.mubr.msk.f32.mxu0 %vm10807_vm2, %v10806_v6 }
 0x2e6   : > { %9690 = vmatprep.subr.mxu0 %v10806_v6  ;;  %9668 = vmatmul.mubr.f32.vlgmr.msra.gmra.mxu1 %v11558_v17 }
 0x2e7   : > { %9676 = vmatpush3.msra.mxu1 %v3454_v20  ;;  %9683 = vmatmul.mubr.f32.vlgmr.msra.gmra.mxu0 %v11567_v40 }
 0x2e8   : > { %9691 = vmatpush3.msra.mxu0 %v3452_v50  ;;  %9677 = vmatprep.mubr.msk.f32.mxu1 %vm10807_vm2, %v10806_v6 }
 0x2e9   : > { %9685 = vmatprep.subr.mxu1 %v10806_v6  ;;  %9692 = vmatprep.mubr.msk.f32.mxu0 %vm10807_vm2, %v10806_v6 }
 0x2ea   : > { %9678 = vmatmul.mubr.f32.vlgmr.msra.gmra.mxu1 %v11562_v34  ;;  %9700 = vmatprep.subr.mxu0 %v10806_v6 }
 0x2eb   : > { %9686 = vmatpush3.msra.mxu1 %v3374_v44  ;;  %9693 = vmatmul.mubr.f32.vlgmr.msra.gmra.mxu0 %v11562_v34 }
 0x2ec   : > { %9701 = vmatpush3.msra.mxu0 %v3822_v55  ;;  %9687 = vmatprep.mubr.msk.f32.mxu1 %vm10807_vm2, %v10806_v6 }
 0x2ed   : > { %9695 = vmatprep.subr.mxu1 %v10806_v6  ;;  %9702 = vmatprep.mubr.msk.f32.mxu0 %vm10807_vm2, %v10806_v6 }
 0x2ee   : > { %9710 = vmatprep.subr.mxu0 %v10806_v6  ;;  %9688 = vmatmul.mubr.f32.vlgmr.msra.gmra.mxu1 %v3411_v45 }
 0x2ef   : > { %9696 = vmatpush3.msra.mxu1 %v3374_v44  ;;  %9703 = vmatmul.mubr.f32.vlgmr.msra.gmra.mxu0 %v3861_v61 }
 0x2f0   : > { %9711 = vmatpush3.msra.mxu0 %v3899_v25  ;;  %9697 = vmatprep.mubr.msk.f32.mxu1 %vm10807_vm2, %v10806_v6 }
 0x2f1   : > { %9705 = vmatprep.subr.mxu1 %v10806_v6  ;;  %9712 = vmatprep.mubr.msk.f32.mxu0 %vm10807_vm2, %v10806_v6 }
 0x2f2   : > { %9720 = vmatprep.subr.mxu0 %v10806_v6  ;;  %9698 = vmatmul.mubr.f32.vlgmr.msra.gmra.mxu1 %v11562_v34 }
 0x2f3   : > { %9706 = vmatpush3.msra.mxu1 %v3902_v62  ;;  %9713 = vmatmul.mubr.f32.vlgmr.msra.gmra.mxu0 %v3858_v57 }
 0x2f4   : > { %9721 = vmatpush3.msra.mxu0 %v3900_v58  ;;  %9707 = vmatprep.mubr.msk.f32.mxu1 %vm10807_vm2, %v10806_v6 }
 0x2f5   : > { %9715 = vmatprep.subr.mxu1 %v10806_v6  ;;  %9722 = vmatprep.mubr.msk.f32.mxu0 %vm10807_vm2, %v10806_v6 }
 0x2f6   : > { %9708 = vmatmul.mubr.f32.vlgmr.msra.gmra.mxu1 %v11579_v53  ;;  %9730 = vmatprep.subr.mxu0 %v10806_v6 }
 0x2f7   : > { %9716 = vmatpush3.msra.mxu1 %v3822_v55  ;;  %9723 = vmatmul.mubr.f32.vlgmr.msra.gmra.mxu0 %v11579_v53 }
 0x2f8   : > { %9717 = vmatprep.mubr.msk.f32.mxu1 %vm10807_vm2, %v10806_v6  ;;  %9725 = vmatprep.subr.mxu1 %v10806_v6 }
 0x2f9   : > { %9732 = vmatprep.mubr.msk.f32.mxu0 %vm10807_vm2, %v10806_v6 }
 0x2fa   : > { %9718 = vmatmul.mubr.f32.vlgmr.msra.gmra.mxu1 %v3859_v32 }
 0x2fb   : > { %9726 = vmatpush3.msra.mxu1 %v3822_v55  ;;  %9727 = vmatprep.mubr.msk.f32.mxu1 %vm10807_vm2, %v10806_v6 }
 0x2fc   : > { %9735 = vmatprep.subr.mxu1 %v10806_v6 }
 0x2fe   : > { %9728 = vmatmul.mubr.f32.vlgmr.msra.gmra.mxu1 %v11579_v53 }
 0x2ff   : > { %9737 = vmatprep.mubr.msk.f32.mxu1 %vm10807_vm2, %v10806_v6 }
 0x34c   : > { %v2519_v15 = vpop.f32.mrf.mxu0 }
 0x34e   : > { %v9614_v63 = vpop.f32.mrf.mxu0 }
 0x350   : > { %v2669_v0 = vpop.f32.mrf.mxu0 }
 0x352   : > { %v9624_v1 = vpop.f32.mrf.mxu0 }
 0x354   : > { %v2595_v2 = vpop.f32.mrf.mxu1  ;;  %v2817_v3 = vpop.f32.mrf.mxu0 }
 0x355   : > { %v2596_v4 = vadd.f32 %v2595_v2, %v2519_v15 }
 0x356   : > { %v9619_v5 = vpop.f32.mrf.mxu1  ;;  %v9634_v7 = vpop.f32.mrf.mxu0 }
 0x357   : > { %v2670_v8 = vadd.f32 %v2669_v0, %v2596_v4 }
 0x358   : > { %v2743_v9 = vpop.f32.mrf.mxu1 }
 0x359   : > { %v2744_v10 = vadd.f32 %v2743_v9, %v2670_v8 }
 0x35a   : > { %v9629_v11 = vpop.f32.mrf.mxu1 }
 0x35b   : > { %v2818_v12 = vadd.f32 %v2817_v3, %v2744_v10 }
 0x35c   : > { %v2889_v13 = vpop.f32.mrf.mxu1 }
 0x35d   : > { %v2890_v14 = vadd.f32 %v2889_v13, %v2818_v12 }
 0x35e   : > { %v9639_v16 = vpop.f32.mrf.mxu1 }
 0x35f   : > { %v11639_v17 = vmul.f32 0.35355338, %v2890_v14 }
 0x361   : > { %v4242_v18 = vsel %vm2444_vm3, %v11639_v17, -inf }
 0x362   : > { %4243 = vmax.xlane.f32.xlu0 %v4242_v18 }
 0x396   : > { %v2967_v19 = vpop.f32.mrf.mxu0 }
 0x398   : > { %v9644_v21 = vpop.f32.mrf.mxu0 }
 0x39a   : > { %v3117_v22 = vpop.f32.mrf.mxu0 }
 0x39c   : > { %v9654_v23 = vpop.f32.mrf.mxu0 }
 0x39e   : > { %v3043_v24 = vpop.f32.mrf.mxu1 }
 0x39f   : > { %v3044_v26 = vadd.f32 %v3043_v24, %v2967_v19  ;;  %v3265_v27 = vpop.f32.mrf.mxu0 }
 0x3a0   : > { %v9649_v28 = vpop.f32.mrf.mxu1 }
 0x3a1   : > { %v9664_v29 = vpop.f32.mrf.mxu0  ;;  %v3118_v30 = vadd.f32 %v3117_v22, %v3044_v26 }
 0x3a2   : > { %v3191_v31 = vpop.f32.mrf.mxu1 }
 0x3a3   : > { %v3192_v33 = vadd.f32 %v3191_v31, %v3118_v30  ;;  %v3415_v34 = vpop.f32.mrf.mxu0 }
 0x3a4   : > { %v9659_v36 = vpop.f32.mrf.mxu1 }
 0x3a5   : > { %v9674_v37 = vpop.f32.mrf.mxu0  ;;  %v3266_v38 = vadd.f32 %v3265_v27, %v3192_v33 }
 0x3a6   : > { %v3337_v39 = vpop.f32.mrf.mxu1 }
 0x3a7   : > { %v3338_v40 = vadd.f32 %v3337_v39, %v3266_v38  ;;  %v3565_v41 = vpop.f32.mrf.mxu0 }
 0x3a8   : > { %v9669_v42 = vpop.f32.mrf.mxu1 }
 0x3a9   : > { %v4239_v43 = vmul.f32 0.35355338, %v3338_v40  ;;  %v9684_v44 = vpop.f32.mrf.mxu0 }
 0x3aa   : > { %v3491_v45 = vpop.f32.mrf.mxu1 }
 0x3ab   : > { %v3492_v46 = vadd.f32 %v3491_v45, %v3415_v34  ;;  %v3713_v47 = vpop.f32.mrf.mxu0  ;;  %v4245_v48 = vsel %vm2444_vm3, %v4239_v43, -inf }
 0x3ac   : > { %v9679_v49 = vpop.f32.mrf.mxu1  ;;  %4246 = vmax.xlane.f32.xlu1 %v4245_v48 }
 0x3ad   : > { %v9694_v50 = vpop.f32.mrf.mxu0  ;;  %v3566_v51 = vadd.f32 %v3565_v41, %v3492_v46 }
 0x3ae   : > { %v3639_v52 = vpop.f32.mrf.mxu1 }
 0x3af   : > { %v3640_v53 = vadd.f32 %v3639_v52, %v3566_v51  ;;  %v3863_v54 = vpop.f32.mrf.mxu0 }
 0x3b0   : > { %v9689_v55 = vpop.f32.mrf.mxu1 }
 0x3b1   : > { %v9704_v56 = vpop.f32.mrf.mxu0  ;;  %v3714_v57 = vadd.f32 %v3713_v47, %v3640_v53 }
 0x3b2   : > { %v3785_v20 = vpop.f32.mrf.mxu1 }
 0x3b3   : > { %v3786_v25 = vadd.f32 %v3785_v20, %v3714_v57  ;;  %v4013_v32 = vpop.f32.mrf.mxu0 }
 0x3b4   : > { %v9699_v58 = vpop.f32.mrf.mxu1 }
 0x3b5   : > { %v4240_v59 = vmul.f32 0.35355338, %v3786_v25  ;;  %v9714_v60 = vpop.f32.mrf.mxu0 }
 0x3b6   : > { %v3939_v61 = vpop.f32.mrf.mxu1 }
 0x3b7   : > { %v3940_v62 = vadd.f32 %v3939_v61, %v3863_v54  ;;  %v4161_v15 = vpop.f32.mrf.mxu0  ;;  %v4248_v63 = vsel %vm2444_vm3, %v4240_v59, -inf }
 0x3b8   : > { %v9709_v0 = vpop.f32.mrf.mxu1  ;;  %4249 = vmax.xlane.f32.xlu1 %v4248_v63 }
 0x3b9   : > { %v9724_v1 = vpop.f32.mrf.mxu0  ;;  %v4014_v2 = vadd.f32 %v4013_v32, %v3940_v62 }
 0x3ba   : > { %v4087_v3 = vpop.f32.mrf.mxu1 }
 0x3bb   : > { %v4088_v4 = vadd.f32 %v4087_v3, %v4014_v2 }
 0x3bc   : > { %v9719_v5 = vpop.f32.mrf.mxu1 }
 0x3bd   : > { %v4162_v7 = vadd.f32 %v4161_v15, %v4088_v4 }
 0x3be   : > { %v4233_v8 = vpop.f32.mrf.mxu1 }
 0x3bf   : > { %v4234_v9 = vadd.f32 %v4233_v8, %v4162_v7 }
 0x3c0   : > { %v9729_v10 = vpop.f32.mrf.mxu1 }
 0x3c1   : > { %v4241_v11 = vmul.f32 0.35355338, %v4234_v9 }
 0x3c3   : > { %v4251_v12 = vsel %vm2444_vm3, %v4241_v11, -inf }
 0x3c4   : > { %4252 = vmax.xlane.f32.xlu0 %v4251_v12 }
 0x3c9   : > { %2310 = vrot.lane.b32.xlu1 %v11564_v35, %s10810_s1 }
 0x3da   : > { %2307 = vrot.lane.b32.xlu0 %v11564_v35, %s10808_s20 }
 0x3eb   : > { %v4244_v13 = vpop.xlane.xlu0 %4243 }
 0x3ec   : > { %v4254_v14 = vsub.f32 %v11639_v17, %v4244_v13 }
 0x3ee   : > { %v4258_v16 = vmul.f32 1.442695, %v4254_v14 }
 0x3f0   : > { %10390 = vpow2.f32 %v4258_v16 }
 0x3fd   : > { %v10391_v18 = vpop.eup %10390 }
 0x3fe   : > { %v4266_v19 = vsel %vm2444_vm3, %v10391_v18, 0.0 }
 0x3ff   : > { %4267 = vadd.xlane.f32.xlu1 %v4266_v19 }
 0x410   : > { %2313 = vrot.lane.b32.xlu1 %v11564_v35, %s10809_s3 }
 0x435   : > { %v4247_v21 = vpop.xlane.xlu1 %4246 }
 0x436   : > { %v4255_v22 = vsub.f32 %v4239_v43, %v4247_v21 }
 0x438   : > { %v4260_v23 = vmul.f32 1.442695, %v4255_v22 }
 0x43a   : > { %10392 = vpow2.f32 %v4260_v23 }
 0x441   : > { %v4250_v24 = vpop.xlane.xlu1 %4249 }
 0x442   : > { %v4256_v26 = vsub.f32 %v4240_v59, %v4250_v24 }
 0x444   : > { %v4262_v27 = vmul.f32 1.442695, %v4256_v26 }
 0x445   : > { %v2311_v38 = vpop.permute.xlu1 %2310 }
 0x446   : > { %10394 = vpow2.f32 %v4262_v27 }
 0x447   : > { %v10393_v28 = vpop.eup %10392 }
 0x448   : > { %v4269_v17 = vsel %vm2444_vm3, %v10393_v28, 0.0 }
 0x449   : > { %4270 = vadd.xlane.f32.xlu1 %v4269_v17 }
 0x44d   : > { %v4253_v29 = vpop.xlane.xlu0 %4252 }
 0x44e   : > { %v4257_v30 = vsub.f32 %v4241_v11, %v4253_v29 }
 0x450   : > { %v4264_v31 = vmul.f32 1.442695, %v4257_v30 }
 0x451   : > { %v2308_v41 = vpop.permute.xlu0 %2307 }
 0x452   : > { %10396 = vpow2.f32 %v4264_v31 }
 0x453   : > { %v10395_v33 = vpop.eup %10394 }
 0x454   : > { %v4272_v34 = vsel %vm2444_vm3, %v10395_v33, 0.0 }
 0x455   : > { %4273 = vadd.xlane.f32.xlu0 %v4272_v34 }
 0x45f   : > { %v10397_v36 = vpop.eup %10396 }
 0x460   : > { %v4275_v37 = vsel %vm2444_vm3, %v10397_v36, 0.0 }
 0x461   : > { %4276 = vadd.xlane.f32.xlu1 %v4275_v37 }
 0x482   : > { %4290 = vxpose.xlu0.b32.start.end [1/1] (short) (narrow) %v11564_v35, 8 }
 0x486   : > { %4354 = vxpose.xlu0.b32.start.end [1/1] (short) (narrow) %v2311_v38, 8 }
 0x488   : > { %v4268_v39 = vpop.xlane.xlu1 %4267 }
 0x489   : > { %10398 = vrcp.f32 %v4268_v39 }
 0x48c   : > { %v2314_v40 = vpop.permute.xlu1 %2313 }
 0x48d   : > { %4386 = vxpose.xlu0.b32.start.end [1/1] (short) (narrow) %v2314_v40, 8 }
 0x494   : > { %4322 = vxpose.xlu1.b32.start.end [1/1] (short) (narrow) %v2308_v41, 8 }
 0x496   : > { %v10399_v42 = vpop.eup %10398 }
 0x497   : > { %v4279_v43 = vmul.f32 %v10399_v42, %v10391_v18 }
 0x499   : > { %4286 = vst.msk [vmem:[%s11258_s27] sm:$0xff] %vm2444_vm3, %v4279_v43  ;;  %v4422_v44 = vsel %vm2444_vm3, %v4279_v43, 0 }
 0x49a   : > { %v4455_v45 = vand.u32 4294901760, %v4422_v44 }
 0x49c   : > { %9731 = vmatpush3.xpose.msra.mxu0 %v4455_v45  ;;  %v4532_v46 = vsub.f32 %v4422_v44, %v4455_v45 }
 0x49d   : > { %9740 = vmatprep.subr.mxu0 %v10806_v6 }
 0x49e   : > { %v4533_v35 = vand.u32 4294901760, %v4532_v46 }
 0x4a0   : > { %v4534_v47 = vsub.f32 %v4532_v46, %v4533_v35 }
 0x4a2   : > { %v4535_v48 = vand.u32 4294901760, %v4534_v47 }
 0x4a4   : > { %9736 = vmatpush3.xpose.msra.mxu1 %v4535_v48 }
 0x4a5   : > { %9745 = vmatprep.subr.mxu1 %v10806_v6 }
 0x4d2   : > { %v4271_v49 = vpop.xlane.xlu1 %4270 }
 0x4d3   : > { %10400 = vrcp.f32 %v4271_v49 }
 0x4de   : > { %v4274_v50 = vpop.xlane.xlu0 %4273 }
 0x4df   : > { %10402 = vrcp.f32 %v4274_v50 }
 0x4e0   : > { %v10401_v51 = vpop.eup %10400 }
 0x4e1   : > { %v4281_v52 = vmul.f32 %v10401_v51, %v10393_v28 }
 0x4e3   : > { %4287 = vst.msk [vmem:[%s11258_s27 + $0x8] sm:$0xff] %vm2444_vm3, %v4281_v52  ;;  %v4874_v56 = vsel %vm2444_vm3, %v4281_v52, 0 }
 0x4e4   : > { %v4907_v25 = vand.u32 4294901760, %v4874_v56 }
 0x4e6   : > { %v11670_v32 = vsub.f32 %v4874_v56, %v4907_v25 }
 0x4e8   : > { %v4985_v61 = vand.u32 4294901760, %v11670_v32 }
 0x4ea   : > { %v4277_v53 = vpop.xlane.xlu1 %4276  ;;  %v4986_v63 = vsub.f32 %v11670_v32, %v4985_v61 }
 0x4eb   : > { %10404 = vrcp.f32 %v4277_v53 }
 0x4ec   : > { %v10403_v54 = vpop.eup %10402  ;;  %v4987_v3 = vand.u32 4294901760, %v4986_v63 }
 0x4ed   : > { %v4283_v55 = vmul.f32 %v10403_v54, %v10395_v33 }
 0x4ef   : > { %4288 = vst.msk [vmem:[%s11258_s27 + $0x10] sm:$0xff] %vm2444_vm3, %v4283_v55  ;;  %v5326_v2 = vsel %vm2444_vm3, %v4283_v55, 0 }
 0x4f0   : > { %v11684_v4 = vand.u32 4294901760, %v5326_v2 }
 0x4f2   : > { %v11695_v5 = vsub.f32 %v5326_v2, %v11684_v4 }
 0x4f4   : > { %v5437_v12 = vand.u32 4294901760, %v11695_v5 }
 0x4f6   : > { %v5438_v19 = vsub.f32 %v11695_v5, %v5437_v12 }
 0x4f8   : > { %v10405_v57 = vpop.eup %10404  ;;  %v5439_v26 = vand.u32 4294901760, %v5438_v19 }
 0x4f9   : > { %v4285_v20 = vmul.f32 %v10405_v57, %v10397_v36 }
 0x4fb   : > { %4289 = vst.msk [vmem:[%s11258_s27 + $0x18] sm:$0xff] %vm2444_vm3, %v4285_v20  ;;  %v5778_v14 = vsel %vm2444_vm3, %v4285_v20, 0 }
 0x4fc   : > { %v11713_v21 = vand.u32 4294901760, %v5778_v14 }
 0x4fe   : > { %v4306_v58 = vpop.trf.xlu0  ;;  %v11720_v27 = vsub.f32 %v5778_v14, %v11713_v21 }
 0x4ff   : > { %v4419_v59 = vsel %vm2444_vm3, %v4306_v58, 0 }
 0x500   : > { %v4490_v60 = vand.u32 4294901760, %v4419_v59  ;;  %v5889_v30 = vand.u32 4294901760, %v11720_v27 }
 0x502   : > { %v4491_v62 = vsub.f32 %v4419_v59, %v4490_v60  ;;  %9738 = vmatmul.mubr.f32.vlgmr.msra.gmra.mxu1 %v4490_v60  ;;  %v4370_v8 = vpop.trf.xlu0  ;;  %v5890_v34 = vsub.f32 %v11720_v27, %v5889_v30 }
 0x503   : > { %9746 = vmatpush3.xpose.msra.mxu1 %v4455_v45  ;;  %9747 = vmatprep.mubr.msk.f32.mxu1 %vm10807_vm2, %v10806_v6  ;;  %v5323_v11 = vsel %vm2444_vm3, %v4370_v8, 0 }
 0x504   : > { %v4492_v15 = vand.u32 4294901760, %v4491_v62  ;;  %9755 = vmatprep.subr.mxu1 %v10806_v6  ;;  %v11708_v18 = vand.u32 4294901760, %v5323_v11  ;;  %v5891_v38 = vand.u32 4294901760, %v5890_v34 }
 0x506   : > { %v4493_v0 = vsub.f32 %v4491_v62, %v4492_v15  ;;  %9748 = vmatmul.mubr.f32.vlgmr.msra.gmra.mxu1 %v4492_v15  ;;  %v5395_v24 = vsub.f32 %v5323_v11, %v11708_v18 }
 0x507   : > { %9756 = vmatpush3.xpose.msra.mxu1 %v4455_v45  ;;  %9757 = vmatprep.mubr.msk.f32.mxu1 %vm10807_vm2, %v10806_v6 }
 0x508   : > { %v4494_v1 = vand.u32 4294901760, %v4493_v0  ;;  %9765 = vmatprep.subr.mxu1 %v10806_v6  ;;  %v5396_v17 = vand.u32 4294901760, %v5395_v24 }
 0x509   : > { %v4402_v28 = vpop.trf.xlu0 }
 0x50a   : > { %9733 = vmatmul.mubr.f32.vlgmr.msra.gmra.mxu0 %v4494_v1  ;;  %9758 = vmatmul.mubr.f32.vlgmr.msra.gmra.mxu1 %v4490_v60  ;;  %v5775_v29 = vsel %vm2444_vm3, %v4402_v28, 0  ;;  %v5397_v31 = vsub.f32 %v5395_v24, %v5396_v17 }
 0x50b   : > { %9741 = vmatpush3.xpose.msra.mxu0 %v4532_v46  ;;  %9766 = vmatpush3.xpose.msra.mxu1 %v4987_v3  ;;  %v5846_v33 = vand.u32 4294901760, %v5775_v29 }
 0x50c   : > { %9742 = vmatprep.mubr.msk.f32.mxu0 %vm10807_vm2, %v10806_v6  ;;  %9750 = vmatprep.subr.mxu0 %v10806_v6  ;;  %v5398_v36 = vand.u32 4294901760, %v5397_v31 }
 0x50d   : > { %9767 = vmatprep.mubr.msk.f32.mxu1 %vm10807_vm2, %v10806_v6  ;;  %9775 = vmatprep.subr.mxu1 %v10806_v6  ;;  %v5847_v37 = vsub.f32 %v5775_v29, %v5846_v33 }
 0x50e   : > { %9743 = vmatmul.mubr.f32.vlgmr.msra.gmra.mxu0 %v4491_v62 }
 0x50f   : > { %9751 = vmatpush3.xpose.msra.mxu0 %v4533_v35  ;;  %9752 = vmatprep.mubr.msk.f32.mxu0 %vm10807_vm2, %v10806_v6  ;;  %v5848_v39 = vand.u32 4294901760, %v5847_v37 }
 0x510   : > { %v4338_v7 = vpop.trf.xlu1  ;;  %9760 = vmatprep.subr.mxu0 %v10806_v6 }
 0x511   : > { %v4871_v9 = vsel %vm2444_vm3, %v4338_v7, 0  ;;  %v5849_v40 = vsub.f32 %v5847_v37, %v5848_v39 }
 0x512   : > { %v4942_v10 = vand.u32 4294901760, %v4871_v9  ;;  %9753 = vmatmul.mubr.f32.vlgmr.msra.gmra.mxu0 %v4490_v60 }
 0x513   : > { %9761 = vmatpush3.xpose.msra.mxu0 %v4907_v25  ;;  %9762 = vmatprep.mubr.msk.f32.mxu0 %vm10807_vm2, %v10806_v6  ;;  %v5850_v41 = vand.u32 4294901760, %v5849_v40 }
 0x514   : > { %v4943_v13 = vsub.f32 %v4871_v9, %v4942_v10  ;;  %9768 = vmatmul.mubr.f32.vlgmr.msra.gmra.mxu1 %v4942_v10  ;;  %9770 = vmatprep.subr.mxu0 %v10806_v6 }
 0x515   : > { %9776 = vmatpush3.xpose.msra.mxu1 %v4907_v25  ;;  %9777 = vmatprep.mubr.msk.f32.mxu1 %vm10807_vm2, %v10806_v6 }
 0x516   : > { %v4944_v16 = vand.u32 4294901760, %v4943_v13  ;;  %9785 = vmatprep.subr.mxu1 %v10806_v6 }
 0x518   : > { %v4945_v22 = vsub.f32 %v4943_v13, %v4944_v16  ;;  %9778 = vmatmul.mubr.f32.vlgmr.msra.gmra.mxu1 %v4944_v16 }
 0x519   : > { %9786 = vmatpush3.xpose.msra.mxu1 %v4907_v25  ;;  %9787 = vmatprep.mubr.msk.f32.mxu1 %vm10807_vm2, %v10806_v6 }
 0x51a   : > { %v4946_v23 = vand.u32 4294901760, %v4945_v22  ;;  %9795 = vmatprep.subr.mxu1 %v10806_v6 }
 0x51c   : > { %9763 = vmatmul.mubr.f32.vlgmr.msra.gmra.mxu0 %v4946_v23  ;;  %9788 = vmatmul.mubr.f32.vlgmr.msra.gmra.mxu1 %v4942_v10 }
 0x51d   : > { %9771 = vmatpush3.xpose.msra.mxu0 %v11670_v32  ;;  %9796 = vmatpush3.xpose.msra.mxu1 %v5439_v26 }
 0x51e   : > { %9772 = vmatprep.mubr.msk.f32.mxu0 %vm10807_vm2, %v10806_v6  ;;  %9780 = vmatprep.subr.mxu0 %v10806_v6 }
 0x51f   : > { %9797 = vmatprep.mubr.msk.f32.mxu1 %vm10807_vm2, %v10806_v6  ;;  %9805 = vmatprep.subr.mxu1 %v10806_v6 }
 0x520   : > { %9773 = vmatmul.mubr.f32.vlgmr.msra.gmra.mxu0 %v4943_v13  ;;  %9798 = vmatmul.mubr.f32.vlgmr.msra.gmra.mxu1 %v11708_v18 }
 0x521   : > { %9781 = vmatpush3.xpose.msra.mxu0 %v4985_v61  ;;  %9806 = vmatpush3.xpose.msra.mxu1 %v11684_v4 }
 0x522   : > { %9782 = vmatprep.mubr.msk.f32.mxu0 %vm10807_vm2, %v10806_v6  ;;  %9790 = vmatprep.subr.mxu0 %v10806_v6 }
 0x523   : > { %9807 = vmatprep.mubr.msk.f32.mxu1 %vm10807_vm2, %v10806_v6  ;;  %9815 = vmatprep.subr.mxu1 %v10806_v6 }
 0x524   : > { %9783 = vmatmul.mubr.f32.vlgmr.msra.gmra.mxu0 %v4942_v10  ;;  %9808 = vmatmul.mubr.f32.vlgmr.msra.gmra.mxu1 %v5396_v17 }
 0x525   : > { %9791 = vmatpush3.xpose.msra.mxu0 %v11684_v4  ;;  %9816 = vmatpush3.xpose.msra.mxu1 %v11684_v4 }
 0x526   : > { %9792 = vmatprep.mubr.msk.f32.mxu0 %vm10807_vm2, %v10806_v6  ;;  %9800 = vmatprep.subr.mxu0 %v10806_v6 }
 0x527   : > { %9817 = vmatprep.mubr.msk.f32.mxu1 %vm10807_vm2, %v10806_v6  ;;  %9825 = vmatprep.subr.mxu1 %v10806_v6 }
 0x528   : > { %9793 = vmatmul.mubr.f32.vlgmr.msra.gmra.mxu0 %v5398_v36  ;;  %9818 = vmatmul.mubr.f32.vlgmr.msra.gmra.mxu1 %v11708_v18 }
 0x529   : > { %9801 = vmatpush3.xpose.msra.mxu0 %v11695_v5  ;;  %9826 = vmatpush3.xpose.msra.mxu1 %v5891_v38 }
 0x52a   : > { %9802 = vmatprep.mubr.msk.f32.mxu0 %vm10807_vm2, %v10806_v6  ;;  %9810 = vmatprep.subr.mxu0 %v10806_v6 }
 0x52b   : > { %9827 = vmatprep.mubr.msk.f32.mxu1 %vm10807_vm2, %v10806_v6  ;;  %9835 = vmatprep.subr.mxu1 %v10806_v6 }
 0x52c   : > { %9803 = vmatmul.mubr.f32.vlgmr.msra.gmra.mxu0 %v5395_v24  ;;  %9828 = vmatmul.mubr.f32.vlgmr.msra.gmra.mxu1 %v5846_v33 }
 0x52d   : > { %9811 = vmatpush3.xpose.msra.mxu0 %v5437_v12  ;;  %9836 = vmatpush3.xpose.msra.mxu1 %v11713_v21 }
 0x52e   : > { %9812 = vmatprep.mubr.msk.f32.mxu0 %vm10807_vm2, %v10806_v6  ;;  %9820 = vmatprep.subr.mxu0 %v10806_v6 }
 0x52f   : > { %9837 = vmatprep.mubr.msk.f32.mxu1 %vm10807_vm2, %v10806_v6  ;;  %9845 = vmatprep.subr.mxu1 %v10806_v6 }
 0x530   : > { %9813 = vmatmul.mubr.f32.vlgmr.msra.gmra.mxu0 %v11708_v18  ;;  %9838 = vmatmul.mubr.f32.vlgmr.msra.gmra.mxu1 %v5848_v39 }
 0x531   : > { %9821 = vmatpush3.xpose.msra.mxu0 %v11713_v21  ;;  %9846 = vmatpush3.xpose.msra.mxu1 %v11713_v21 }
 0x532   : > { %9822 = vmatprep.mubr.msk.f32.mxu0 %vm10807_vm2, %v10806_v6  ;;  %9830 = vmatprep.subr.mxu0 %v10806_v6 }
 0x533   : > { %9847 = vmatprep.mubr.msk.f32.mxu1 %vm10807_vm2, %v10806_v6  ;;  %9861 = vmatprep.subr.mxu1 %v10806_v6 }
 0x534   : > { %9823 = vmatmul.mubr.f32.vlgmr.msra.gmra.mxu0 %v5850_v41  ;;  %9848 = vmatmul.mubr.f32.vlgmr.msra.gmra.mxu1 %v5846_v33 }
 0x535   : > { %9831 = vmatpush3.xpose.msra.mxu0 %v11720_v27  ;;  %9832 = vmatprep.mubr.msk.f32.mxu0 %vm10807_vm2, %v10806_v6 }
 0x536   : > { %9840 = vmatprep.subr.mxu0 %v10806_v6  ;;  %9869 = vmatprep.mubr.msk.f32.mxu1 %vm10807_vm2, %v10806_v6 }
 0x538   : > { %9833 = vmatmul.mubr.f32.vlgmr.msra.gmra.mxu0 %v5847_v37 }
 0x539   : > { %9841 = vmatpush3.xpose.msra.mxu0 %v5889_v30  ;;  %9842 = vmatprep.mubr.msk.f32.mxu0 %vm10807_vm2, %v10806_v6 }
 0x53a   : > { %9850 = vmatprep.subr.mxu0 %v10806_v6 }
 0x53c   : > { %9843 = vmatmul.mubr.f32.vlgmr.msra.gmra.mxu0 %v5846_v33 }
 0x53d   : > { %9858 = vmatprep.mubr.msk.f32.mxu0 %vm10807_vm2, %v10806_v6 }
 0x5c2   : > { %v4572_v42 = vpop.f32.mrf.mxu1 }
 0x5c4   : > { %v9739_v43 = vpop.f32.mrf.mxu1 }
 0x5c6   : > { %v4720_v44 = vpop.f32.mrf.mxu1 }
 0x5c8   : > { %v9749_v45 = vpop.f32.mrf.mxu1 }
 0x5ca   : > { %v4496_v46 = vpop.f32.mrf.mxu0  ;;  %v4866_v35 = vpop.f32.mrf.mxu1 }
 0x5cb   : > { %v4573_v49 = vadd.f32 %v4572_v42, %v4496_v46 }
 0x5cc   : > { %v9734_v47 = vpop.f32.mrf.mxu0  ;;  %v9759_v48 = vpop.f32.mrf.mxu1 }
 0x5cd   : > { %v10811_v47 = vmov 1983009808  }
 0x5ce   : > { %v4646_v50 = vpop.f32.mrf.mxu0  ;;  %v6357_v48 = vunpack.c.l.s4 %v10811_v47 }
 0x5cf   : > { %v4647_v51 = vadd.f32 %v4646_v50, %v4573_v49  ;;  %v6359_v49 = vlaneseq }
 0x5d0   : > { %v9744_v52 = vpop.f32.mrf.mxu0 }
 0x5d1   : > { %v4721_v53 = vadd.f32 %v4720_v44, %v4647_v51  ;;  %v10812_v51 = vmov 1934713408  }
 0x5d2   : > { %v4794_v54 = vpop.f32.mrf.mxu0  ;;  %v6389_v52 = vunpack.c.l.s4 %v10812_v51 }
 0x5d3   : > { %v4795_v55 = vadd.f32 %v4794_v54, %v4721_v53  ;;  %v6358_v53 = vunpack.c.0.s8 %v6357_v48  ;;  %v6360_v54 = vshrl.u32 %v6359_v49, 7 }
 0x5d4   : > { %v9754_v56 = vpop.f32.mrf.mxu0  ;;  %v5024_v57 = vpop.f32.mrf.mxu1 }
 0x5d5   : > { %v4867_v20 = vadd.f32 %v4866_v35, %v4795_v55  ;;  %v6510_v56 = vld [vmem:[%s11202_s17 + $0x18] sm:$0xff] }
 0x5d6   : > { %v9769_v25 = vpop.f32.mrf.mxu1 }
 0x5d7   : > { %6226 = vxpose.xlu0.b32.start.end [1/1] (short) (narrow) %v4867_v20, 8  ;;  %v11788_v20 = vand.u32 4294901760, %v6510_v56  ;;  %v6361_v25 = vsub.s32 %v6358_v53, %v6360_v54 }
 0x5d8   : > { %v5172_v32 = vpop.f32.mrf.mxu1 }
 0x5d9   : > { %9851 = vmatpush3.msra.mxu0 %v11788_v20 }
 0x5da   : > { %v9779_v58 = vpop.f32.mrf.mxu1  ;;  %9852 = vmatprep.subr.mxu0 %v10806_v6 }
 0x5dc   : > { %v4948_v59 = vpop.f32.mrf.mxu0  ;;  %v5318_v60 = vpop.f32.mrf.mxu1 }
 0x5dd   : > { %v5025_v15 = vadd.f32 %v5024_v57, %v4948_v59  ;;  %v6390_v57 = vunpack.c.0.s8 %v6389_v52  ;;  %v6509_v59 = vld [vmem:[%s11202_s17 + $0x10] sm:$0xff] }
 0x5de   : > { %v9764_v61 = vpop.f32.mrf.mxu0  ;;  %v9789_v62 = vpop.f32.mrf.mxu1 }
 0x5df   : > { %v11792_v61 = vsub.f32 %v6510_v56, %v11788_v20  ;;  %v11794_v62 = vand.u32 4294901760, %v6509_v59 }
 0x5e0   : > { %v5098_v63 = vpop.f32.mrf.mxu0  ;;  %v5476_v0 = vpop.f32.mrf.mxu1 }
 0x5e1   : > { %v5099_v1 = vadd.f32 %v5098_v63, %v5025_v15  ;;  %9853 = vmatpush3.msra.mxu0 %v11794_v62 }
 0x5e2   : > { %v9774_v2 = vpop.f32.mrf.mxu0  ;;  %v9799_v3 = vpop.f32.mrf.mxu1  ;;  %9854 = vmatprep.subr.mxu0 %v10806_v6 }
 0x5e3   : > { %v5173_v4 = vadd.f32 %v5172_v32, %v5099_v1  ;;  %v6393_v1 = vsub.s32 %v6390_v57, %v6360_v54  ;;  %v6620_v2 = vand.u32 4294901760, %v11792_v61  ;;  %v11801_v3 = vsub.f32 %v6509_v59, %v11794_v62 }
 0x5e4   : > { %v5246_v5 = vpop.f32.mrf.mxu0  ;;  %v5624_v7 = vpop.f32.mrf.mxu1 }
 0x5e5   : > { %v5247_v8 = vadd.f32 %v5246_v5, %v5173_v4 }
 0x5e6   : > { %v9784_v9 = vpop.f32.mrf.mxu0  ;;  %v9809_v10 = vpop.f32.mrf.mxu1 }
 0x5e7   : > { %v5319_v11 = vadd.f32 %v5318_v60, %v5247_v8  ;;  %v6507_v10 = vld [vmem:[%s11202_s17] sm:$0xff] }
 0x5e8   : > { %v5400_v12 = vpop.f32.mrf.mxu0  ;;  %v5770_v13 = vpop.f32.mrf.mxu1 }
 0x5e9   : > { %6258 = vxpose.xlu0.b32.start.end [1/1] (short) (narrow) %v5319_v11, 8  ;;  %v5477_v18 = vadd.f32 %v5476_v0, %v5400_v12  ;;  %v6508_v0 = vld [vmem:[%s11202_s17 + $0x8] sm:$0xff]  ;;  %v6621_v11 = vsub.f32 %v11792_v61, %v6620_v2  ;;  %v6627_v12 = vand.u32 4294901760, %v11801_v3 }
 0x5ea   : > { %v9794_v14 = vpop.f32.mrf.mxu0  ;;  %v9819_v16 = vpop.f32.mrf.mxu1  ;;  %v11803_v4 = vand.u32 4294901760, %v6508_v0 }
 0x5eb   : > { %v11815_v14 = vand.u32 4294901760, %v6507_v10 }
 0x5ec   : > { %v5550_v19 = vpop.f32.mrf.mxu0  ;;  %v5928_v21 = vpop.f32.mrf.mxu1  ;;  %9855 = vmatpush3.msra.mxu0 %v11803_v4 }
 0x5ed   : > { %v5551_v22 = vadd.f32 %v5550_v19, %v5477_v18  ;;  %9856 = vmatprep.subr.mxu0 %v10806_v6 }
 0x5ee   : > { %v9804_v23 = vpop.f32.mrf.mxu0  ;;  %v9829_v24 = vpop.f32.mrf.mxu1  ;;  %9857 = vmatpush3.msra.mxu0 %v11815_v14 }
 0x5ef   : > { %v5625_v26 = vadd.f32 %v5624_v7, %v5551_v22  ;;  %v6622_v22 = vand.u32 4294901760, %v6621_v11  ;;  %v6628_v23 = vsub.f32 %v11801_v3, %v6627_v12  ;;  %9872 = vmatprep.subr.mxu0 %v10806_v6 }
 0x5f0   : > { %v5698_v27 = vpop.f32.mrf.mxu0  ;;  %v6076_v28 = vpop.f32.mrf.mxu1 }
 0x5f1   : > { %v5699_v17 = vadd.f32 %v5698_v27, %v5625_v26  ;;  %9862 = vmatpush3.msra.mxu1 %v6622_v22 }
 0x5f2   : > { %v9814_v29 = vpop.f32.mrf.mxu0  ;;  %v9839_v30 = vpop.f32.mrf.mxu1  ;;  %9863 = vmatprep.subr.mxu1 %v10806_v6 }
 0x5f3   : > { %v5771_v31 = vadd.f32 %v5770_v13, %v5699_v17  ;;  %v11813_v13 = vsub.f32 %v6508_v0, %v11803_v4  ;;  %v6629_v17 = vand.u32 4294901760, %v6628_v23  ;;  %v11826_v30 = vsub.f32 %v6507_v10, %v11815_v14 }
 0x5f4   : > { %v5852_v33 = vpop.f32.mrf.mxu0  ;;  %v6222_v34 = vpop.f32.mrf.mxu1 }
 0x5f5   : > { %6290 = vxpose.xlu1.b32.start.end [1/1] (short) (narrow) %v5771_v31, 8  ;;  %v5929_v38 = vadd.f32 %v5928_v21, %v5852_v33  ;;  %v6634_v29 = vand.u32 4294901760, %v11813_v13  ;;  %9864 = vmatpush3.msra.mxu1 %v6629_v17 }
 0x5f6   : > { %v9824_v36 = vpop.f32.mrf.mxu0  ;;  %v9849_v37 = vpop.f32.mrf.mxu1  ;;  %9865 = vmatprep.subr.mxu1 %v10806_v6 }
 0x5f7   : > { %v6635_v37 = vsub.f32 %v11813_v13, %v6634_v29 }
 0x5f8   : > { %v6002_v39 = vpop.f32.mrf.mxu0 }
 0x5f9   : > { %v6003_v40 = vadd.f32 %v6002_v39, %v5929_v38  ;;  %v6641_v38 = vand.u32 4294901760, %v11826_v30 }
 0x5fa   : > { %v9834_v41 = vpop.f32.mrf.mxu0 }
 0x5fb   : > { %v6077_v42 = vadd.f32 %v6076_v28, %v6003_v40 }
 0x5fc   : > { %v6150_v43 = vpop.f32.mrf.mxu0 }
 0x5fd   : > { %v6151_v44 = vadd.f32 %v6150_v43, %v6077_v42  ;;  %v6636_v43 = vand.u32 4294901760, %v6635_v37 }
 0x5fe   : > { %v9844_v45 = vpop.f32.mrf.mxu0 }
 0x5ff   : > { %v6223_v46 = vadd.f32 %v6222_v34, %v6151_v44  ;;  %v6642_v44 = vsub.f32 %v11826_v30, %v6641_v38  ;;  %9866 = vmatpush3.msra.mxu1 %v6636_v43 }
 0x600   : > { %9867 = vmatprep.subr.mxu1 %v10806_v6 }
 0x601   : > { %6322 = vxpose.xlu0.b32.start.end [1/1] (short) (narrow) %v6223_v46, 8  ;;  %v6643_v48 = vand.u32 4294901760, %v6642_v44 }
 0x603   : > { %9868 = vmatpush3.msra.mxu1 %v6643_v48 }
 0x604   : > { %9883 = vmatprep.subr.mxu1 %v10806_v6 }
 0x653   : > { %v6242_v35 = vpop.trf.xlu0 }
 0x665   : > { %v6274_v50 = vpop.trf.xlu0 }
 0x671   : > { %v6306_v55 = vpop.trf.xlu1 }
 0x672   : > { %v6354_v32 = vcombine.low %v6242_v35, %v6306_v55  ;;  %v6355_v58 = vcombine.high %v6242_v35, %v6306_v55 }
 0x674   : > { %v6362_v5 = vrot.slane %v6354_v32, %v6361_v25  ;;  %v6369_v7 = vrot.slane %v6355_v58, %v6361_v25 }
 0x67d   : > { %v6338_v60 = vpop.trf.xlu0 }
 0x67e   : > { %v6370_v15 = vcombine.low %v6274_v50, %v6338_v60  ;;  %v6371_v63 = vcombine.high %v6274_v50, %v6338_v60 }
 0x680   : > { %v6378_v8 = vrot.slane %v6370_v15, %v6361_v25  ;;  %v6385_v9 = vrot.slane %v6371_v63, %v6361_v25 }
 0x682   : > { %v6386_v16 = vcombine.low %v6362_v5, %v6378_v8  ;;  %v6387_v18 = vcombine.high %v6362_v5, %v6378_v8  ;;  %v6402_v19 = vcombine.low %v6369_v7, %v6385_v9  ;;  %v6403_v21 = vcombine.high %v6369_v7, %v6385_v9  ;;  %v10414_v8 = vld [vmem:[#allocation2] sm:$0xff] }
 0x684   : > { %v6394_v24 = vrot.slane %v6386_v16, %v6393_v1  ;;  %v6401_v26 = vrot.slane %v6387_v18, %v6393_v1  ;;  %v6410_v27 = vrot.slane %v6402_v19, %v6393_v1  ;;  %v6417_v28 = vrot.slane %v6403_v21, %v6393_v1 }
 0x686   : > { %v6422_v31 = vcombine.low %v6394_v24, %v6401_v26  ;;  %v9036_v33 = vcombine.high %v6394_v24, %v6401_v26  ;;  %v6438_v34 = vcombine.low %v6410_v27, %v6417_v28  ;;  %v9037_v36 = vcombine.high %v6410_v27, %v6417_v28 }
 0x688   : > { %v6429_v39 = vrot.slane %v6422_v31, %v6361_v25  ;;  %v6437_v40 = vrot.slane %v9036_v33, %v6361_v25  ;;  %v6445_v41 = vrot.slane %v6438_v34, %v6361_v25  ;;  %v6453_v42 = vrot.slane %v9037_v36, %v6361_v25  ;;  %v7039_v31 = vld [vmem:[%s11255_s5 + $0x10] sm:$0xff]  ;;  %v7038_v33 = vld [vmem:[%s11255_s5 + $0x8] sm:$0xff] }
 0x689   : > { %v11897_v36 = vand.u32 4294901760, %v7039_v31  ;;  %v11899_v37 = vand.u32 4294901760, %v7038_v33 }
 0x68a   : > { %v6455_v45 = vcombine.high %v6429_v39, %v6437_v40  ;;  %v6471_v46 = vcombine.high %v6445_v41, %v6453_v42  ;;  %v6454_v35 = vcombine.low %v6429_v39, %v6437_v40  ;;  %v6470_v47 = vcombine.low %v6445_v41, %v6453_v42 }
 0x68b   : > { %v11908_v41 = vsub.f32 %v7039_v31, %v11897_v36  ;;  %v11911_v42 = vsub.f32 %v7038_v33, %v11899_v37  ;;  %v7532_v31 = vld [vmem:[%s11239_s29 + $0x10] sm:$0xff] }
 0x68c   : > { %v6469_v49 = vrot.slane %v6455_v45, %v6393_v1  ;;  %v6485_v50 = vrot.slane %v6471_v46, %v6393_v1  ;;  %v6462_v51 = vrot.slane %v6454_v35, %v6393_v1  ;;  %v6478_v52 = vrot.slane %v6470_v47, %v6393_v1 }
 0x68d   : > { %v7157_v45 = vand.u32 4294901760, %v11908_v41  ;;  %v7164_v46 = vand.u32 4294901760, %v11911_v42 }
 0x68e   : > { %v6488_v53 = vcombine.low %v6469_v49, %v6485_v50  ;;  %v6487_v54 = vcombine.high %v6462_v51, %v6478_v52  ;;  %v6486_v55 = vcombine.low %v6462_v51, %v6478_v52  ;;  %v6489_v56 = vcombine.high %v6469_v49, %v6485_v50 }
 0x68f   : > { %v7158_v48 = vsub.f32 %v11908_v41, %v7157_v45  ;;  %v7165_v49 = vsub.f32 %v11911_v42, %v7164_v46 }
 0x690   : > { %6495 = vrot.lane.b32.xlu0 %v6488_v53, %s10813_s19  ;;  %6491 = vrot.lane.b32.xlu1 %v6487_v54, %s10814_s9 }
 0x691   : > { %v7159_v51 = vand.u32 4294901760, %v7158_v48  ;;  %v7166_v53 = vand.u32 4294901760, %v7165_v49 }
 0x694   : > { %6499 = vrot.lane.b32.xlu1 %v6489_v56, %s10815_s13 }
 0x702   : > { %v6492_v57 = vpop.permute.xlu1 %6491  ;;  %v6496_v25 = vpop.permute.xlu0 %6495 }
 0x703   : > { %v6502_v32 = vsel %vm2444_vm3, %v6486_v55, %v6492_v57 }
 0x704   : > { %v6504_v59 = vsel %vm6503_vm4, %v6502_v32, %v6496_v25 }
 0x706   : > { %v6500_v58 = vpop.permute.xlu1 %6499 }
 0x707   : > { %v6506_v60 = vsel %vm6505_vm5, %v6504_v59, %v6500_v58 }
 0x708   : > { %v6512_v15 = vsel %vm822_vm1, %v6506_v60, 0 }
 0x709   : > { %v6583_v63 = vand.u32 4294901760, %v6512_v15 }
 0x70b   : > { %v6584_v0 = vsub.f32 %v6512_v15, %v6583_v63  ;;  %9870 = vmatmul.mubr.f32.vlgmr.msra.gmra.mxu1 %v6583_v63 }
 0x70c   : > { %9884 = vmatpush3.msra.mxu1 %v11788_v20  ;;  %9891 = vmatprep.mubr.msk.f32.mxu1 %vm10807_vm2, %v10806_v6 }
 0x70d   : > { %9885 = vmatprep.subr.mxu1 %v10806_v6  ;;  %v6585_v1 = vand.u32 4294901760, %v6584_v0 }
 0x70e   : > { %9886 = vmatpush3.msra.mxu1 %v11794_v62 }
 0x70f   : > { %9887 = vmatprep.subr.mxu1 %v10806_v6  ;;  %v6586_v5 = vsub.f32 %v6584_v0, %v6585_v1 }
 0x710   : > { %9888 = vmatpush3.msra.mxu1 %v11803_v4 }
 0x711   : > { %9889 = vmatprep.subr.mxu1 %v10806_v6  ;;  %v6587_v7 = vand.u32 4294901760, %v6586_v5 }
 0x712   : > { %9890 = vmatpush3.msra.mxu1 %v11815_v14 }
 0x713   : > { %9892 = vmatmul.mubr.f32.vlgmr.msra.gmra.mxu1 %v6585_v1  ;;  %9905 = vmatprep.subr.mxu1 %v10806_v6  ;;  %v9039_v1 = vld [vmem:[%s12647_s24] ss:$0 sm:$0xff] }
 0x714   : > { %9859 = vmatmul.mubr.f32.vlgmr.msra.gmra.mxu0 %v6587_v7  ;;  %9906 = vmatpush3.msra.mxu1 %v11788_v20 }
 0x715   : > { %9873 = vmatpush3.msra.mxu0 %v11792_v61  ;;  %9907 = vmatprep.subr.mxu1 %v10806_v6 }
 0x716   : > { %9874 = vmatprep.subr.mxu0 %v10806_v6  ;;  %9908 = vmatpush3.msra.mxu1 %v11794_v62 }
 0x717   : > { %9875 = vmatpush3.msra.mxu0 %v11801_v3  ;;  %9909 = vmatprep.subr.mxu1 %v10806_v6 }
 0x718   : > { %9876 = vmatprep.subr.mxu0 %v10806_v6  ;;  %9910 = vmatpush3.msra.mxu1 %v11803_v4 }
 0x719   : > { %9877 = vmatpush3.msra.mxu0 %v11813_v13  ;;  %9911 = vmatprep.subr.mxu1 %v10806_v6 }
 0x71a   : > { %9878 = vmatprep.subr.mxu0 %v10806_v6  ;;  %9880 = vmatprep.mubr.msk.f32.mxu0 %vm10807_vm2, %v10806_v6 }
 0x71b   : > { %9879 = vmatpush3.msra.mxu0 %v11826_v30  ;;  %9912 = vmatpush3.msra.mxu1 %v11815_v14  ;;  %v7040_v30 = vld [vmem:[%s11255_s5 + $0x18] sm:$0xff] }
 0x71c   : > { %9913 = vmatprep.mubr.msk.f32.mxu1 %vm10807_vm2, %v10806_v6  ;;  %9881 = vmatmul.mubr.f32.vlgmr.msra.gmra.mxu0 %v6584_v0  ;;  %v11895_v34 = vand.u32 4294901760, %v7040_v30 }
 0x71d   : > { %9894 = vmatprep.subr.mxu0 %v10806_v6  ;;  %9914 = vmatmul.mubr.f32.vlgmr.msra.gmra.mxu1 %v6583_v63 }
 0x71e   : > { %9895 = vmatpush3.msra.mxu0 %v6620_v2  ;;  %9902 = vmatprep.mubr.msk.f32.mxu0 %vm10807_vm2, %v10806_v6  ;;  %v11905_v40 = vsub.f32 %v7040_v30, %v11895_v34 }
 0x71f   : > { %9896 = vmatprep.subr.mxu0 %v10806_v6  ;;  %9927 = vmatprep.subr.mxu1 %v10806_v6 }
 0x720   : > { %9897 = vmatpush3.msra.mxu0 %v6627_v12  ;;  %9935 = vmatprep.mubr.msk.f32.mxu1 %vm10807_vm2, %v10806_v6  ;;  %v7150_v44 = vand.u32 4294901760, %v11905_v40 }
 0x721   : > { %9898 = vmatprep.subr.mxu0 %v10806_v6 }
 0x722   : > { %9899 = vmatpush3.msra.mxu0 %v6634_v29  ;;  %v7151_v47 = vsub.f32 %v11905_v40, %v7150_v44 }
 0x723   : > { %9900 = vmatprep.subr.mxu0 %v10806_v6 }
 0x724   : > { %9901 = vmatpush3.msra.mxu0 %v6641_v38  ;;  %v7037_v38 = vld [vmem:[%s11255_s5] sm:$0xff]  ;;  %v7152_v50 = vand.u32 4294901760, %v7151_v47 }
 0x725   : > { %9903 = vmatmul.mubr.f32.vlgmr.msra.gmra.mxu0 %v6583_v63  ;;  %9916 = vmatprep.subr.mxu0 %v10806_v6  ;;  %v11902_v39 = vand.u32 4294901760, %v7037_v38  ;;  %v9038_v63 = vld [vmem:[%s12646_s23] ss:$0 sm:$0xff] }
 0x726   : > { %9924 = vmatprep.mubr.msk.f32.mxu0 %vm10807_vm2, %v10806_v6  ;;  %9917 = vmatpush3.msra.mxu0 %v11895_v34 }
 0x727   : > { %v11915_v43 = vsub.f32 %v7037_v38, %v11902_v39  ;;  %9918 = vmatprep.subr.mxu0 %v10806_v6  ;;  %9928 = vmatpush3.msra.mxu1 %v7152_v50 }
 0x728   : > { %9919 = vmatpush3.msra.mxu0 %v11897_v36  ;;  %9929 = vmatprep.subr.mxu1 %v10806_v6 }
 0x729   : > { %v7171_v35 = vand.u32 4294901760, %v11915_v43  ;;  %9920 = vmatprep.subr.mxu0 %v10806_v6  ;;  %9930 = vmatpush3.msra.mxu1 %v7159_v51 }
 0x72a   : > { %9921 = vmatpush3.msra.mxu0 %v11899_v37  ;;  %9931 = vmatprep.subr.mxu1 %v10806_v6 }
 0x72b   : > { %9922 = vmatprep.subr.mxu0 %v10806_v6  ;;  %v7172_v52 = vsub.f32 %v11915_v43, %v7171_v35  ;;  %9932 = vmatpush3.msra.mxu1 %v7166_v53 }
 0x72c   : > { %9923 = vmatpush3.msra.mxu0 %v11902_v39  ;;  %9933 = vmatprep.subr.mxu1 %v10806_v6 }
 0x72d   : > { %9938 = vmatprep.subr.mxu0 %v10806_v6  ;;  %v7173_v54 = vand.u32 4294901760, %v7172_v52 }
 0x72f   : > { %9934 = vmatpush3.msra.mxu1 %v7173_v54 }
 0x730   : > { %9949 = vmatprep.subr.mxu1 %v10806_v6 }
 0x7cb   : > { %v6680_v20 = vpop.f32.mrf.mxu1 }
 0x7cd   : > { %v9871_v61 = vpop.f32.mrf.mxu1 }
 0x7d3   : > { %v6837_v62 = vpop.f32.mrf.mxu1 }
 0x7d4   : > { %v6589_v2 = vpop.f32.mrf.mxu0 }
 0x7d5   : > { %v9893_v3 = vpop.f32.mrf.mxu1  ;;  %v6590_v9 = vadd.f32 %v10414_v8, %v6589_v2  ;;  %v7537_v8 = vld [vmem:[%s11239_s29 + $0x38] sm:$0xff] }
 0x7d6   : > { %v9860_v4 = vpop.f32.mrf.mxu0 }
 0x7d7   : > { %v6681_v12 = vadd.f32 %v6680_v20, %v6590_v9  ;;  %v12001_v9 = vand.u32 4294901760, %v7537_v8 }
 0x7dc   : > { %v6760_v10 = vpop.f32.mrf.mxu0 }
 0x7dd   : > { %v6995_v11 = vpop.f32.mrf.mxu1  ;;  %v6761_v16 = vadd.f32 %v6760_v10, %v6681_v12  ;;  %v7536_v10 = vld [vmem:[%s11239_s29 + $0x30] sm:$0xff] }
 0x7de   : > { %v9882_v13 = vpop.f32.mrf.mxu0  ;;  %v12007_v12 = vand.u32 4294901760, %v7536_v10 }
 0x7df   : > { %v9915_v14 = vpop.f32.mrf.mxu1  ;;  %v6838_v18 = vadd.f32 %v6837_v62, %v6761_v16  ;;  %v7535_v13 = vld [vmem:[%s11239_s29 + $0x28] sm:$0xff] }
 0x7e0   : > { %v12014_v16 = vsub.f32 %v7536_v10, %v12007_v12 }
 0x7e5   : > { %v6920_v19 = vpop.f32.mrf.mxu0 }
 0x7e6   : > { %v6921_v21 = vadd.f32 %v6920_v19, %v6838_v18  ;;  %v12016_v18 = vand.u32 4294901760, %v7535_v13  ;;  %v7534_v19 = vld [vmem:[%s11239_s29 + $0x20] sm:$0xff] }
 0x7e7   : > { %v9904_v22 = vpop.f32.mrf.mxu0 }
 0x7e8   : > { %v6996_v23 = vadd.f32 %v6995_v11, %v6921_v21  ;;  %v12005_v11 = vsub.f32 %v7537_v8, %v12001_v9  ;;  %v7651_v22 = vand.u32 4294901760, %v12014_v16 }
 0x7ea   : > { %v7001_v24 = vsel %vm822_vm1, %v6996_v23, 0.0  ;;  %v7644_v14 = vand.u32 4294901760, %v12005_v11 }
 0x7eb   : > { %7002 = vadd.xlane.f32.xlu1 %v7001_v24  ;;  %v12028_v24 = vand.u32 4294901760, %v7534_v19 }
 0x7ec   : > { %v7645_v21 = vsub.f32 %v12005_v11, %v7644_v14 }
 0x874   : > { %v7003_v26 = vpop.xlane.xlu1 %7002 }
 0x875   : > { %v7005_v27 = vmul.f32 0.03125, %v7003_v26  ;;  %v7533_v26 = vld [vmem:[%s11239_s29 + $0x18] sm:$0xff] }
 0x876   : > { %v12041_v30 = vand.u32 4294901760, %v7533_v26 }
 0x877   : > { %v7006_v28 = vsub.f32 %v6996_v23, %v7005_v27  ;;  %v12026_v23 = vsub.f32 %v7535_v13, %v12016_v18  ;;  %v7646_v27 = vand.u32 4294901760, %v7645_v21 }
 0x878   : > { %v12053_v38 = vsub.f32 %v7533_v26, %v12041_v30 }
 0x879   : > { %v7007_v17 = vmul.f32 %v7006_v28, %v7006_v28 }
 0x87b   : > { %v7008_v29 = vsel %vm822_vm1, %v7007_v17, 0.0  ;;  %v7658_v17 = vand.u32 4294901760, %v12026_v23 }
 0x87c   : > { %7009 = vadd.xlane.f32.xlu0 %v7008_v29  ;;  %v12038_v29 = vsub.f32 %v7534_v19, %v12028_v24 }
 0x905   : > { %v7010_v55 = vpop.xlane.xlu0 %7009 }
 0x906   : > { %v7012_v56 = vmul.f32 0.032258064, %v7010_v55 }
 0x908   : > { %10406 = vrsqrt.f32 %v7012_v56  ;;  %vm7015_vm6 = vcmp.eq.f32.partialorder %v7012_v56, inf  ;;  %v7018_v32 = vand.u32 2147483648, %v7012_v56  ;;  %vm7017_vm7 = vcmp.eq.f32.partialorder %v7012_v56, 0.0 }
 0x915   : > { %v10407_v57 = vpop.eup %10406 }
 0x916   : > { %v7014_v25 = vmul.f32 %v10407_v57, %v7012_v56 }
 0x918   : > { %v7016_v58 = vsel %vm7015_vm6, %v7012_v56, %v7014_v25 }
 0x919   : > { %v7019_v59 = vsel %vm7017_vm7, %v7018_v32, %v7016_v58 }
 0x91a   : > { %v7020_v60 = vadd.f32 1e-06, %v7019_v59 }
 0x91c   : > { %10408 = vrcp.f32 %v7020_v60 }
 0x929   : > { %v10409_v15 = vpop.eup %10408 }
 0x92a   : > { %v7022_v0 = vmul.f32 %v10409_v15, %v7006_v28  ;;  %v7652_v28 = vsub.f32 %v12014_v16, %v7651_v22 }
 0x92c   : > { %v7029_v5 = vmul.f32 %v9038_v63, %v7022_v0  ;;  %v7653_v33 = vand.u32 4294901760, %v7652_v28 }
 0x92e   : > { %v11948_v7 = vadd.f32 %v9039_v1, %v7029_v5 }
 0x930   : > { %v7042_v20 = vsel %vm822_vm1, %v11948_v7, 0 }
 0x931   : > { %v7113_v61 = vand.u32 4294901760, %v7042_v20 }
 0x933   : > { %v7114_v62 = vsub.f32 %v7042_v20, %v7113_v61  ;;  %9936 = vmatmul.mubr.f32.vlgmr.msra.gmra.mxu1 %v7113_v61 }
 0x934   : > { %9950 = vmatpush3.msra.mxu1 %v11895_v34  ;;  %9957 = vmatprep.mubr.msk.f32.mxu1 %vm10807_vm2, %v10806_v6 }
 0x935   : > { %9951 = vmatprep.subr.mxu1 %v10806_v6  ;;  %v7115_v2 = vand.u32 4294901760, %v7114_v62 }
 0x936   : > { %9952 = vmatpush3.msra.mxu1 %v11897_v36 }
 0x937   : > { %9953 = vmatprep.subr.mxu1 %v10806_v6  ;;  %v7116_v3 = vsub.f32 %v7114_v62, %v7115_v2 }
 0x938   : > { %9954 = vmatpush3.msra.mxu1 %v11899_v37 }
 0x939   : > { %9955 = vmatprep.subr.mxu1 %v10806_v6  ;;  %v7117_v4 = vand.u32 4294901760, %v7116_v3 }
 0x93a   : > { %9956 = vmatpush3.msra.mxu1 %v11902_v39 }
 0x93b   : > { %9958 = vmatmul.mubr.f32.vlgmr.msra.gmra.mxu1 %v7115_v2  ;;  %9971 = vmatprep.subr.mxu1 %v10806_v6 }
 0x93c   : > { %9925 = vmatmul.mubr.f32.vlgmr.msra.gmra.mxu0 %v7117_v4  ;;  %9972 = vmatpush3.msra.mxu1 %v11895_v34  ;;  %v7659_v34 = vsub.f32 %v12026_v23, %v7658_v17 }
 0x93d   : > { %9939 = vmatpush3.msra.mxu0 %v11905_v40  ;;  %9973 = vmatprep.subr.mxu1 %v10806_v6 }
 0x93e   : > { %9940 = vmatprep.subr.mxu0 %v10806_v6  ;;  %9974 = vmatpush3.msra.mxu1 %v11897_v36  ;;  %v7665_v36 = vand.u32 4294901760, %v12038_v29  ;;  %v7660_v40 = vand.u32 4294901760, %v7659_v34 }
 0x93f   : > { %9941 = vmatpush3.msra.mxu0 %v11908_v41  ;;  %9975 = vmatprep.subr.mxu1 %v10806_v6 }
 0x940   : > { %9942 = vmatprep.subr.mxu0 %v10806_v6  ;;  %9976 = vmatpush3.msra.mxu1 %v11899_v37  ;;  %v12049_v37 = vand.u32 4294901760, %v7532_v31  ;;  %v7666_v41 = vsub.f32 %v12038_v29, %v7665_v36 }
 0x941   : > { %9943 = vmatpush3.msra.mxu0 %v11911_v42  ;;  %9977 = vmatprep.subr.mxu1 %v10806_v6 }
 0x942   : > { %9944 = vmatprep.subr.mxu0 %v10806_v6  ;;  %9946 = vmatprep.mubr.msk.f32.mxu0 %vm10807_vm2, %v10806_v6  ;;  %v12061_v42 = vsub.f32 %v7532_v31, %v12049_v37 }
 0x943   : > { %9945 = vmatpush3.msra.mxu0 %v11915_v43  ;;  %9978 = vmatpush3.msra.mxu1 %v11902_v39  ;;  %v7531_v39 = vld [vmem:[%s11239_s29 + $0x8] sm:$0xff] }
 0x944   : > { %9979 = vmatprep.mubr.msk.f32.mxu1 %vm10807_vm2, %v10806_v6  ;;  %9947 = vmatmul.mubr.f32.vlgmr.msra.gmra.mxu0 %v7114_v62  ;;  %v12063_v43 = vand.u32 4294901760, %v7531_v39 }
 0x945   : > { %9960 = vmatprep.subr.mxu0 %v10806_v6  ;;  %9980 = vmatmul.mubr.f32.vlgmr.msra.gmra.mxu1 %v7113_v61 }
 0x946   : > { %9961 = vmatpush3.msra.mxu0 %v7150_v44  ;;  %9968 = vmatprep.mubr.msk.f32.mxu0 %vm10807_vm2, %v10806_v6  ;;  %v7672_v44 = vand.u32 4294901760, %v12053_v38  ;;  %v12072_v47 = vsub.f32 %v7531_v39, %v12063_v43 }
 0x947   : > { %9962 = vmatprep.subr.mxu0 %v10806_v6  ;;  %10001 = vmatprep.subr.mxu1 %v10806_v6 }
 0x948   : > { %9963 = vmatpush3.msra.mxu0 %v7157_v45  ;;  %10017 = vmatprep.mubr.msk.f32.mxu1 %vm10807_vm2, %v10806_v6  ;;  %v7530_v45 = vld [vmem:[%s11239_s29] sm:$0xff]  ;;  %v7673_v49 = vsub.f32 %v12053_v38, %v7672_v44  ;;  %v7686_v51 = vand.u32 4294901760, %v12072_v47 }
 0x949   : > { %9964 = vmatprep.subr.mxu0 %v10806_v6  ;;  %10002 = vmatpush3.msra.mxu1 %v7646_v27  ;;  %v12074_v48 = vand.u32 4294901760, %v7530_v45 }
 0x94a   : > { %9965 = vmatpush3.msra.mxu0 %v7164_v46  ;;  %10003 = vmatprep.subr.mxu1 %v10806_v6  ;;  %v7667_v46 = vand.u32 4294901760, %v7666_v41  ;;  %v7674_v53 = vand.u32 4294901760, %v7673_v49  ;;  %v7687_v55 = vsub.f32 %v12072_v47, %v7686_v51 }
 0x94b   : > { %9966 = vmatprep.subr.mxu0 %v10806_v6  ;;  %10004 = vmatpush3.msra.mxu1 %v7653_v33  ;;  %v12087_v52 = vsub.f32 %v7530_v45, %v12074_v48 }
 0x94c   : > { %9967 = vmatpush3.msra.mxu0 %v7171_v35  ;;  %10005 = vmatprep.subr.mxu1 %v10806_v6  ;;  %v7679_v35 = vand.u32 4294901760, %v12061_v42  ;;  %v7688_v57 = vand.u32 4294901760, %v7687_v55 }
 0x94d   : > { %9969 = vmatmul.mubr.f32.vlgmr.msra.gmra.mxu0 %v7113_v61  ;;  %9982 = vmatprep.subr.mxu0 %v10806_v6  ;;  %v7693_v56 = vand.u32 4294901760, %v12087_v52 }
 0x94e   : > { %9998 = vmatprep.mubr.msk.f32.mxu0 %vm10807_vm2, %v10806_v6  ;;  %9983 = vmatpush3.msra.mxu0 %v12001_v9  ;;  %v7680_v50 = vsub.f32 %v12061_v42, %v7679_v35 }
 0x94f   : > { %9984 = vmatprep.subr.mxu0 %v10806_v6  ;;  %10006 = vmatpush3.msra.mxu1 %v7660_v40  ;;  %v7694_v25 = vsub.f32 %v12087_v52, %v7693_v56 }
 0x950   : > { %9985 = vmatpush3.msra.mxu0 %v12007_v12  ;;  %10007 = vmatprep.subr.mxu1 %v10806_v6  ;;  %v7681_v54 = vand.u32 4294901760, %v7680_v50 }
 0x951   : > { %9986 = vmatprep.subr.mxu0 %v10806_v6  ;;  %10008 = vmatpush3.msra.mxu1 %v7667_v46  ;;  %v7695_v32 = vand.u32 4294901760, %v7694_v25 }
 0x952   : > { %9987 = vmatpush3.msra.mxu0 %v12016_v18  ;;  %10009 = vmatprep.subr.mxu1 %v10806_v6 }
 0x953   : > { %9988 = vmatprep.subr.mxu0 %v10806_v6  ;;  %10010 = vmatpush3.msra.mxu1 %v7674_v53 }
 0x954   : > { %9989 = vmatpush3.msra.mxu0 %v12028_v24  ;;  %10011 = vmatprep.subr.mxu1 %v10806_v6 }
 0x955   : > { %9990 = vmatprep.subr.mxu0 %v10806_v6  ;;  %10012 = vmatpush3.msra.mxu1 %v7681_v54  ;;  %v8080_v54 = vld [vmem:[%s11244_s26] sm:$0xff] }
 0x956   : > { %9991 = vmatpush3.msra.mxu0 %v12041_v30  ;;  %10013 = vmatprep.subr.mxu1 %v10806_v6  ;;  %v12269_v25 = vand.u32 4294901760, %v8080_v54 }
 0x957   : > { %9992 = vmatprep.subr.mxu0 %v10806_v6  ;;  %10014 = vmatpush3.msra.mxu1 %v7688_v57 }
 0x958   : > { %9993 = vmatpush3.msra.mxu0 %v12049_v37  ;;  %10015 = vmatprep.subr.mxu1 %v10806_v6 }
 0x959   : > { %9994 = vmatprep.subr.mxu0 %v10806_v6  ;;  %10016 = vmatpush3.msra.mxu1 %v7695_v32 }
 0x95a   : > { %9995 = vmatpush3.msra.mxu0 %v12063_v43  ;;  %10039 = vmatprep.subr.mxu1 %v10806_v6 }
 0x95b   : > { %9996 = vmatprep.subr.mxu0 %v10806_v6 }
 0x95c   : > { %9997 = vmatpush3.msra.mxu0 %v12074_v48 }
 0x95d   : > { %10020 = vmatprep.subr.mxu0 %v10806_v6 }
 0x9f3   : > { %v7210_v58 = vpop.f32.mrf.mxu1 }
 0x9f5   : > { %v9937_v59 = vpop.f32.mrf.mxu1 }
 0x9fb   : > { %v7367_v60 = vpop.f32.mrf.mxu1 }
 0x9fc   : > { %v7119_v15 = vpop.f32.mrf.mxu0 }
 0x9fd   : > { %v9959_v63 = vpop.f32.mrf.mxu1  ;;  %v7211_v20 = vadd.f32 %v7210_v58, %v7119_v15 }
 0x9fe   : > { %v9926_v0 = vpop.f32.mrf.mxu0 }
 0xa04   : > { %v7290_v1 = vpop.f32.mrf.mxu0 }
 0xa05   : > { %v7525_v5 = vpop.f32.mrf.mxu1  ;;  %v7291_v2 = vadd.f32 %v7290_v1, %v7211_v20 }
 0xa06   : > { %v9948_v61 = vpop.f32.mrf.mxu0 }
 0xa07   : > { %v9981_v62 = vpop.f32.mrf.mxu1  ;;  %v7368_v3 = vadd.f32 %v7367_v60, %v7291_v2  ;;  %v12282_v60 = vsub.f32 %v8080_v54, %v12269_v25 }
 0xa09   : > { %v8242_v1 = vand.u32 4294901760, %v12282_v60 }
 0xa0b   : > { %v8243_v20 = vsub.f32 %v12282_v60, %v8242_v1 }
 0xa0d   : > { %v7450_v4 = vpop.f32.mrf.mxu0  ;;  %v8244_v61 = vand.u32 4294901760, %v8243_v20 }
 0xa0e   : > { %v7451_v8 = vadd.f32 %v7450_v4, %v7368_v3 }
 0xa0f   : > { %v9970_v10 = vpop.f32.mrf.mxu0 }
 0xa10   : > { %v7526_v13 = vadd.f32 %v7525_v5, %v7451_v8 }
 0xa12   : > { %v7529_v19 = vmax.f32 %v7526_v13, 0.0 }
 0xa14   : > { %v7540_v21 = vsel %vm7538_vm8, %v7529_v19, 0 }
 0xa15   : > { %v12105_v26 = vand.u32 4294901760, %v7540_v21 }
 0xa17   : > { %v7616_v27 = vsub.f32 %v7540_v21, %v12105_v26  ;;  %10018 = vmatmul.mubr.f32.vlgmr.msra.gmra.mxu1 %v12105_v26 }
 0xa18   : > { %10040 = vmatpush3.msra.mxu1 %v12001_v9  ;;  %10055 = vmatprep.mubr.msk.f32.mxu1 %vm10807_vm2, %v10806_v6 }
 0xa19   : > { %10041 = vmatprep.subr.mxu1 %v10806_v6  ;;  %v7617_v28 = vand.u32 4294901760, %v7616_v27 }
 0xa1a   : > { %10042 = vmatpush3.msra.mxu1 %v12007_v12 }
 0xa1b   : > { %10043 = vmatprep.subr.mxu1 %v10806_v6  ;;  %v7618_v31 = vsub.f32 %v7616_v27, %v7617_v28 }
 0xa1c   : > { %10044 = vmatpush3.msra.mxu1 %v12016_v18 }
 0xa1d   : > { %10045 = vmatprep.subr.mxu1 %v10806_v6  ;;  %v7619_v33 = vand.u32 4294901760, %v7618_v31 }
 0xa1e   : > { %10046 = vmatpush3.msra.mxu1 %v12028_v24 }
 0xa1f   : > { %10047 = vmatprep.subr.mxu1 %v10806_v6  ;;  %9999 = vmatmul.mubr.f32.vlgmr.msra.gmra.mxu0 %v7619_v33 }
 0xa20   : > { %10021 = vmatpush3.msra.mxu0 %v12005_v11  ;;  %10048 = vmatpush3.msra.mxu1 %v12041_v30 }
 0xa21   : > { %10022 = vmatprep.subr.mxu0 %v10806_v6  ;;  %10049 = vmatprep.subr.mxu1 %v10806_v6 }
 0xa22   : > { %10023 = vmatpush3.msra.mxu0 %v12014_v16  ;;  %10050 = vmatpush3.msra.mxu1 %v12049_v37 }
 0xa23   : > { %10024 = vmatprep.subr.mxu0 %v10806_v6  ;;  %10051 = vmatprep.subr.mxu1 %v10806_v6 }
 0xa24   : > { %10025 = vmatpush3.msra.mxu0 %v12026_v23  ;;  %10052 = vmatpush3.msra.mxu1 %v12063_v43 }
 0xa25   : > { %10026 = vmatprep.subr.mxu0 %v10806_v6  ;;  %10053 = vmatprep.subr.mxu1 %v10806_v6 }
 0xa26   : > { %10027 = vmatpush3.msra.mxu0 %v12038_v29  ;;  %10054 = vmatpush3.msra.mxu1 %v12074_v48 }
 0xa27   : > { %10028 = vmatprep.subr.mxu0 %v10806_v6  ;;  %10056 = vmatmul.mubr.f32.vlgmr.msra.gmra.mxu1 %v7617_v28 }
 0xa28   : > { %10077 = vmatprep.subr.mxu1 %v10806_v6  ;;  %10029 = vmatpush3.msra.mxu0 %v12053_v38 }
 0xa29   : > { %10078 = vmatpush3.msra.mxu1 %v12001_v9  ;;  %10030 = vmatprep.subr.mxu0 %v10806_v6  ;;  %v8087_v9 = vld [vmem:[%s11244_s26 + $0x38] sm:$0xff] }
 0xa2a   : > { %10079 = vmatprep.subr.mxu1 %v10806_v6  ;;  %10031 = vmatpush3.msra.mxu0 %v12061_v42  ;;  %v12196_v11 = vand.u32 4294901760, %v8087_v9 }
 0xa2b   : > { %10080 = vmatpush3.msra.mxu1 %v12007_v12  ;;  %10032 = vmatprep.subr.mxu0 %v10806_v6  ;;  %v8086_v12 = vld [vmem:[%s11244_s26 + $0x30] sm:$0xff] }
 0xa2c   : > { %10081 = vmatprep.subr.mxu1 %v10806_v6  ;;  %10033 = vmatpush3.msra.mxu0 %v12072_v47  ;;  %v12202_v16 = vand.u32 4294901760, %v8086_v12 }
 0xa2d   : > { %10082 = vmatpush3.msra.mxu1 %v12016_v18  ;;  %10034 = vmatprep.subr.mxu0 %v10806_v6  ;;  %v8085_v18 = vld [vmem:[%s11244_s26 + $0x28] sm:$0xff] }
 0xa2e   : > { %10083 = vmatprep.subr.mxu1 %v10806_v6  ;;  %10035 = vmatpush3.msra.mxu0 %v12087_v52  ;;  %v12209_v23 = vsub.f32 %v8086_v12, %v12202_v16 }
 0xa2f   : > { %10036 = vmatprep.mubr.msk.f32.mxu0 %vm10807_vm2, %v10806_v6  ;;  %10084 = vmatpush3.msra.mxu1 %v12028_v24  ;;  %v12211_v24 = vand.u32 4294901760, %v8085_v18 }
 0xa30   : > { %10037 = vmatmul.mubr.f32.vlgmr.msra.gmra.mxu0 %v7616_v27  ;;  %10058 = vmatprep.subr.mxu0 %v10806_v6 }
 0xa31   : > { %10085 = vmatprep.subr.mxu1 %v10806_v6  ;;  %10059 = vmatpush3.msra.mxu0 %v7644_v14  ;;  %v12200_v14 = vsub.f32 %v8087_v9, %v12196_v11  ;;  %v12221_v34 = vsub.f32 %v8085_v18, %v12211_v24 }
 0xa32   : > { %10086 = vmatpush3.msra.mxu1 %v12041_v30  ;;  %10060 = vmatprep.subr.mxu0 %v10806_v6  ;;  %v8200_v30 = vand.u32 4294901760, %v12209_v23 }
 0xa33   : > { %10087 = vmatprep.subr.mxu1 %v10806_v6  ;;  %10061 = vmatpush3.msra.mxu0 %v7651_v22  ;;  %v8193_v22 = vand.u32 4294901760, %v12200_v14  ;;  %v8207_v40 = vand.u32 4294901760, %v12221_v34 }
 0xa34   : > { %10088 = vmatpush3.msra.mxu1 %v12049_v37  ;;  %10062 = vmatprep.subr.mxu0 %v10806_v6  ;;  %v8083_v37 = vld [vmem:[%s11244_s26 + $0x18] sm:$0xff]  ;;  %v8201_v39 = vsub.f32 %v12209_v23, %v8200_v30 }
 0xa35   : > { %10089 = vmatprep.subr.mxu1 %v10806_v6  ;;  %10063 = vmatpush3.msra.mxu0 %v7658_v17  ;;  %v8084_v17 = vld [vmem:[%s11244_s26 + $0x20] sm:$0xff]  ;;  %v8194_v29 = vsub.f32 %v12200_v14, %v8193_v22  ;;  %v12236_v42 = vand.u32 4294901760, %v8083_v37  ;;  %v8208_v45 = vsub.f32 %v12221_v34, %v8207_v40 }
 0xa36   : > { %10090 = vmatpush3.msra.mxu1 %v12063_v43  ;;  %10064 = vmatprep.subr.mxu0 %v10806_v6  ;;  %v8082_v43 = vld [vmem:[%s11244_s26 + $0x10] sm:$0xff] }
 0xa37   : > { %10091 = vmatprep.subr.mxu1 %v10806_v6  ;;  %10065 = vmatpush3.msra.mxu0 %v7665_v36  ;;  %v12223_v36 = vand.u32 4294901760, %v8084_v17  ;;  %v8195_v38 = vand.u32 4294901760, %v8194_v29  ;;  %v12248_v47 = vsub.f32 %v8083_v37, %v12236_v42  ;;  %v8209_v49 = vand.u32 4294901760, %v8208_v45 }
 0xa38   : > { %10092 = vmatpush3.msra.mxu1 %v12074_v48  ;;  %10093 = vmatprep.mubr.msk.f32.mxu1 %vm10807_vm2, %v10806_v6  ;;  %v8081_v48 = vld [vmem:[%s11244_s26 + $0x8] sm:$0xff] }
 0xa39   : > { %10066 = vmatprep.subr.mxu0 %v10806_v6  ;;  %10094 = vmatmul.mubr.f32.vlgmr.msra.gmra.mxu1 %v12105_v26  ;;  %v12233_v41 = vsub.f32 %v8084_v17, %v12223_v36  ;;  %v12258_v52 = vand.u32 4294901760, %v8081_v48  ;;  %v8221_v53 = vand.u32 4294901760, %v12248_v47 }
 0xa3a   : > { %10067 = vmatpush3.msra.mxu0 %v7672_v44  ;;  %10074 = vmatprep.mubr.msk.f32.mxu0 %vm10807_vm2, %v10806_v6  ;;  %v8202_v44 = vand.u32 4294901760, %v8201_v39 }
 0xa3b   : > { %10068 = vmatprep.subr.mxu0 %v10806_v6  ;;  %10115 = vmatprep.subr.mxu1 %v10806_v6  ;;  %v8214_v46 = vand.u32 4294901760, %v12233_v41  ;;  %v12267_v57 = vsub.f32 %v8081_v48, %v12258_v52  ;;  %v8222_v32 = vsub.f32 %v12248_v47, %v8221_v53 }
 0xa3c   : > { %10069 = vmatpush3.msra.mxu0 %v7679_v35  ;;  %10131 = vmatprep.mubr.msk.f32.mxu1 %vm10807_vm2, %v10806_v6  ;;  %v12244_v35 = vand.u32 4294901760, %v8082_v43 }
 0xa3d   : > { %10070 = vmatprep.subr.mxu0 %v10806_v6  ;;  %10116 = vmatpush3.msra.mxu1 %v8195_v38  ;;  %v8215_v50 = vsub.f32 %v12233_v41, %v8214_v46  ;;  %v8235_v59 = vand.u32 4294901760, %v12267_v57  ;;  %v8223_v15 = vand.u32 4294901760, %v8222_v32 }
 0xa3e   : > { %10071 = vmatpush3.msra.mxu0 %v7686_v51  ;;  %10117 = vmatprep.subr.mxu1 %v10806_v6  ;;  %v12256_v51 = vsub.f32 %v8082_v43, %v12244_v35 }
 0xa3f   : > { %10072 = vmatprep.subr.mxu0 %v10806_v6  ;;  %10118 = vmatpush3.msra.mxu1 %v8202_v44  ;;  %v8216_v55 = vand.u32 4294901760, %v8215_v50  ;;  %v8236_v0 = vsub.f32 %v12267_v57, %v8235_v59 }
 0xa40   : > { %10073 = vmatpush3.msra.mxu0 %v7693_v56  ;;  %10119 = vmatprep.subr.mxu1 %v10806_v6  ;;  %v8228_v56 = vand.u32 4294901760, %v12256_v51 }
 0xa41   : > { %10075 = vmatmul.mubr.f32.vlgmr.msra.gmra.mxu0 %v12105_v26  ;;  %10096 = vmatprep.subr.mxu0 %v10806_v6  ;;  %v8237_v5 = vand.u32 4294901760, %v8236_v0  ;;  %v9041_v0 = vld [vmem:[%s807_s0] ss:$0 sm:$0xff] }
 0xa42   : > { %10112 = vmatprep.mubr.msk.f32.mxu0 %vm10807_vm2, %v10806_v6  ;;  %10097 = vmatpush3.msra.mxu0 %v12196_v11  ;;  %v8229_v58 = vsub.f32 %v12256_v51, %v8228_v56 }
 0xa43   : > { %10098 = vmatprep.subr.mxu0 %v10806_v6  ;;  %10120 = vmatpush3.msra.mxu1 %v8209_v49 }
 0xa44   : > { %10099 = vmatpush3.msra.mxu0 %v12202_v16  ;;  %10121 = vmatprep.subr.mxu1 %v10806_v6  ;;  %v8230_v63 = vand.u32 4294901760, %v8229_v58 }
 0xa45   : > { %10100 = vmatprep.subr.mxu0 %v10806_v6  ;;  %10122 = vmatpush3.msra.mxu1 %v8216_v55 }
 0xa46   : > { %10101 = vmatpush3.msra.mxu0 %v12211_v24  ;;  %10123 = vmatprep.subr.mxu1 %v10806_v6 }
 0xa47   : > { %10102 = vmatprep.subr.mxu0 %v10806_v6  ;;  %10124 = vmatpush3.msra.mxu1 %v8223_v15  ;;  %v9040_v15 = vld [vmem:[%s804_s21] ss:$0 sm:$0xff] }
 0xa48   : > { %10103 = vmatpush3.msra.mxu0 %v12223_v36  ;;  %10125 = vmatprep.subr.mxu1 %v10806_v6 }
 0xa49   : > { %10104 = vmatprep.subr.mxu0 %v10806_v6  ;;  %10126 = vmatpush3.msra.mxu1 %v8230_v63 }
 0xa4a   : > { %10105 = vmatpush3.msra.mxu0 %v12236_v42  ;;  %10127 = vmatprep.subr.mxu1 %v10806_v6 }
 0xa4b   : > { %10106 = vmatprep.subr.mxu0 %v10806_v6  ;;  %10128 = vmatpush3.msra.mxu1 %v8237_v5 }
 0xa4c   : > { %10107 = vmatpush3.msra.mxu0 %v12244_v35  ;;  %10129 = vmatprep.subr.mxu1 %v10806_v6 }
 0xa4d   : > { %10108 = vmatprep.subr.mxu0 %v10806_v6  ;;  %10130 = vmatpush3.msra.mxu1 %v8244_v61 }
 0xa4e   : > { %10109 = vmatpush3.msra.mxu0 %v12258_v52  ;;  %10153 = vmatprep.subr.mxu1 %v10806_v6 }
 0xa4f   : > { %10110 = vmatprep.subr.mxu0 %v10806_v6 }
 0xa50   : > { %10111 = vmatpush3.msra.mxu0 %v12269_v25 }
 0xa51   : > { %10134 = vmatprep.subr.mxu0 %v10806_v6 }
 0xad7   : > { %v7732_v62 = vpop.f32.mrf.mxu1 }
 0xad9   : > { %v10019_v2 = vpop.f32.mrf.mxu1 }
 0xadf   : > { %v7621_v3 = vpop.f32.mrf.mxu0 }
 0xae0   : > { %v7733_v26 = vadd.f32 %v7732_v62, %v7621_v3 }
 0xae1   : > { %v10000_v4 = vpop.f32.mrf.mxu0 }
 0xae7   : > { %v7901_v8 = vpop.f32.mrf.mxu1 }
 0xae9   : > { %v10057_v10 = vpop.f32.mrf.mxu1 }
 0xaf0   : > { %v7820_v13 = vpop.f32.mrf.mxu0 }
 0xaf1   : > { %v7821_v28 = vadd.f32 %v7820_v13, %v7733_v26 }
 0xaf2   : > { %v10038_v19 = vpop.f32.mrf.mxu0 }
 0xaf3   : > { %v7902_v31 = vadd.f32 %v7901_v8, %v7821_v28 }
 0xaf9   : > { %v8075_v21 = vpop.f32.mrf.mxu1 }
 0xafb   : > { %v10095_v27 = vpop.f32.mrf.mxu1 }
 0xb01   : > { %v7996_v33 = vpop.f32.mrf.mxu0 }
 0xb02   : > { %v7997_v9 = vadd.f32 %v7996_v33, %v7902_v31 }
 0xb03   : > { %v10076_v12 = vpop.f32.mrf.mxu0 }
 0xb04   : > { %v8076_v18 = vadd.f32 %v8075_v21, %v7997_v9 }
 0xb06   : > { %v8079_v17 = vmax.f32 %v8076_v18, 0.0 }
 0xb08   : > { %v8089_v29 = vsel %vm7538_vm8, %v8079_v17, 0 }
 0xb09   : > { %v12300_v37 = vand.u32 4294901760, %v8089_v29 }
 0xb0b   : > { %v8165_v38 = vsub.f32 %v8089_v29, %v12300_v37  ;;  %10132 = vmatmul.mubr.f32.vlgmr.msra.gmra.mxu1 %v12300_v37 }
 0xb0c   : > { %10154 = vmatpush3.msra.mxu1 %v12196_v11  ;;  %10169 = vmatprep.mubr.msk.f32.mxu1 %vm10807_vm2, %v10806_v6 }
 0xb0d   : > { %10155 = vmatprep.subr.mxu1 %v10806_v6  ;;  %v8166_v39 = vand.u32 4294901760, %v8165_v38 }
 0xb0e   : > { %10156 = vmatpush3.msra.mxu1 %v12202_v16 }
 0xb0f   : > { %10157 = vmatprep.subr.mxu1 %v10806_v6  ;;  %v8167_v43 = vsub.f32 %v8165_v38, %v8166_v39 }
 0xb10   : > { %10158 = vmatpush3.msra.mxu1 %v12211_v24 }
 0xb11   : > { %10159 = vmatprep.subr.mxu1 %v10806_v6  ;;  %v8168_v44 = vand.u32 4294901760, %v8167_v43 }
 0xb12   : > { %10160 = vmatpush3.msra.mxu1 %v12223_v36 }
 0xb13   : > { %10161 = vmatprep.subr.mxu1 %v10806_v6  ;;  %10113 = vmatmul.mubr.f32.vlgmr.msra.gmra.mxu0 %v8168_v44 }
 0xb14   : > { %10135 = vmatpush3.msra.mxu0 %v12200_v14  ;;  %10162 = vmatpush3.msra.mxu1 %v12236_v42 }
 0xb15   : > { %10136 = vmatprep.subr.mxu0 %v10806_v6  ;;  %10163 = vmatprep.subr.mxu1 %v10806_v6 }
 0xb16   : > { %10137 = vmatpush3.msra.mxu0 %v12209_v23  ;;  %10164 = vmatpush3.msra.mxu1 %v12244_v35 }
 0xb17   : > { %10138 = vmatprep.subr.mxu0 %v10806_v6  ;;  %10165 = vmatprep.subr.mxu1 %v10806_v6 }
 0xb18   : > { %10139 = vmatpush3.msra.mxu0 %v12221_v34  ;;  %10166 = vmatpush3.msra.mxu1 %v12258_v52 }
 0xb19   : > { %10140 = vmatprep.subr.mxu0 %v10806_v6  ;;  %10167 = vmatprep.subr.mxu1 %v10806_v6 }
 0xb1a   : > { %10141 = vmatpush3.msra.mxu0 %v12233_v41  ;;  %10168 = vmatpush3.msra.mxu1 %v12269_v25 }
 0xb1b   : > { %10142 = vmatprep.subr.mxu0 %v10806_v6  ;;  %10170 = vmatmul.mubr.f32.vlgmr.msra.gmra.mxu1 %v8166_v39 }
 0xb1c   : > { %10191 = vmatprep.subr.mxu1 %v10806_v6  ;;  %10143 = vmatpush3.msra.mxu0 %v12248_v47 }
 0xb1d   : > { %10192 = vmatpush3.msra.mxu1 %v12196_v11  ;;  %10144 = vmatprep.subr.mxu0 %v10806_v6 }
 0xb1e   : > { %10193 = vmatprep.subr.mxu1 %v10806_v6  ;;  %10145 = vmatpush3.msra.mxu0 %v12256_v51 }
 0xb1f   : > { %10194 = vmatpush3.msra.mxu1 %v12202_v16  ;;  %10146 = vmatprep.subr.mxu0 %v10806_v6 }
 0xb20   : > { %10195 = vmatprep.subr.mxu1 %v10806_v6  ;;  %10147 = vmatpush3.msra.mxu0 %v12267_v57 }
 0xb21   : > { %10196 = vmatpush3.msra.mxu1 %v12211_v24  ;;  %10148 = vmatprep.subr.mxu0 %v10806_v6 }
 0xb22   : > { %10197 = vmatprep.subr.mxu1 %v10806_v6  ;;  %10149 = vmatpush3.msra.mxu0 %v12282_v60 }
 0xb23   : > { %10150 = vmatprep.mubr.msk.f32.mxu0 %vm10807_vm2, %v10806_v6  ;;  %10198 = vmatpush3.msra.mxu1 %v12223_v36 }
 0xb24   : > { %10151 = vmatmul.mubr.f32.vlgmr.msra.gmra.mxu0 %v8165_v38  ;;  %10172 = vmatprep.subr.mxu0 %v10806_v6 }
 0xb25   : > { %10199 = vmatprep.subr.mxu1 %v10806_v6  ;;  %10173 = vmatpush3.msra.mxu0 %v8193_v22 }
 0xb26   : > { %10200 = vmatpush3.msra.mxu1 %v12236_v42  ;;  %10174 = vmatprep.subr.mxu0 %v10806_v6 }
 0xb27   : > { %10201 = vmatprep.subr.mxu1 %v10806_v6  ;;  %10175 = vmatpush3.msra.mxu0 %v8200_v30 }
 0xb28   : > { %10202 = vmatpush3.msra.mxu1 %v12244_v35  ;;  %10176 = vmatprep.subr.mxu0 %v10806_v6 }
 0xb29   : > { %10203 = vmatprep.subr.mxu1 %v10806_v6  ;;  %10177 = vmatpush3.msra.mxu0 %v8207_v40 }
 0xb2a   : > { %10204 = vmatpush3.msra.mxu1 %v12258_v52  ;;  %10178 = vmatprep.subr.mxu0 %v10806_v6 }
 0xb2b   : > { %10205 = vmatprep.subr.mxu1 %v10806_v6  ;;  %10179 = vmatpush3.msra.mxu0 %v8214_v46 }
 0xb2c   : > { %10206 = vmatpush3.msra.mxu1 %v12269_v25  ;;  %10207 = vmatprep.mubr.msk.f32.mxu1 %vm10807_vm2, %v10806_v6 }
 0xb2d   : > { %10180 = vmatprep.subr.mxu0 %v10806_v6  ;;  %10208 = vmatmul.mubr.f32.vlgmr.msra.gmra.mxu1 %v12300_v37 }
 0xb2e   : > { %10181 = vmatpush3.msra.mxu0 %v8221_v53  ;;  %10188 = vmatprep.mubr.msk.f32.mxu0 %vm10807_vm2, %v10806_v6 }
 0xb2f   : > { %10182 = vmatprep.subr.mxu0 %v10806_v6 }
 0xb30   : > { %10183 = vmatpush3.msra.mxu0 %v8228_v56 }
 0xb31   : > { %10184 = vmatprep.subr.mxu0 %v10806_v6 }
 0xb32   : > { %10185 = vmatpush3.msra.mxu0 %v8235_v59 }
 0xb33   : > { %10186 = vmatprep.subr.mxu0 %v10806_v6 }
 0xb34   : > { %10187 = vmatpush3.msra.mxu0 %v8242_v1 }
 0xb35   : > { %10189 = vmatmul.mubr.f32.vlgmr.msra.gmra.mxu0 %v12300_v37 }
 0xbcb   : > { %v8281_v11 = vpop.f32.mrf.mxu1 }
 0xbcd   : > { %v10133_v14 = vpop.f32.mrf.mxu1 }
 0xbd3   : > { %v8170_v16 = vpop.f32.mrf.mxu0 }
 0xbd4   : > { %v8171_v36 = vadd.f32 %v8170_v16, %v11948_v7 }
 0xbd5   : > { %v10114_v22 = vpop.f32.mrf.mxu0 }
 0xbd6   : > { %v8282_v41 = vadd.f32 %v8281_v11, %v8171_v36 }
 0xbdb   : > { %v8450_v23 = vpop.f32.mrf.mxu1 }
 0xbdd   : > { %v10171_v24 = vpop.f32.mrf.mxu1 }
 0xbe4   : > { %v8369_v30 = vpop.f32.mrf.mxu0 }
 0xbe5   : > { %v8370_v45 = vadd.f32 %v8369_v30, %v8282_v41 }
 0xbe6   : > { %v10152_v34 = vpop.f32.mrf.mxu0 }
 0xbe7   : > { %v8451_v6 = vadd.f32 %v8450_v23, %v8370_v45 }
 0xbed   : > { %v8624_v40 = vpop.f32.mrf.mxu1 }
 0xbef   : > { %v10209_v42 = vpop.f32.mrf.mxu1 }
 0xbf5   : > { %v8545_v46 = vpop.f32.mrf.mxu0 }
 0xbf6   : > { %v8546_v35 = vadd.f32 %v8545_v46, %v8451_v6 }
 0xbf7   : > { %v10190_v47 = vpop.f32.mrf.mxu0 }
 0xbf8   : > { %v8625_v48 = vadd.f32 %v8624_v40, %v8546_v35 }
 0xbfa   : > { %v8630_v49 = vsel %vm822_vm1, %v8625_v48, 0.0 }
 0xbfb   : > { %8631 = vadd.xlane.f32.xlu1 %v8630_v49 }
 0xc84   : > { %v8632_v50 = vpop.xlane.xlu1 %8631 }
 0xc85   : > { %v8633_v51 = vmul.f32 0.03125, %v8632_v50 }
 0xc87   : > { %v8634_v52 = vsub.f32 %v8625_v48, %v8633_v51 }
 0xc89   : > { %v8635_v53 = vmul.f32 %v8634_v52, %v8634_v52 }
 0xc8b   : > { %v8636_v54 = vsel %vm822_vm1, %v8635_v53, 0.0 }
 0xc8c   : > { %8637 = vadd.xlane.f32.xlu0 %v8636_v54 }
 0xd15   : > { %v8638_v7 = vpop.xlane.xlu0 %8637 }
 0xd16   : > { %v8639_v55 = vmul.f32 0.032258064, %v8638_v7 }
 0xd18   : > { %10410 = vrsqrt.f32 %v8639_v55  ;;  %vm8642_vm9 = vcmp.eq.f32.partialorder %v8639_v55, inf  ;;  %v8645_v25 = vand.u32 2147483648, %v8639_v55  ;;  %vm8644_vm10 = vcmp.eq.f32.partialorder %v8639_v55, 0.0 }
 0xd25   : > { %v10411_v56 = vpop.eup %10410 }
 0xd26   : > { %v8641_v57 = vmul.f32 %v10411_v56, %v8639_v55 }
 0xd28   : > { %v8643_v32 = vsel %vm8642_vm9, %v8639_v55, %v8641_v57 }
 0xd29   : > { %v8646_v58 = vsel %vm8644_vm10, %v8645_v25, %v8643_v32 }
 0xd2a   : > { %v8647_v59 = vadd.f32 1e-06, %v8646_v58 }
 0xd2c   : > { %10412 = vrcp.f32 %v8647_v59 }
 0xd39   : > { %v10413_v60 = vpop.eup %10412 }
 0xd3a   : > { %v8649_v63 = vmul.f32 %v10413_v60, %v8634_v52 }
 0xd3c   : > { %v8656_v1 = vmul.f32 %v9040_v15, %v8649_v63  ;;  %8668 = sbr.rel (%p9042_p13) target bundleno = 3394 (0xd42), region = 108 }
 0xd3e   : > { %v8663_v5 = vadd.f32 %v9041_v0, %v8656_v1 }
 0xd40   : > { %8664 = vst.msk [vmem:[#allocation2] sm:$0xff] %vm822_vm1, %v8663_v5 }
 0xd41   : > { %8669 = vst.msk [vmem:[%s775_s6] sm:$0xff] %vm822_vm1, %v8663_v5 }
 0xd42 PF: > { %s12651_s25 = sld [smem:[#allocation33_spill]]  ;;  %s8689_s21 = sshll.u32 %s775_s6, 4  ;;  %s8690_s21 = int_to_ptr.vmem [resolvable:$true] %s8689_s21 }
 0xd43   : > { %s12652_s15 = sld [smem:[#allocation28_spill]]  ;;  %s10609_s0 = scalar_lea.vmem %s8690_s21, 128 }
 0xd44   : > { %s12653_s30 = sld [smem:[#allocation38_spill]]  ;;  %p10610_p8 = scmp.ne.s32.totalorder %s8690_s21, %s10609_s0 }
 0xd45   : > { %s12654_s7 = sld [smem:[#allocation59_spill]]  ;;  %s10816_s5 = smov [#allocation15]  }
 0xd46   : > { %s10613_s20 = sshll.u32 %s10816_s5, 4  ;;  %s10614_s20 = int_to_ptr.vmem [resolvable:$false] %s10613_s20 }
 0xd47   : > { %s10615_s3 = scalar_lea.vmem %s10614_s20, 256  ;;  %p10616_p1 = scmp.lt.s32.totalorder %s8690_s21, %s10614_s20 }
 0xd48   : > { %s9045_s11 = sshll.u32 %s12651_s25, 7  ;;  %p10617_p0 = scmp.lt.s32.totalorder %s10615_s3, %s10609_s0 }
 0xd49   : > { %s12655_s2 = sand.u32 1, %s12652_s15  }
 0xd4a   : > { %s8671_s10 = scalar_lea.sflag [#allocation5], %s12655_s2  ;;  %p12656_p4 = scmp.ne.s32.totalorder %s12653_s30, 0 }
 0xd4b   : > { %s8687_s14 = scalar_lea.hbm %s12654_s7, %s9045_s11  ;;  %p10618_p11 = por %p10617_p0, %p10616_p1 }
 0xd4c   : > { %p10611_p5 = pnand %p10610_p8, %p12656_p4 }
 0xd4e   : > { %p10612_p9 = pneg %p10611_p5 }
 0xd50   : > { %p10619_p2 = pnand %p10618_p11, %p10612_p9 }
 0xd52   : > { %10622 = shalt.err (!%p10619_p2)
}
 0xd53   : > { %s10623_s1 = scalar_lea.hbm %s8687_s14, 128  ;;  %s10627_s19 = scalar_lea.hbm %s12654_s7, 256 }
 0xd54   : > { %p10624_p7 = scmp.ne.s32.totalorder %s8687_s14, %s10623_s1  ;;  %p10628_p3 = scmp.lt.s32.totalorder %s8687_s14, %s12654_s7 }
 0xd55   : > { %p10629_p10 = scmp.lt.s32.totalorder %s10627_s19, %s10623_s1 }
 0xd56   : > { %p10625_p12 = pnand %p10624_p7, %p12656_p4 }
 0xd57   : > { %p10630_p13 = por %p10629_p10, %p10628_p3 }
 0xd58   : > { %p10626_p6 = pneg %p10625_p12 }
 0xd5a   : > { %p10631_p8 = pnand %p10630_p13, %p10626_p6 }
 0xd5c   : > { %10634 = shalt.err (!%p10631_p8)
}
 0xd5d   : > { %s12657_s24 = sld [smem:[#allocation32_spill]]  ;;  %s9047_s28 = sshll.u32 %s12651_s25, 3 }
 0xd5e   : > { %s12658_s26 = sld [smem:[#allocation25_spill]]  ;;  %s8704_s8 = sshll.u32 %s11258_s27, 4  ;;  %s12425_s8 = int_to_ptr.vmem [resolvable:$true] %s8704_s8 }
 0xd5f   : > { %s12659_s29 = sld [smem:[#allocation44_spill]]  ;;  %s10635_s0 = scalar_lea.vmem %s12425_s8, 512 }
 0xd60   : > { %10226 = dma.vmem_to_hbm [thread:$0]  (%p12656_p4), %s8690_s21, 128, %s8687_s14, %s8671_s10  }
 0xd61   : > { %s12660_s12 = sld [smem:[#allocation60_spill]]  ;;  %p10636_p4 = scmp.ne.s32.totalorder %s12425_s8, %s10635_s0 }
 0xd62   : > { %s10817_s27 = smov [#allocation16]  }
 0xd63   : > { %s9046_s16 = sshll.u32 %s12657_s24, 2  ;;  %s10639_s25 = sshll.u32 %s10817_s27, 4  ;;  %s10640_s25 = int_to_ptr.vmem [resolvable:$false] %s10639_s25 }
 0xd64   : > { %s8701_s17 = sadd.s32 %s9047_s28, %s9046_s16  ;;  %s12661_s18 = sand.u32 1, %s12658_s26  }
 0xd65   : > { %s9048_s22 = sshll.u32 %s8701_s17, 7  ;;  %s12434_s2 = scalar_lea.sflag [#allocation17], %s12661_s18 }
 0xd66   : > { %p12662_p5 = scmp.ne.s32.totalorder %s12659_s29, 0  ;;  %s10641_s14 = scalar_lea.vmem %s10640_s25, 1024 }
 0xd67   : > { %s12430_s30 = scalar_lea.hbm %s12660_s12, %s9048_s22  ;;  %p10642_p0 = scmp.lt.s32.totalorder %s12425_s8, %s10640_s25 }
 0xd68   : > { %p10637_p9 = pnand %p10636_p4, %p12662_p5  ;;  %p10643_p11 = scmp.lt.s32.totalorder %s10641_s14, %s10635_s0 }
 0xd6a   : > { %p10638_p1 = pneg %p10637_p9  ;;  %p10644_p2 = por %p10643_p11, %p10642_p0 }
 0xd6c   : > { %p10645_p7 = pnand %p10644_p2, %p10638_p1 }
 0xd6e   : > { %10648 = shalt.err (!%p10645_p7)
}
 0xd6f   : > { %s10649_s21 = scalar_lea.hbm %s12430_s30, 512  ;;  %s10653_s20 = scalar_lea.hbm %s12660_s12, 2048 }
 0xd70   : > { %p10650_p12 = scmp.ne.s32.totalorder %s12430_s30, %s10649_s21  ;;  %p10654_p10 = scmp.lt.s32.totalorder %s12430_s30, %s12660_s12 }
 0xd71   : > { %p10655_p13 = scmp.lt.s32.totalorder %s10653_s20, %s10649_s21 }
 0xd72   : > { %p10651_p6 = pnand %p10650_p12, %p12662_p5 }
 0xd73   : > { %p10656_p8 = por %p10655_p13, %p10654_p10 }
 0xd74   : > { %p10652_p3 = pneg %p10651_p6 }
 0xd76   : > { %p10657_p4 = pnand %p10656_p8, %p10652_p3 }
 0xd78   : > { %10660 = shalt.err (!%p10657_p4)
}
 0xd79   : > { %s10818_s4 = smov 128  }
 0xd7a   : > { %10227 = dma.vmem_to_hbm [thread:$0]  (%p12662_p5), %s12425_s8, 512, %s12430_s30, %s12434_s2, %s10818_s4, %s10818_s4, %s10814_s9  }
 0xd7b PF: > { %s12663_s6 = sld [smem:[#allocation36_spill]] }
 0xd7c   : > { %s12664_s19 = sld [smem:[#allocation27_spill]] }
 0xd7d   : > { %s12665_s13 = sld [smem:[#allocation41_spill]] }
 0xd81   : > { %p10263_p9 = scmp.ge.s32.totalorder %s12663_s6, 2 }
 0xd82   : > { %s8719_s23 = sand.u32 1, %s12664_s19  }
 0xd83   : > { %p12666_p1 = scmp.ne.s32.totalorder %s12665_s13, 0  ;;  %s8720_s24 = scalar_lea.sflag [#allocation5], %s8719_s23 }
 0xd85   : > { %p10254_p0 = pnand %p10263_p9, %p12666_p1 }
 0xd87   : > { %p10255_p11 = pneg %p10254_p0 }
 0xd89   : > { %10734 = dma.done.wait (%p10255_p11), %s8720_s24, 128  }
 0xd8a   : > { %10736 = vsyncadd (%p10255_p11), %s8720_s24, 4294967168  ;;  %s12667_s26 = sld [smem:[#allocation24_spill]] }
 0xd8b   : > { %s12668_s16 = sld [smem:[#allocation45_spill]] }
 0xd90   : > { %s8728_s29 = sand.u32 1, %s12667_s26  }
 0xd91   : > { %p12669_p2 = scmp.ne.s32.totalorder %s12668_s16, 0  ;;  %s8729_s28 = scalar_lea.sflag [#allocation17], %s8728_s29 }
 0xd93   : > { %p10257_p7 = pnand %p10263_p9, %p12669_p2 }
 0xd95   : > { %p10258_p12 = pneg %p10257_p7 }
 0xd97   : > { %10738 = dma.done.wait (%p10258_p12), %s8729_s28, 512  }
 0xd98   : > { %10740 = vsyncadd (%p10258_p12), %s8729_s28, 4294966784  ;;  %s41_s26 = sadd.s32 1, %s12663_s6   ;;  %s12671_s29 = sld [smem:[#allocation25_spill]] }
 0xd99   : > { %p12466_p5 = scmp.ge.s32.totalorder %s41_s26, 6   ;;  %s12672_s30 = sld [smem:[#allocation26_spill]] }
 0xd9a   : > { %s12673_s15 = sld [smem:[#allocation43_spill]] }
 0xd9b   : > { %s12674_s16 = sld [smem:[#allocation28_spill]] }
 0xd9c   : > { %s12675_s17 = sld [smem:[#allocation29_spill]] }
 0xd9d   : > { %s12676_s18 = sld [smem:[#allocation42_spill]] }
 0xd9e   : > { %s12677_s19 = sld [smem:[#allocation30_spill]] }
 0xd9f   : > { %s12678_s20 = sld [smem:[#allocation31_spill]] }
 0xda0   : > { %s12679_s21 = sld [smem:[#allocation39_spill]]  ;;  %40 = sbr.rel (!%p12466_p5) target bundleno = 33 (0x21), region = 224 }
 0xda1   : > { %s12680_s22 = sld [smem:[#allocation34_spill]] }
 0xda2   : > { %s12681_s23 = sld [smem:[#allocation35_spill]] }
 0xda3   : > { %s12682_s24 = sld [smem:[#allocation37_spill]] }
 0xda4   : > { %s12683_s25 = sld [smem:[#allocation40_spill]] }
 0xda5   :  { %8734 = vsyncpa [#allocation4], 1 }
 0xda6   :  { %8736 = vsyncpa [#allocation4 + $0x1], 1 }
 0xda7   :  { %8737 = vsyncpa [#allocation7], 1 }
 0xda8   :  { %8739 = vsyncpa [#allocation7 + $0x1], 1 }
 0xda9   :  { %8740 = vsyncpa [#allocation10], 1 }
 0xdaa   :  { %8742 = vsyncpa [#allocation10 + $0x1], 1 }
 0xdab   :  { %8743 = vsyncpa [#allocation13], 1 }
 0xdac   :  { %8745 = vsyncpa [#allocation13 + $0x1], 1 }
 0xdad   :  { %8746 = vsyncpa [#allocation5], 1 }
 0xdae   :  { %8748 = vsyncpa [#allocation5 + $0x1], 1 }
 0xdaf   :  { %8749 = vsyncpa [#allocation17], 1 }
 0xdb0   :  { %8751 = vsyncpa [#allocation17 + $0x1], 1 }

</bundles_post_ra>
